<compile_context>
chip_gen: v6e
topology: v6e:2x2x1
jax: 0.10.0
libtpu: 0.0.40
codegen_flags: <defaults>
</compile_context>

<pallas_src>
import functools

import jax
import jax.numpy as jnp
import numpy as np
from jax import lax
from jax.experimental import pallas as pl
from jax.experimental.pallas import tpu as pltpu


def _trilinear_lut_kernel(lut_ref, x_ref, o_ref, *, dim: int, dim_pad: int):
    """One tile of pixels.

    lut_ref: (3*dim_pad, dim*dim_pad) f32
             rows = (channel, b_idx padded to dim_pad), cols = (g_idx, r_idx padded)
    x_ref:   (3, TN) f32   rows = (r, g, b) pixel values in [0, 1]
    o_ref:   (3, TN) f32
    """
    d = dim
    dp = dim_pad
    inv_bin = jnp.float32((d - 1) / 1.000001)       # 1 / binsize, as in the CUDA op

    x = x_ref[...].astype(jnp.float32)              # (3, TN)
    s = x * inv_bin
    ids = jnp.floor(s)                              # integer-valued f32 bin indices
    frs = s - ids                                   # fractional offsets in the bin

    rid, gid, bid = ids[0:1, :], ids[1:2, :], ids[2:3, :]   # (1, TN) each
    rd, gd, bd = frs[0:1, :], frs[1:2, :], frs[2:3, :]

    # ---- factored per-axis one-hot interpolation weights (cheap: O(D*TN) VPU work) ----
    iota_g = lax.broadcasted_iota(jnp.int32, (d, 1), 0).astype(jnp.float32)    # (d, 1)
    iota_p = lax.broadcasted_iota(jnp.int32, (dp, 1), 0).astype(jnp.float32)   # (dp, 1)

    wg = (jnp.where(iota_g == gid, 1.0 - gd, 0.0)
          + jnp.where(iota_g == gid + 1.0, gd, 0.0))          # (d, TN)
    wr = (jnp.where(iota_p == rid, 1.0 - rd, 0.0)
          + jnp.where(iota_p == rid + 1.0, rd, 0.0))          # (dp, TN), rows >= d are 0
    wb = (jnp.where(iota_p == bid, 1.0 - bd, 0.0)
          + jnp.where(iota_p == bid + 1.0, bd, 0.0))          # (dp, TN), rows >= d are 0

    # Outer product over (g, r): one broadcast multiply; dp % 8 == 0 so the reshape
    # (d, dp, TN) -> (d*dp, TN) is a tile-aligned relabel.
    wgr = (wg[:, None, :] * wr[None, :, :]).reshape(d * dp, -1)     # (d*dp, TN)

    # ---- MXU: contract the whole (g, r) plane in a single f32 matmul ----
    t = jnp.dot(lut_ref[...], wgr, preferred_element_type=jnp.float32)   # (3*dp, TN)

    # ---- blue-axis contraction: wb is channel-independent, aligned dp-row segments ----
    t3 = t.reshape(3, dp, -1)                        # free relabel (dp % 8 == 0)
    out = jnp.sum(t3 * wb[None, :, :], axis=1)       # (3, TN)
    o_ref[...] = out.astype(o_ref.dtype)             # single unmasked lane-dense store


def generator3dlut_forward(lut, x, *, tile_n: int = 512):
    """Pallas forward of Generator3DLUT_zero: apply `lut` to image batch `x`.

    lut: (3, D, D, D) float32, axes = (channel, b_idx, g_idx, r_idx)
    x:   (B, 3, H, W) float32 in [0, 1]
    returns (B, 3, H, W) float32
    """
    b, c, h, w = x.shape
    assert c == 3
    d = lut.shape[-1]
    dp = ((d + 7) // 8) * 8          # pad b and r LUT axes to a sublane multiple (33 -> 40)
    n = b * h * w

    # Pixels on the lane axis (lane-dense), channels on sublanes.
    x_flat = jnp.transpose(x, (1, 0, 2, 3)).reshape(3, n).astype(jnp.float32)
    n_pad = pl.cdiv(n, tile_n) * tile_n
    if n_pad != n:
        # zero-padded pixels map to valid bin 0 and are discarded afterwards
        x_flat = jnp.pad(x_flat, ((0, 0), (0, n_pad - n)))

    # 2D LUT slab: rows = (channel, b_idx padded), cols = (g_idx, r_idx padded);
    # padded rows/cols are zero and their one-hot weights are zero, so they never leak.
    lut_p = jnp.pad(lut.astype(jnp.float32),
                    ((0, 0), (0, dp - d), (0, 0), (0, dp - d)))
    lut2d = lut_p.reshape(3 * dp, d * dp)

    grid = (n_pad // tile_n,)
    flops = 2 * (3 * dp) * (d * dp) * n_pad             # dominant MXU contraction
    bytes_accessed = 4 * (lut2d.size + 2 * 3 * n_pad)   # LUT once + x + out

    out_flat = pl.pallas_call(
        functools.partial(_trilinear_lut_kernel, dim=d, dim_pad=dp),
        out_shape=jax.ShapeDtypeStruct((3, n_pad), jnp.float32),
        grid=grid,
        in_specs=[
            # LUT: same block every step -> DMA'd into VMEM once, stays resident.
            pl.BlockSpec((3 * dp, d * dp), lambda i: (0, 0)),
            pl.BlockSpec((3, tile_n), lambda i: (0, i)),
        ],
        out_specs=pl.BlockSpec((3, tile_n), lambda i: (0, i)),
        compiler_params=pltpu.CompilerParams(
            dimension_semantics=("parallel",),
            vmem_limit_bytes=64 * 1024 * 1024),
        cost_estimate=pl.CostEstimate(flops=flops, transcendentals=0,
                                      bytes_accessed=bytes_accessed),
    )(lut2d, x_flat)

    out = out_flat[:, :n].reshape(3, b, h, w)
    return jnp.transpose(out, (1, 0, 2, 3))


def trilinear_reference(lut, x):
    """Pure-JAX reference of the CUDA trilinear.forward semantics."""
    d = lut.shape[-1]
    inv_bin = (d - 1) / 1.000001
    r, g, b = x[:, 0], x[:, 1], x[:, 2]                     # (B, H, W)
    sr, sg, sb = r * inv_bin, g * inv_bin, b * inv_bin
    rid_f, gid_f, bid_f = jnp.floor(sr), jnp.floor(sg), jnp.floor(sb)
    rd, gd, bd = sr - rid_f, sg - gid_f, sb - bid_f
    rid = rid_f.astype(jnp.int32)
    gid = gid_f.astype(jnp.int32)
    bid = bid_f.astype(jnp.int32)

    out = jnp.zeros((3,) + r.shape, jnp.float32)
    for db in (0, 1):
        for dg in (0, 1):
            for dr in (0, 1):
                wgt = ((bd if db else 1.0 - bd)
                       * (gd if dg else 1.0 - gd)
                       * (rd if dr else 1.0 - rd))          # (B, H, W)
                val = lut[:, bid + db, gid + dg, rid + dr]   # (3, B, H, W)
                out = out + wgt[None] * val
    return jnp.transpose(out, (1, 0, 2, 3))


# TODO(synk): the custom autograd backward (trilinear.backward) is not implemented;
# only the forward pass of Generator3DLUT_zero is translated here.

if __name__ == "__main__":
    key = jax.random.PRNGKey(0)
    k_lut, k_x = jax.random.split(key)

    dim = 33                      # module default LUT resolution
    batch, height, width = 2, 16, 16

    # Generator3DLUT_zero initializes its LUT parameter to zeros; use a random
    # LUT here so the numerical check is non-trivial (forward semantics are the
    # same for any LUT value).
    lut = jax.random.normal(k_lut, (3, dim, dim, dim), jnp.float32)
    x = jax.random.uniform(k_x, (batch, 3, height, width), jnp.float32)

    out = jax.block_until_ready(generator3dlut_forward(lut, x))
    ref = jax.block_until_ready(trilinear_reference(lut, x))

    assert out.shape == x.shape
    err = float(np.max(np.abs(np.asarray(out) - np.asarray(ref))))
    assert np.allclose(np.asarray(out), np.asarray(ref), rtol=1e-4, atol=1e-4), err

    # The module's actual zero-initialized LUT maps every pixel to zero.
    out_zero = jax.block_until_ready(generator3dlut_forward(jnp.zeros_like(lut), x))
    assert np.allclose(np.asarray(out_zero), 0.0)

    print("KERNEL_OK")
</pallas_src>

<mosaic_0001>
module attributes {stable_mosaic.version = 11 : i64} {
  func.func @_trilinear_lut_kernel(%arg0: i32, %arg1: memref<120x1320xf32, #tpu.memory_space<vmem>>, %arg2: memref<3x512xf32, #tpu.memory_space<vmem>>, %arg3: memref<3x512xf32, #tpu.memory_space<vmem>>) attributes {dimension_semantics = [#tpu.dimension_semantics<parallel>], iteration_bounds = array<i64: 1>, scalar_prefetch = 0 : i64, scratch_operands = 0 : i64, tpu.core_type = #tpu.core_type<tc>, window_params = [{pipeline_mode = #tpu.pipeline_mode<synchronous>, transform_indices = @transform_0, window_bounds = array<i64: 120, 1320>}, {transform_indices = @transform_1, window_bounds = array<i64: 3, 512>}, {transform_indices = @transform_2, window_bounds = array<i64: 3, 512>}]} {
    %c0 = arith.constant 0 : index
    %c0_0 = arith.constant 0 : index
    %0 = vector.load %arg2[%c0, %c0_0] : memref<3x512xf32, #tpu.memory_space<vmem>>, vector<3x512xf32>
    %cst = arith.constant 31.9999676 : f32
    %1 = vector.broadcast %cst : f32 to vector<3x512xf32>
    %2 = arith.mulf %0, %1 : vector<3x512xf32>
    %3 = math.floor %2 : vector<3x512xf32>
    %4 = arith.subf %2, %3 : vector<3x512xf32>
    %5 = vector.extract_strided_slice %3 {offsets = [0, 0], sizes = [1, 512], strides = [1, 1]} : vector<3x512xf32> to vector<1x512xf32>
    %6 = vector.extract_strided_slice %3 {offsets = [1, 0], sizes = [1, 512], strides = [1, 1]} : vector<3x512xf32> to vector<1x512xf32>
    %7 = vector.extract_strided_slice %3 {offsets = [2, 0], sizes = [1, 512], strides = [1, 1]} : vector<3x512xf32> to vector<1x512xf32>
    %8 = vector.extract_strided_slice %4 {offsets = [0, 0], sizes = [1, 512], strides = [1, 1]} : vector<3x512xf32> to vector<1x512xf32>
    %9 = vector.extract_strided_slice %4 {offsets = [1, 0], sizes = [1, 512], strides = [1, 1]} : vector<3x512xf32> to vector<1x512xf32>
    %10 = vector.extract_strided_slice %4 {offsets = [2, 0], sizes = [1, 512], strides = [1, 1]} : vector<3x512xf32> to vector<1x512xf32>
    %11 = tpu.iota {dimensions = array<i32: 0>} : vector<33x1xi32>
    %12 = arith.sitofp %11 : vector<33x1xi32> to vector<33x1xf32>
    %13 = tpu.iota {dimensions = array<i32: 0>} : vector<40x1xi32>
    %14 = arith.sitofp %13 : vector<40x1xi32> to vector<40x1xf32>
    %15 = vector.broadcast %12 : vector<33x1xf32> to vector<33x512xf32>
    %16 = vector.broadcast %6 : vector<1x512xf32> to vector<33x512xf32>
    %17 = arith.cmpf oeq, %15, %16 : vector<33x512xf32>
    %cst_1 = arith.constant 1.000000e+00 : f32
    %18 = vector.broadcast %cst_1 : f32 to vector<1x512xf32>
    %19 = arith.subf %18, %9 : vector<1x512xf32>
    %cst_2 = arith.constant 0.000000e+00 : f32
    %20 = vector.shape_cast %19 : vector<1x512xf32> to vector<1x512xf32>
    %21 = vector.broadcast %20 : vector<1x512xf32> to vector<33x512xf32>
    %22 = vector.broadcast %cst_2 : f32 to vector<33x512xf32>
    %23 = arith.select %17, %21, %22 : vector<33x512xi1>, vector<33x512xf32>
    %cst_3 = arith.constant 1.000000e+00 : f32
    %24 = vector.broadcast %cst_3 : f32 to vector<1x512xf32>
    %25 = arith.addf %6, %24 : vector<1x512xf32>
    %26 = vector.broadcast %12 : vector<33x1xf32> to vector<33x512xf32>
    %27 = vector.broadcast %25 : vector<1x512xf32> to vector<33x512xf32>
    %28 = arith.cmpf oeq, %26, %27 : vector<33x512xf32>
    %cst_4 = arith.constant 0.000000e+00 : f32
    %29 = vector.shape_cast %9 : vector<1x512xf32> to vector<1x512xf32>
    %30 = vector.broadcast %29 : vector<1x512xf32> to vector<33x512xf32>
    %31 = vector.broadcast %cst_4 : f32 to vector<33x512xf32>
    %32 = arith.select %28, %30, %31 : vector<33x512xi1>, vector<33x512xf32>
    %33 = arith.addf %23, %32 : vector<33x512xf32>
    %34 = vector.broadcast %14 : vector<40x1xf32> to vector<40x512xf32>
    %35 = vector.broadcast %5 : vector<1x512xf32> to vector<40x512xf32>
    %36 = arith.cmpf oeq, %34, %35 : vector<40x512xf32>
    %cst_5 = arith.constant 1.000000e+00 : f32
    %37 = vector.broadcast %cst_5 : f32 to vector<1x512xf32>
    %38 = arith.subf %37, %8 : vector<1x512xf32>
    %cst_6 = arith.constant 0.000000e+00 : f32
    %39 = vector.shape_cast %38 : vector<1x512xf32> to vector<1x512xf32>
    %40 = vector.broadcast %39 : vector<1x512xf32> to vector<40x512xf32>
    %41 = vector.broadcast %cst_6 : f32 to vector<40x512xf32>
    %42 = arith.select %36, %40, %41 : vector<40x512xi1>, vector<40x512xf32>
    %cst_7 = arith.constant 1.000000e+00 : f32
    %43 = vector.broadcast %cst_7 : f32 to vector<1x512xf32>
    %44 = arith.addf %5, %43 : vector<1x512xf32>
    %45 = vector.broadcast %14 : vector<40x1xf32> to vector<40x512xf32>
    %46 = vector.broadcast %44 : vector<1x512xf32> to vector<40x512xf32>
    %47 = arith.cmpf oeq, %45, %46 : vector<40x512xf32>
    %cst_8 = arith.constant 0.000000e+00 : f32
    %48 = vector.shape_cast %8 : vector<1x512xf32> to vector<1x512xf32>
    %49 = vector.broadcast %48 : vector<1x512xf32> to vector<40x512xf32>
    %50 = vector.broadcast %cst_8 : f32 to vector<40x512xf32>
    %51 = arith.select %47, %49, %50 : vector<40x512xi1>, vector<40x512xf32>
    %52 = arith.addf %42, %51 : vector<40x512xf32>
    %53 = vector.broadcast %14 : vector<40x1xf32> to vector<40x512xf32>
    %54 = vector.broadcast %7 : vector<1x512xf32> to vector<40x512xf32>
    %55 = arith.cmpf oeq, %53, %54 : vector<40x512xf32>
    %cst_9 = arith.constant 1.000000e+00 : f32
    %56 = vector.broadcast %cst_9 : f32 to vector<1x512xf32>
    %57 = arith.subf %56, %10 : vector<1x512xf32>
    %cst_10 = arith.constant 0.000000e+00 : f32
    %58 = vector.shape_cast %57 : vector<1x512xf32> to vector<1x512xf32>
    %59 = vector.broadcast %58 : vector<1x512xf32> to vector<40x512xf32>
    %60 = vector.broadcast %cst_10 : f32 to vector<40x512xf32>
    %61 = arith.select %55, %59, %60 : vector<40x512xi1>, vector<40x512xf32>
    %cst_11 = arith.constant 1.000000e+00 : f32
    %62 = vector.broadcast %cst_11 : f32 to vector<1x512xf32>
    %63 = arith.addf %7, %62 : vector<1x512xf32>
    %64 = vector.broadcast %14 : vector<40x1xf32> to vector<40x512xf32>
    %65 = vector.broadcast %63 : vector<1x512xf32> to vector<40x512xf32>
    %66 = arith.cmpf oeq, %64, %65 : vector<40x512xf32>
    %cst_12 = arith.constant 0.000000e+00 : f32
    %67 = vector.shape_cast %10 : vector<1x512xf32> to vector<1x512xf32>
    %68 = vector.broadcast %67 : vector<1x512xf32> to vector<40x512xf32>
    %69 = vector.broadcast %cst_12 : f32 to vector<40x512xf32>
    %70 = arith.select %66, %68, %69 : vector<40x512xi1>, vector<40x512xf32>
    %71 = arith.addf %61, %70 : vector<40x512xf32>
    %72 = vector.shape_cast %33 : vector<33x512xf32> to vector<33x1x512xf32>
    %73 = vector.shape_cast %52 : vector<40x512xf32> to vector<1x40x512xf32>
    %74 = vector.broadcast %72 : vector<33x1x512xf32> to vector<33x40x512xf32>
    %75 = vector.broadcast %73 : vector<1x40x512xf32> to vector<33x40x512xf32>
    %76 = arith.mulf %74, %75 : vector<33x40x512xf32>
    %77 = vector.shape_cast %76 : vector<33x40x512xf32> to vector<1320x512xf32>
    %c0_13 = arith.constant 0 : index
    %c0_14 = arith.constant 0 : index
    %78 = vector.load %arg1[%c0_13, %c0_14] : memref<120x1320xf32, #tpu.memory_space<vmem>>, vector<120x1320xf32>
    %cst_15 = arith.constant dense<0.000000e+00> : vector<120x512xf32>
    %79 = tpu.matmul %78, %77, %cst_15 {dimension_numbers = #tpu.dot_dimension_numbers<[1], [0], [0], [1], [0, 0, 1, 1], [], []>} : vector<120x1320xf32>, vector<1320x512xf32>, vector<120x512xf32> -> vector<120x512xf32>
    %80 = vector.shape_cast %79 : vector<120x512xf32> to vector<3x40x512xf32>
    %81 = vector.shape_cast %71 : vector<40x512xf32> to vector<1x40x512xf32>
    %82 = vector.broadcast %81 : vector<1x40x512xf32> to vector<3x40x512xf32>
    %83 = arith.mulf %80, %82 : vector<3x40x512xf32>
    %cst_16 = arith.constant dense<0.000000e+00> : vector<3x512xf32>
    %84 = vector.multi_reduction <add>, %83, %cst_16 [1] : vector<3x40x512xf32> to vector<3x512xf32>
    %c0_17 = arith.constant 0 : index
    %c0_18 = arith.constant 0 : index
    %85 = vector.load %arg3[%c0_17, %c0_18] : memref<3x512xf32, #tpu.memory_space<vmem>>, vector<3x512xf32>
    tpu.vector_store %arg3[%c0_17, %c0_18], %84 {strides = array<i32>} : memref<3x512xf32, #tpu.memory_space<vmem>>, vector<3x512xf32>,
    return
  }
  func.func @transform_0(%arg0: i32) -> (i32, i32) {
    %c0_i32 = arith.constant 0 : i32
    %c0_i32_0 = arith.constant 0 : i32
    %c0_i32_1 = arith.constant 0 : i32
    return %c0_i32, %c0_i32_0 : i32, i32
  }
  func.func @transform_1(%arg0: i32) -> (i32, i32) {
    %c0_i32 = arith.constant 0 : i32
    %c0_i32_0 = arith.constant 0 : i32
    return %c0_i32, %arg0 : i32, i32
  }
  func.func @transform_2(%arg0: i32) -> (i32, i32) {
    %c0_i32 = arith.constant 0 : i32
    %c0_i32_0 = arith.constant 0 : i32
    return %c0_i32, %arg0 : i32, i32
  }
}

</mosaic_0001>

<bundles_post_ra>
// kernel: tpu_custom_call.1
= control target key start
LH: loop header
LB: loop body
LE: loop exit
PB: predicated region body
PF: predicated region fallthrough
CT: control target
= control target key end

     0   :  { %7 = vsyncpa [#allocation3], 0  ;;  %s8820_s0 = inlined_call_operand.hbm [shape: f32[120,1320], index: 0, kind: input, shape index: {}]   ;;  %s8821_s1 = inlined_call_operand.hbm [shape: f32[3,512], index: 1, kind: input, shape index: {}]   ;;  %s8822_s2 = inlined_call_operand.hbm [shape: f32[3,512], index: 2, kind: output, shape index: {}]  }
   0x1   :  { %8 = vsyncpa [#allocation6], 0 }
   0x2   :  { %9 = vsyncpa [#allocation4], 0  ;;  %s5010_s9 = smov [#allocation2]  }
   0x3   :  { %s15_s10 = sshll.u32 %s5010_s9, 4  ;;  %s16_s10 = int_to_ptr.vmem [resolvable:$true] %s15_s10 }
   0x4   :  { %s4952_s11 = scalar_lea.vmem %s16_s10, 21120  ;;  %p4957_p1 = scmp.lt.s32.totalorder %s16_s10, %s16_s10 }
   0x5   :  { %p4953_p0 = scmp.ne.s32.totalorder %s16_s10, %s4952_s11  ;;  %p4958_p2 = scmp.lt.s32.totalorder %s4952_s11, %s4952_s11 }
   0x7   :  { %p4959_p3 = por %p4958_p2, %p4957_p1 }
   0x9   :  { %p4960_p4 = pnand %p4959_p3, %p4953_p0 }
   0xb   :  { %4963 = shalt.err (!%p4960_p4)
}
   0xc   :  { %s5011_s12 = smov 1408   ;;  %s5012_s13 = smov 88  }
   0xd   :  { %21 = dma.hbm_to_vmem [thread:$0]  %s8820_s0, 21120, %s16_s10, [#allocation3], %s5011_s12, %s5011_s12, %s5012_s13  }
   0xe   :  { %s5013_s16 = smov [#allocation5]  }
   0xf   :  { %s28_s17 = sshll.u32 %s5013_s16, 4  ;;  %s29_s17 = int_to_ptr.vmem [resolvable:$true] %s28_s17 }
  0x10   :  { %s4972_s18 = scalar_lea.vmem %s29_s17, 256  ;;  %p4977_p6 = scmp.lt.s32.totalorder %s29_s17, %s29_s17 }
  0x11   :  { %p4973_p5 = scmp.ne.s32.totalorder %s29_s17, %s4972_s18  ;;  %p4978_p7 = scmp.lt.s32.totalorder %s4972_s18, %s4972_s18 }
  0x13   :  { %p4979_p8 = por %p4978_p7, %p4977_p6 }
  0x15   :  { %p4980_p9 = pnand %p4979_p8, %p4973_p5 }
  0x17   :  { %4983 = shalt.err (!%p4980_p9)
}
  0x18   :  { %31 = dma.hbm_to_vmem [thread:$0]  %s8821_s1, 256, %s29_s17, [#allocation6]  }
  0x19   :  { %5004 = dma.done.wait [#allocation3], 21120  }
  0x1a   :  { %5005 = vsyncadd [#allocation3], 4294946176 }
  0x1b   :  { %5006 = dma.done.wait [#allocation6], 256  }
  0x1c   :  { %5007 = vsyncadd [#allocation6], 4294967040  ;;  %v46_v0 = vlaneseq  ;;  %v38_v2 = vld [vmem:[#allocation5] sm:$0x77]  ;;  %v39_v3 = vld [vmem:[#allocation5 + $0x8] sm:$0x77] }
  0x1d   :  { %v40_v4 = vmul.f32 31.999968, %v38_v2  ;;  %v41_v5 = vmul.f32 31.999968, %v39_v3  ;;  %v2440_v6 = vld [vmem:[#allocation2 + $0x18] sm:$0xff]  ;;  %v2438_v9 = vld [vmem:[#allocation2 + $0x8] sm:$0xff] }
  0x1e   :  { %v5038_v1 = vshrl.u32 %v46_v0, 7  ;;  %2867 = vmatprep.mubr.f32.mxu1 %v2440_v6  ;;  %2712 = vmatprep.mubr.f32.mxu0 %v2438_v9  ;;  %v5014_v53 = vmov 1966171168   ;;  %s5016_s0 = smov [#allocation7]  }
  0x1f   :  { %v5044_v10 = vfloor.f32 %v40_v4  ;;  %v5046_v11 = vfloor.f32 %v41_v5  ;;  %v826_v54 = vunpack.c.l.s4 %v5014_v53  ;;  %s4732_s1 = sshll.u32 %s5016_s0, 4  ;;  %s4733_s1 = int_to_ptr.vmem [resolvable:$true] %s4732_s1 }
  0x20   :  { %8946 = vst [vmem:[#allocation11_spill] sm:$0xff] %v5038_v1  ;;  %v5041_v7 = vsub.s32 1, %v5038_v1  ;;  %v65_v8 = vsub.s32 5, %v5038_v1  ;;  %v48_v14 = vadd.s32 8, %v5038_v1  ;;  %v5094_v32 = vsub.s32 4, %v5038_v1  ;;  %s4984_s21 = scalar_lea.vmem %s4733_s1, 256  ;;  %p4989_p11 = scmp.lt.s32.totalorder %s4733_s1, %s4733_s1 }
  0x21   :  { %8947 = vst [vmem:[#allocation12_spill] sm:$0xff] %v5044_v10  ;;  %8948 = vst [vmem:[#allocation13_spill] sm:$0xff] %v5046_v11  ;;  %v5049_v12 = vsub.f32 %v40_v4, %v5044_v10  ;;  %v5052_v13 = vsub.f32 %v41_v5, %v5046_v11  ;;  %v5059_v17 = vadd.f32 1.0, %v5044_v10  ;;  %v5062_v18 = vadd.f32 1.0, %v5046_v11  ;;  %p4985_p10 = scmp.ne.s32.totalorder %s4733_s1, %s4984_s21  ;;  %p4990_p12 = scmp.lt.s32.totalorder %s4984_s21, %s4984_s21 }
  0x22   :  { %v62_v15 = vrot.slane %v5044_v10, %v5041_v7  ;;  %v66_v16 = vrot.slane %v5044_v10, %v65_v8  ;;  %v70_v19 = vrot.slane %v5046_v11, %v5041_v7  ;;  %v74_v20 = vrot.slane %v5046_v11, %v65_v8  ;;  %8956 = vst [vmem:[#allocation21_spill] sm:$0xff] %v5094_v32 }
  0x23   :  { %8949 = vst [vmem:[#allocation14_spill] sm:$0xff] %v5049_v12  ;;  %8950 = vst [vmem:[#allocation15_spill] sm:$0xff] %v5052_v13  ;;  %v5067_v21 = vcvt.s32.f32 %v48_v14  ;;  %v5070_v22 = vsub.f32 1.0, %v5049_v12  ;;  %v5073_v23 = vsub.f32 1.0, %v5052_v13  ;;  %v182_v26 = vrot.slane %v5059_v17, %v5041_v7  ;;  %p4991_p13 = por %p4990_p12, %p4989_p11 }
  0x24   :  { %8951 = vst [vmem:[#allocation16_spill] sm:$0xff] %v5059_v17  ;;  %8952 = vst [vmem:[#allocation17_spill] sm:$0xff] %v5062_v18  ;;  %v5076_v24 = vrot.slane %v62_v15, %v5041_v7  ;;  %v5079_v25 = vrot.slane %v66_v16, %v5041_v7  ;;  %v186_v27 = vrot.slane %v5059_v17, %v65_v8  ;;  %v49_v63 = vadd.s32 16, %v5038_v1 }
  0x25   :  { %8953 = vst [vmem:[#allocation18_spill] sm:$0xff] %v5067_v21  ;;  %8954 = vst [vmem:[#allocation19_spill] sm:$0xff] %v5070_v22  ;;  %v190_v28 = vrot.slane %v5062_v18, %v5041_v7  ;;  %v194_v29 = vrot.slane %v5062_v18, %v65_v8  ;;  %v5088_v30 = vrot.slane %v70_v19, %v5041_v7  ;;  %v5182_v0 = vsub.s32 0, %v5038_v1  ;;  %p4992_p0 = pnand %p4991_p13, %p4985_p10 }
  0x26   :  { %8955 = vst [vmem:[#allocation20_spill] sm:$0xff] %v5073_v23  ;;  %v5091_v31 = vrot.slane %v74_v20, %v5041_v7  ;;  %v122_v33 = vrot.slane %v5070_v22, %v5041_v7  ;;  %v126_v34 = vrot.slane %v5070_v22, %v65_v8  ;;  %v130_v35 = vrot.slane %v5073_v23, %v5041_v7 }
  0x27   :  { %v134_v36 = vrot.slane %v5073_v23, %v65_v8  ;;  %vm99_vm0 = vcmp.eq.f32.partialorder %v5067_v21, %v5076_v24  ;;  %vm100_vm1 = vcmp.eq.f32.partialorder %v5067_v21, %v5079_v25  ;;  %v5107_v37 = vrot.slane %v182_v26, %v5041_v7  ;;  %8957 = vst [vmem:[#allocation22_spill] sm:$0xff] %v5182_v0 }
  0x28   :  { %v5110_v38 = vrot.slane %v186_v27, %v5041_v7  ;;  %v5113_v39 = vrot.slane %v190_v28, %v5041_v7  ;;  %v5116_v40 = vrot.slane %v194_v29, %v5041_v7  ;;  %v240_v41 = vrot.slane %v5049_v12, %v5041_v7 }
  0x29   :  { %v244_v42 = vrot.slane %v5049_v12, %v65_v8  ;;  %vm101_vm2 = vcmp.eq.f32.partialorder %v5067_v21, %v5088_v30  ;;  %vm102_vm3 = vcmp.eq.f32.partialorder %v5067_v21, %v5091_v31  ;;  %v248_v43 = vrot.slane %v5052_v13, %v5041_v7 }
  0x2a   :  { %v252_v44 = vrot.slane %v5052_v13, %v65_v8  ;;  %v5129_v45 = vrot.slane %v122_v33, %v5041_v7  ;;  %v5132_v46 = vrot.slane %v126_v34, %v5041_v7  ;;  %v5135_v47 = vrot.slane %v130_v35, %v5041_v7 }
  0x2b   :  { %v5138_v48 = vrot.slane %v134_v36, %v5041_v7  ;;  %v5141_v49 = vrot.slane %v240_v41, %v5041_v7  ;;  %v5144_v50 = vrot.slane %v244_v42, %v5041_v7  ;;  %v5147_v51 = vrot.slane %v248_v43, %v5041_v7 }
  0x2c   :  { %v5150_v52 = vrot.slane %v252_v44, %v5041_v7  ;;  %vm219_vm4 = vcmp.eq.f32.partialorder %v5067_v21, %v5107_v37  ;;  %vm220_vm5 = vcmp.eq.f32.partialorder %v5067_v21, %v5110_v38  ;;  %vm221_vm6 = vcmp.eq.f32.partialorder %v5067_v21, %v5113_v39 }
  0x2d   :  { %vm222_vm7 = vcmp.eq.f32.partialorder %v5067_v21, %v5116_v40  ;;  %v159_v55 = vsel %vm99_vm0, %v5129_v45, 0.0  ;;  %v160_v56 = vsel %vm100_vm1, %v5132_v46, 0.0  ;;  %v161_v57 = vsel %vm101_vm2, %v5135_v47, 0.0 }
  0x2e   :  { %v162_v58 = vsel %vm102_vm3, %v5138_v48, 0.0  ;;  %v277_v59 = vsel %vm219_vm4, %v5141_v49, 0.0  ;;  %v278_v60 = vsel %vm220_vm5, %v5144_v50, 0.0  ;;  %v279_v61 = vsel %vm221_vm6, %v5147_v51, 0.0 }
  0x2f   :  { %v280_v62 = vsel %vm222_vm7, %v5150_v52, 0.0  ;;  %v320_v2 = vrot.slane %v5044_v10, %v5094_v32  ;;  %v50_v3 = vadd.s32 24, %v5038_v1  ;;  %v51_v4 = vadd.s32 32, %v5038_v1 }
  0x30   :  { %v827_v5 = vunpack.c.0.s8 %v826_v54  ;;  %v5188_v6 = vadd.f32 %v277_v59, %v159_v55  ;;  %v5190_v8 = vadd.f32 %v278_v60, %v160_v56  ;;  %v5192_v9 = vadd.f32 %v279_v61, %v161_v57 }
  0x31   :  { %v5194_v14 = vadd.f32 %v280_v62, %v162_v58  ;;  %v376_v15 = vrot.slane %v5070_v22, %v5094_v32  ;;  %v432_v16 = vrot.slane %v5059_v17, %v5094_v32  ;;  %v5200_v19 = vcvt.s32.f32 %v49_v63 }
  0x32   :  { %v340_v20 = vrot.slane %v320_v2, %v5182_v0  ;;  %v488_v26 = vrot.slane %v5049_v12, %v5094_v32  ;;  %v5206_v27 = vcvt.s32.f32 %v5038_v1  ;;  %v5208_v28 = vcvt.s32.f32 %v50_v3 }
  0x33   :  { %8958 = vst [vmem:[#allocation23_spill] sm:$0xff] %v5200_v19  ;;  %v5210_v29 = vcvt.s32.f32 %v51_v4  ;;  %v5213_v33 = vrot.slane %v432_v16, %v5182_v0  ;;  %v5217_v34 = vsub.s32 %v827_v5, %v5038_v1  ;;  %v889_v35 = vcombine.low %v5188_v6, %v5190_v8 }
  0x34   :  { %8959 = vst [vmem:[#allocation24_spill] sm:$0xff] %v5206_v27  ;;  %8960 = vst [vmem:[#allocation25_spill] sm:$0xff] %v5208_v28  ;;  %vm354_vm8 = vcmp.eq.f32.partialorder %v5067_v21, %v340_v20  ;;  %v891_v36 = vcombine.low %v5192_v9, %v5194_v14  ;;  %v396_v41 = vrot.slane %v376_v15, %v5182_v0 }
  0x35   :  { %8961 = vst [vmem:[#allocation26_spill] sm:$0xff] %v5210_v29  ;;  %v5225_v42 = vrot.slane %v488_v26, %v5182_v0  ;;  %vm350_vm9 = vcmp.eq.f32.partialorder %v5206_v27, %v340_v20  ;;  %vm358_vm10 = vcmp.eq.f32.partialorder %v5200_v19, %v340_v20  ;;  %vm466_vm11 = vcmp.eq.f32.partialorder %v5067_v21, %v5213_v33 }
  0x36   :  { %vm470_vm12 = vcmp.eq.f32.partialorder %v5200_v19, %v5213_v33  ;;  %vm362_vm13 = vcmp.eq.f32.partialorder %v5208_v28, %v340_v20  ;;  %vm366_vm14 = vcmp.eq.f32.partialorder %v5210_v29, %v340_v20  ;;  %v410_v43 = vsel %vm354_vm8, %v396_v41, 0.0 }
  0x37   :  { %v316_v44 = vrot.slane %v5044_v10, %v5182_v0  ;;  %vm462_vm15 = vcmp.eq.f32.partialorder %v5206_v27, %v5213_v33  ;;  %vm474_vm0 = vcmp.eq.f32.partialorder %v5208_v28, %v5213_v33  ;;  %v5242_v53 = vrot.slane %v889_v35, %v5217_v34 }
  0x38   :  { %v5245_v54 = vrot.slane %v891_v36, %v5217_v34  ;;  %v414_v55 = vsel %vm358_vm10, %v396_v41, 0.0  ;;  %v522_v56 = vsel %vm466_vm11, %v5225_v42, 0.0  ;;  %v526_v57 = vsel %vm470_vm12, %v5225_v42, 0.0 }
  0x39   :  { %v372_v58 = vrot.slane %v5070_v22, %v5182_v0  ;;  %v406_v59 = vsel %vm350_vm9, %v396_v41, 0.0  ;;  %v5253_v60 = vsel %vm362_vm13, %v396_v41, 0.0  ;;  %v5255_v61 = vsel %vm366_vm14, %v396_v41, 0.0 }
  0x3a   :  { %v518_v62 = vsel %vm462_vm15, %v5225_v42, 0.0  ;;  %v5259_v63 = vsel %vm474_vm0, %v5225_v42, 0.0  ;;  %v5261_v2 = vadd.f32 %v522_v56, %v410_v43  ;;  %v5263_v3 = vadd.f32 %v526_v57, %v414_v55 }
  0x3b   :  { %v922_v4 = vcombine.high %v5242_v53, %v5245_v54  ;;  %v5268_v5 = vrot.slane %v316_v44, %v5182_v0  ;;  %vm478_vm1 = vcmp.eq.f32.partialorder %v5210_v29, %v5213_v33  ;;  %v5273_v15 = vrot.slane %v372_v58, %v5182_v0 }
  0x3c   :  { %v428_v16 = vrot.slane %v5059_v17, %v5182_v0  ;;  %v484_v20 = vrot.slane %v5049_v12, %v5182_v0  ;;  %vm95_vm2 = vcmp.eq.f32.partialorder %v5206_v27, %v5076_v24  ;;  %vm96_vm4 = vcmp.eq.f32.partialorder %v5206_v27, %v5079_v25 }
  0x3d   :  { %v5282_v26 = vrot.slane %v922_v4, %v5217_v34  ;;  %vm357_vm3 = vcmp.eq.f32.partialorder %v5200_v19, %v5268_v5  ;;  %vm97_vm5 = vcmp.eq.f32.partialorder %v5206_v27, %v5088_v30  ;;  %vm98_vm6 = vcmp.eq.f32.partialorder %v5206_v27, %v5091_v31 }
  0x3e   :  { %v413_v35 = vsel %vm357_vm3, %v5273_v15, 0.0  ;;  %v5292_v36 = vrot.slane %v428_v16, %v5182_v0  ;;  %v5295_v41 = vrot.slane %v484_v20, %v5182_v0  ;;  %v155_v55 = vsel %vm95_vm2, %v5129_v45, 0.0 }
  0x3f   :  { %8962 = vst [vmem:[#allocation27_spill] sm:$0xff] %v5282_v26  ;;  %v5301_v43 = vrot.slane %v5282_v26, %v5041_v7  ;;  %v5305_v44 = vrot.slane %v5282_v26, %v5182_v0  ;;  %v156_v56 = vsel %vm96_vm4, %v5132_v46, 0.0  ;;  %v157_v57 = vsel %vm97_vm5, %v5135_v47, 0.0 }
  0x40   :  { %vm469_vm7 = vcmp.eq.f32.partialorder %v5200_v19, %v5292_v36  ;;  %v158_v58 = vsel %vm98_vm6, %v5138_v48, 0.0  ;;  %vm215_vm8 = vcmp.eq.f32.partialorder %v5206_v27, %v5107_v37  ;;  %vm216_vm9 = vcmp.eq.f32.partialorder %v5206_v27, %v5110_v38 }
  0x41   :  { %8963 = vst [vmem:[#allocation28_spill] sm:$0xff] %v5305_v44  ;;  %v1966_v4 = vmul.f32 %v5301_v43, %v5263_v3  ;;  %v525_v16 = vsel %vm469_vm7, %v5295_v41, 0.0  ;;  %vm217_vm10 = vcmp.eq.f32.partialorder %v5206_v27, %v5113_v39  ;;  %vm218_vm11 = vcmp.eq.f32.partialorder %v5206_v27, %v5116_v40 }
  0x42   :  { %v5322_v20 = vadd.f32 %v525_v16, %v413_v35  ;;  %v273_v12 = vsel %vm215_vm8, %v5141_v49, 0.0  ;;  %v274_v22 = vsel %vm216_vm9, %v5144_v50, 0.0  ;;  %v275_v17 = vsel %vm217_vm10, %v5147_v51, 0.0 }
  0x43   :  { %2803 = vmatprep.subr.mxu1 %v1966_v4  ;;  %v276_v10 = vsel %vm218_vm11, %v5150_v52, 0.0  ;;  %v5330_v1 = vadd.f32 %v273_v12, %v155_v55  ;;  %v5332_v13 = vadd.f32 %v274_v22, %v156_v56  ;;  %v5336_v16 = vadd.f32 %v275_v17, %v157_v57 }
  0x44   :  { %v1965_v35 = vmul.f32 %v5305_v44, %v5322_v20  ;;  %v5338_v23 = vadd.f32 %v276_v10, %v158_v58  ;;  %v1962_v18 = vmul.f32 %v5301_v43, %v5261_v2  ;;  %vm349_vm12 = vcmp.eq.f32.partialorder %v5206_v27, %v5268_v5 }
  0x45   :  { %v821_v4 = vcombine.low %v5330_v1, %v5332_v13  ;;  %vm461_vm13 = vcmp.eq.f32.partialorder %v5206_v27, %v5292_v36  ;;  %vm353_vm14 = vcmp.eq.f32.partialorder %v5067_v21, %v5268_v5  ;;  %v405_v12 = vsel %vm349_vm12, %v5273_v15, 0.0 }
  0x46   :  { %2804 = vmatpush1.msra.mxu1 %v1965_v35  ;;  %v823_v10 = vcombine.low %v5336_v16, %v5338_v23  ;;  %v517_v17 = vsel %vm461_vm13, %v5295_v41, 0.0  ;;  %v409_v22 = vsel %vm353_vm14, %v5273_v15, 0.0  ;;  %v534_v55 = vsel %vm478_vm1, %v5225_v42, 0.0 }
  0x47   :  { %v5359_v56 = vadd.f32 %v518_v62, %v406_v59  ;;  %v831_v57 = vrot.slane %v821_v4, %v5217_v34  ;;  %2805 = vmatprep.subr.mxu1 %v1962_v18  ;;  %vm465_vm15 = vcmp.eq.f32.partialorder %v5067_v21, %v5292_v36  ;;  %vm365_vm0 = vcmp.eq.f32.partialorder %v5210_v29, %v5268_v5 }
  0x48   :  { %v845_v58 = vrot.slane %v823_v10, %v5217_v34  ;;  %v521_v35 = vsel %vm465_vm15, %v5295_v41, 0.0  ;;  %vm477_vm2 = vcmp.eq.f32.partialorder %v5210_v29, %v5292_v36  ;;  %v5370_v33 = vadd.f32 %v517_v17, %v405_v12 }
  0x49   :  { %v5372_v42 = vadd.f32 %v521_v35, %v409_v22  ;;  %v1958_v18 = vmul.f32 %v5301_v43, %v5359_v56  ;;  %v421_v59 = vsel %vm365_vm0, %v5273_v15, 0.0  ;;  %v533_v10 = vsel %vm477_vm2, %v5295_v41, 0.0 }
  0x4a   :  { %v854_v62 = vcombine.high %v831_v57, %v845_v58  ;;  %v853_v4 = vcombine.low %v831_v57, %v845_v58  ;;  %v921_v21 = vcombine.low %v5242_v53, %v5245_v54  ;;  %v1957_v12 = vmul.f32 %v5305_v44, %v5370_v33 }
  0x4b   :  { %v1961_v27 = vmul.f32 %v5305_v44, %v5372_v42  ;;  %vm361_vm1 = vcmp.eq.f32.partialorder %v5208_v28, %v5268_v5  ;;  %vm473_vm3 = vcmp.eq.f32.partialorder %v5208_v28, %v5292_v36  ;;  %v5400_v57 = vadd.f32 %v5259_v63, %v5253_v60 }
  0x4c   :  { %v5389_v17 = vrot.slane %v854_v62, %v5217_v34  ;;  %v5392_v22 = vrot.slane %v853_v4, %v5217_v34  ;;  %v5395_v53 = vrot.slane %v921_v21, %v5217_v34  ;;  %v417_v54 = vsel %vm361_vm1, %v5273_v15, 0.0 }
  0x4d   :  { %v5403_v5 = vadd.f32 %v534_v55, %v5255_v61  ;;  %2806 = vmatpush1.msra.mxu1 %v1961_v27  ;;  %v529_v36 = vsel %vm473_vm3, %v5295_v41, 0.0  ;;  %v5414_v15 = vadd.f32 %v533_v10, %v421_v59  ;;  %v822_v63 = vcombine.high %v5330_v1, %v5332_v13 }
  0x4e   :  { %8964 = vst [vmem:[#allocation29_spill] sm:$0xff] %v5389_v17  ;;  %8965 = vst [vmem:[#allocation30_spill] sm:$0xff] %v5392_v22  ;;  %v5408_v58 = vcombine.high %v5389_v17, %v5389_v17  ;;  %v5412_v21 = vcombine.high %v5392_v22, %v5392_v22  ;;  %2807 = vmatprep.subr.mxu1 %v1958_v18  ;;  %v1252_v60 = vrot.slane %v5395_v53, %v5041_v7 }
  0x4f   :  { %8966 = vst [vmem:[#allocation31_spill] sm:$0xff] %v5395_v53  ;;  %2808 = vmatpush1.msra.mxu1 %v1957_v12  ;;  %v5418_v61 = vadd.f32 %v529_v36, %v417_v54  ;;  %v1248_v27 = vrot.slane %v5395_v53, %v5182_v0  ;;  %v824_v41 = vcombine.high %v5336_v16, %v5338_v23 }
  0x50   :  { %8967 = vst [vmem:[#allocation32_spill] sm:$0xff] %v5408_v58  ;;  %8968 = vst [vmem:[#allocation33_spill] sm:$0xff] %v5412_v21  ;;  %v5428_v55 = vrot.slane %v5408_v58, %v5041_v7  ;;  %v5432_v35 = vrot.slane %v5408_v58, %v5182_v0  ;;  %v1156_v18 = vrot.slane %v5412_v21, %v5041_v7 }
  0x51   :  { %v1152_v59 = vrot.slane %v5412_v21, %v5182_v0  ;;  %v1954_v62 = vmul.f32 %v1252_v60, %v5403_v5  ;;  %v1953_v1 = vmul.f32 %v1248_v27, %v5414_v15  ;;  %v1950_v13 = vmul.f32 %v1252_v60, %v5400_v57 }
  0x52   :  { %v1838_v23 = vmul.f32 %v5428_v55, %v5359_v56  ;;  %v1837_v16 = vmul.f32 %v5432_v35, %v5370_v33  ;;  %v1834_v4 = vmul.f32 %v1156_v18, %v5403_v5  ;;  %v1949_v10 = vmul.f32 %v1248_v27, %v5418_v61 }
  0x53   :  { %v1833_v12 = vmul.f32 %v1152_v59, %v5414_v15  ;;  %2809 = vmatprep.subr.mxu1 %v1954_v62  ;;  %v838_v54 = vrot.slane %v822_v63, %v5217_v34  ;;  %v1830_v36 = vmul.f32 %v1156_v18, %v5400_v57  ;;  %v1946_v21 = vmul.f32 %v1252_v60, %v5263_v3 }
  0x54   :  { %2648 = vmatprep.subr.mxu0 %v1838_v23  ;;  %2810 = vmatpush1.msra.mxu1 %v1953_v1  ;;  %v852_v58 = vrot.slane %v824_v41, %v5217_v34  ;;  %v1829_v11 = vmul.f32 %v1152_v59, %v5418_v61  ;;  %v1945_v32 = vmul.f32 %v1248_v27, %v5322_v20 }
  0x55   :  { %2649 = vmatpush1.msra.mxu0 %v1837_v16  ;;  %2811 = vmatprep.subr.mxu1 %v1950_v13  ;;  %v1942_v29 = vmul.f32 %v1252_v60, %v5261_v2  ;;  %v1826_v62 = vmul.f32 %v1156_v18, %v5263_v3  ;;  %v1941_v63 = vmul.f32 %v1248_v27, %v5372_v42 }
  0x56   :  { %2650 = vmatprep.subr.mxu0 %v1834_v4  ;;  %2812 = vmatpush1.msra.mxu1 %v1949_v10  ;;  %v1825_v1 = vmul.f32 %v1152_v59, %v5322_v20  ;;  %v1140_v41 = vrot.slane %v5389_v17, %v5041_v7  ;;  %v1938_v23 = vmul.f32 %v1252_v60, %v5359_v56 }
  0x57   :  { %2651 = vmatpush1.msra.mxu0 %v1833_v12  ;;  %2813 = vmatprep.subr.mxu1 %v1946_v21  ;;  %v1822_v13 = vmul.f32 %v1156_v18, %v5261_v2  ;;  %v1937_v16 = vmul.f32 %v1248_v27, %v5370_v33  ;;  %v856_v4 = vcombine.high %v838_v54, %v852_v58 }
  0x58   :  { %2652 = vmatprep.subr.mxu0 %v1830_v36  ;;  %2814 = vmatpush1.msra.mxu1 %v1945_v32  ;;  %v1821_v10 = vmul.f32 %v1152_v59, %v5372_v42  ;;  %v1136_v12 = vrot.slane %v5389_v17, %v5182_v0  ;;  %v1818_v21 = vmul.f32 %v1156_v18, %v5359_v56 }
  0x59   :  { %2653 = vmatpush1.msra.mxu0 %v1829_v11  ;;  %2815 = vmatprep.subr.mxu1 %v1942_v29  ;;  %v5468_v60 = vrot.slane %v856_v4, %v5217_v34  ;;  %v1817_v32 = vmul.f32 %v1152_v59, %v5370_v33  ;;  %v1814_v11 = vmul.f32 %v1140_v41, %v5403_v5 }
  0x5a   :  { %2654 = vmatprep.subr.mxu0 %v1826_v62  ;;  %2816 = vmatpush1.msra.mxu1 %v1941_v63  ;;  %v855_v27 = vcombine.low %v838_v54, %v852_v58  ;;  %v1813_v18 = vmul.f32 %v1136_v12, %v5414_v15  ;;  %v1810_v36 = vmul.f32 %v1140_v41, %v5400_v57 }
  0x5b   :  { %8969 = vst [vmem:[#allocation34_spill] sm:$0xff] %v5468_v60  ;;  %2655 = vmatpush1.msra.mxu0 %v1825_v1  ;;  %2817 = vmatprep.subr.mxu1 %v1938_v23  ;;  %v5474_v29 = vcombine.high %v5468_v60, %v5468_v60  ;;  %v1809_v62 = vmul.f32 %v1136_v12, %v5418_v61 }
  0x5c   :  { %2656 = vmatprep.subr.mxu0 %v1822_v13  ;;  %2818 = vmatpush1.msra.mxu1 %v1937_v16  ;;  %v890_v59 = vcombine.high %v5188_v6, %v5190_v8  ;;  %v1124_v58 = vrot.slane %v5392_v22, %v5041_v7  ;;  %v5488_v54 = vrot.slane %v855_v27, %v5217_v34 }
  0x5d   :  { %8970 = vst [vmem:[#allocation35_spill] sm:$0xff] %v5474_v29  ;;  %2657 = vmatpush1.msra.mxu0 %v1821_v10  ;;  %v1236_v63 = vrot.slane %v5474_v29, %v5041_v7  ;;  %v1232_v1 = vrot.slane %v5474_v29, %v5182_v0  ;;  %v1806_v23 = vmul.f32 %v1140_v41, %v5263_v3 }
  0x5e   :  { %2658 = vmatprep.subr.mxu0 %v1818_v21  ;;  %8971 = vst [vmem:[#allocation36_spill] sm:$0xff] %v5488_v54  ;;  %v1805_v13 = vmul.f32 %v1136_v12, %v5322_v20  ;;  %v1802_v6 = vmul.f32 %v1140_v41, %v5261_v2  ;;  %v892_v8 = vcombine.high %v5192_v9, %v5194_v14 }
  0x5f   :  { %2659 = vmatpush1.msra.mxu0 %v1817_v32  ;;  %v1934_v16 = vmul.f32 %v1236_v63, %v5403_v5  ;;  %v1933_v4 = vmul.f32 %v1232_v1, %v5414_v15  ;;  %v1930_v10 = vmul.f32 %v1236_v63, %v5400_v57  ;;  %v1120_v21 = vrot.slane %v5392_v22, %v5182_v0 }
  0x60   :  { %2660 = vmatprep.subr.mxu0 %v1814_v11  ;;  %v1929_v32 = vmul.f32 %v1232_v1, %v5418_v61  ;;  %v1801_v27 = vmul.f32 %v1136_v12, %v5372_v42  ;;  %v1798_v29 = vmul.f32 %v1140_v41, %v5359_v56  ;;  %v1797_v17 = vmul.f32 %v1136_v12, %v5370_v33 }
  0x61   :  { %2661 = vmatpush1.msra.mxu0 %v1813_v18  ;;  %2819 = vmatprep.subr.mxu1 %v1934_v16  ;;  %v1926_v9 = vmul.f32 %v1236_v63, %v5263_v3  ;;  %v1794_v14 = vmul.f32 %v1124_v58, %v5403_v5  ;;  %v5508_v11 = vcombine.high %v5488_v54, %v5488_v54 }
  0x62   :  { %2662 = vmatprep.subr.mxu0 %v1810_v36  ;;  %2820 = vmatpush1.msra.mxu1 %v1933_v4  ;;  %v1925_v18 = vmul.f32 %v1232_v1, %v5322_v20  ;;  %v5512_v22 = vrot.slane %v890_v59, %v5217_v34  ;;  %v5515_v41 = vrot.slane %v892_v8, %v5217_v34 }
  0x63   :  { %8972 = vst [vmem:[#allocation37_spill] sm:$0xff] %v5508_v11  ;;  %2663 = vmatpush1.msra.mxu0 %v1809_v62  ;;  %2821 = vmatprep.subr.mxu1 %v1930_v10  ;;  %v1922_v12 = vmul.f32 %v1236_v63, %v5261_v2  ;;  %v1793_v36 = vmul.f32 %v1120_v21, %v5414_v15 }
  0x64   :  { %2664 = vmatprep.subr.mxu0 %v1806_v23  ;;  %v1220_v16 = vrot.slane %v5508_v11, %v5041_v7  ;;  %2822 = vmatpush1.msra.mxu1 %v1929_v32  ;;  %v1921_v62 = vmul.f32 %v1232_v1, %v5372_v42  ;;  %v1216_v59 = vrot.slane %v5508_v11, %v5182_v0 }
  0x65   :  { %2665 = vmatpush1.msra.mxu0 %v1805_v13  ;;  %v923_v8 = vcombine.low %v5512_v22, %v5515_v41  ;;  %2823 = vmatprep.subr.mxu1 %v1926_v9  ;;  %v1918_v23 = vmul.f32 %v1236_v63, %v5359_v56  ;;  %v1790_v4 = vmul.f32 %v1124_v58, %v5400_v57 }
  0x66   :  { %2666 = vmatprep.subr.mxu0 %v1802_v6  ;;  %v1789_v10 = vmul.f32 %v1120_v21, %v5418_v61  ;;  %2824 = vmatpush1.msra.mxu1 %v1925_v18  ;;  %v1917_v13 = vmul.f32 %v1232_v1, %v5370_v33  ;;  %v1786_v32 = vmul.f32 %v1124_v58, %v5263_v3 }
  0x67   :  { %2667 = vmatpush1.msra.mxu0 %v1801_v27  ;;  %v1785_v28 = vmul.f32 %v1120_v21, %v5322_v20  ;;  %2825 = vmatprep.subr.mxu1 %v1922_v12  ;;  %v1914_v11 = vmul.f32 %v1220_v16, %v5403_v5  ;;  %v1782_v6 = vmul.f32 %v1124_v58, %v5261_v2 }
  0x68   :  { %2668 = vmatprep.subr.mxu0 %v1798_v29  ;;  %v5535_v63 = vrot.slane %v923_v8, %v5217_v34  ;;  %2826 = vmatpush1.msra.mxu1 %v1921_v62  ;;  %v1913_v27 = vmul.f32 %v1216_v59, %v5414_v15  ;;  %v1781_v9 = vmul.f32 %v1120_v21, %v5372_v42 }
  0x69   :  { %2669 = vmatpush1.msra.mxu0 %v1797_v17  ;;  %v1778_v1 = vmul.f32 %v1124_v58, %v5359_v56  ;;  %2827 = vmatprep.subr.mxu1 %v1918_v23  ;;  %v1910_v29 = vmul.f32 %v1220_v16, %v5400_v57  ;;  %v1777_v12 = vmul.f32 %v1120_v21, %v5370_v33 }
  0x6a   :  { %8973 = vst [vmem:[#allocation38_spill] sm:$0xff] %v5535_v63  ;;  %2670 = vmatprep.subr.mxu0 %v1794_v14  ;;  %v5543_v18 = vrot.slane %v5535_v63, %v5041_v7  ;;  %2828 = vmatpush1.msra.mxu1 %v1917_v13  ;;  %v1909_v17 = vmul.f32 %v1216_v59, %v5418_v61 }
  0x6b   :  { %2671 = vmatpush1.msra.mxu0 %v1793_v36  ;;  %v5549_v62 = vrot.slane %v5535_v63, %v5182_v0  ;;  %v5553_v58 = vrot.slane %v5468_v60, %v5041_v7  ;;  %2829 = vmatprep.subr.mxu1 %v1914_v11  ;;  %v1906_v14 = vmul.f32 %v1220_v16, %v5263_v3 }
  0x6c   :  { %8974 = vst [vmem:[#allocation39_spill] sm:$0xff] %v5543_v18  ;;  %2672 = vmatprep.subr.mxu0 %v1790_v4  ;;  %v1200_v8 = vrot.slane %v5468_v60, %v5182_v0  ;;  %v5560_v21 = vcombine.high %v5282_v26, %v5282_v26  ;;  %2830 = vmatpush1.msra.mxu1 %v1913_v27 }
  0x6d   :  { %8975 = vst [vmem:[#allocation40_spill] sm:$0xff] %v5549_v62  ;;  %2673 = vmatpush1.msra.mxu0 %v1789_v10  ;;  %v1905_v36 = vmul.f32 %v1216_v59, %v5322_v20  ;;  %v1902_v13 = vmul.f32 %v1220_v16, %v5261_v2  ;;  %2831 = vmatprep.subr.mxu1 %v1910_v29 }
  0x6e   :  { %8976 = vst [vmem:[#allocation41_spill] sm:$0xff] %v5560_v21  ;;  %2674 = vmatprep.subr.mxu0 %v1786_v32  ;;  %v2030_v11 = vmul.f32 %v5543_v18, %v5400_v57  ;;  %v1901_v4 = vmul.f32 %v1216_v59, %v5372_v42  ;;  %v1898_v60 = vmul.f32 %v1220_v16, %v5359_v56 }
  0x6f   :  { %2675 = vmatpush1.msra.mxu0 %v1785_v28  ;;  %2832 = vmatpush1.msra.mxu1 %v1909_v17  ;;  %v2029_v10 = vmul.f32 %v5549_v62, %v5418_v61  ;;  %v1897_v27 = vmul.f32 %v1216_v59, %v5370_v33  ;;  %v1894_v23 = vmul.f32 %v5553_v58, %v5403_v5 }
  0x70   :  { %2676 = vmatprep.subr.mxu0 %v1782_v6  ;;  %2833 = vmatprep.subr.mxu1 %v1906_v14  ;;  %v2026_v32 = vmul.f32 %v5543_v18, %v5263_v3  ;;  %v1893_v29 = vmul.f32 %v1200_v8, %v5414_v15  ;;  %v1300_v16 = vrot.slane %v5560_v21, %v5041_v7 }
  0x71   :  { %2677 = vmatpush1.msra.mxu0 %v1781_v9  ;;  %2834 = vmatpush1.msra.mxu1 %v1905_v36  ;;  %v2025_v28 = vmul.f32 %v5549_v62, %v5322_v20  ;;  %v1890_v59 = vmul.f32 %v5553_v58, %v5400_v57  ;;  %v1296_v6 = vrot.slane %v5560_v21, %v5182_v0 }
  0x72   :  { %2678 = vmatprep.subr.mxu0 %v1778_v1  ;;  %2835 = vmatprep.subr.mxu1 %v2030_v11  ;;  %v2022_v17 = vmul.f32 %v5543_v18, %v5261_v2  ;;  %v2021_v14 = vmul.f32 %v5549_v62, %v5372_v42  ;;  %v1889_v9 = vmul.f32 %v1200_v8, %v5418_v61 }
  0x73   :  { %2679 = vmatpush1.msra.mxu0 %v1777_v12  ;;  %2836 = vmatpush2.msra.mxu1 %v2029_v10  ;;  %v2018_v36 = vmul.f32 %v5543_v18, %v5359_v56  ;;  %v2017_v26 = vmul.f32 %v5549_v62, %v5370_v33  ;;  %v1886_v1 = vmul.f32 %v5553_v58, %v5263_v3 }
  0x74   :  { %2680 = vmatprep.subr.mxu0 %v1902_v13  ;;  %2837 = vmatprep.subr.mxu1 %v2026_v32  ;;  %v2014_v11 = vmul.f32 %v1300_v16, %v5403_v5  ;;  %v2010_v21 = vmul.f32 %v1300_v16, %v5400_v57  ;;  %v1885_v63 = vmul.f32 %v1200_v8, %v5322_v20 }
  0x75   :  { %2681 = vmatpush2.msra.mxu0 %v1901_v4  ;;  %2838 = vmatpush2.msra.mxu1 %v2025_v28  ;;  %v2013_v12 = vmul.f32 %v1296_v6, %v5414_v15  ;;  %v1882_v10 = vmul.f32 %v5553_v58, %v5261_v2  ;;  %v5605_v62 = vcombine.high %v5395_v53, %v5395_v53 }
  0x76   :  { %2682 = vmatprep.subr.mxu0 %v1898_v60  ;;  %2839 = vmatprep.subr.mxu1 %v2022_v17  ;;  %v2009_v13 = vmul.f32 %v1296_v6, %v5418_v61  ;;  %v2006_v32 = vmul.f32 %v1300_v16, %v5263_v3  ;;  %v1881_v18 = vmul.f32 %v1200_v8, %v5372_v42 }
  0x77   :  { %8977 = vst [vmem:[#allocation42_spill] sm:$0xff] %v5605_v62  ;;  %2683 = vmatpush2.msra.mxu0 %v1897_v27  ;;  %2840 = vmatpush2.msra.mxu1 %v2021_v14  ;;  %v2005_v4 = vmul.f32 %v1296_v6, %v5322_v20  ;;  %v1188_v28 = vrot.slane %v5488_v54, %v5041_v7 }
  0x78   :  { %v1184_v44 = vrot.slane %v5488_v54, %v5182_v0  ;;  %2684 = vmatprep.subr.mxu0 %v1894_v23  ;;  %2841 = vmatprep.subr.mxu1 %v2018_v36  ;;  %v1878_v60 = vmul.f32 %v5553_v58, %v5359_v56  ;;  %v2002_v17 = vmul.f32 %v1300_v16, %v5261_v2 }
  0x79   :  { %v1877_v53 = vmul.f32 %v1200_v8, %v5370_v33  ;;  %2685 = vmatpush2.msra.mxu0 %v1893_v29  ;;  %2842 = vmatpush2.msra.mxu1 %v2017_v26  ;;  %v2001_v27 = vmul.f32 %v1296_v6, %v5372_v42  ;;  %v5622_v14 = vrot.slane %v5605_v62, %v5041_v7 }
  0x7a   :  { %v5626_v54 = vrot.slane %v5605_v62, %v5182_v0  ;;  %2686 = vmatprep.subr.mxu0 %v1890_v59  ;;  %2843 = vmatprep.subr.mxu1 %v2014_v11  ;;  %v1998_v58 = vmul.f32 %v1300_v16, %v5359_v56  ;;  %v1997_v23 = vmul.f32 %v1296_v6, %v5370_v33 }
  0x7b   :  { %v5632_v8 = vmul.f32 %v5428_v55, %v5403_v5  ;;  %2687 = vmatpush2.msra.mxu0 %v1889_v9  ;;  %2844 = vmatpush2.msra.mxu1 %v2013_v12  ;;  %v1874_v26 = vmul.f32 %v1188_v28, %v5403_v5  ;;  %v1873_v29 = vmul.f32 %v1184_v44, %v5414_v15 }
  0x7c   :  { %v1870_v36 = vmul.f32 %v1188_v28, %v5400_v57  ;;  %2688 = vmatprep.subr.mxu0 %v1886_v1  ;;  %2845 = vmatprep.subr.mxu1 %v2010_v21  ;;  %v1869_v59 = vmul.f32 %v1184_v44, %v5418_v61  ;;  %v1866_v16 = vmul.f32 %v1188_v28, %v5263_v3 }
  0x7d   :  { %v1865_v6 = vmul.f32 %v1184_v44, %v5322_v20  ;;  %2689 = vmatpush2.msra.mxu0 %v1885_v63  ;;  %2846 = vmatpush2.msra.mxu1 %v2009_v13  ;;  %v1994_v9 = vmul.f32 %v5622_v14, %v5403_v5  ;;  %v1993_v11 = vmul.f32 %v5626_v54, %v5414_v15 }
  0x7e   :  { %v1862_v12 = vmul.f32 %v1188_v28, %v5261_v2  ;;  %2690 = vmatprep.subr.mxu0 %v1882_v10  ;;  %2847 = vmatprep.subr.mxu1 %v2006_v32  ;;  %v1990_v21 = vmul.f32 %v5622_v14, %v5400_v57  ;;  %v1989_v1 = vmul.f32 %v5626_v54, %v5418_v61 }
  0x7f   :  { %v1986_v63 = vmul.f32 %v5622_v14, %v5263_v3  ;;  %2691 = vmatpush2.msra.mxu0 %v1881_v18  ;;  %2848 = vmatpush2.msra.mxu1 %v2005_v4  ;;  %v1861_v13 = vmul.f32 %v1184_v44, %v5372_v42  ;;  %v1985_v62 = vmul.f32 %v5626_v54, %v5322_v20 }
  0x80   :  { %v1858_v0 = vmul.f32 %v1188_v28, %v5359_v56  ;;  %2692 = vmatprep.subr.mxu0 %v1878_v60  ;;  %2849 = vmatprep.subr.mxu1 %v2002_v17  ;;  %v1982_v10 = vmul.f32 %v5622_v14, %v5261_v2  ;;  %v1857_v32 = vmul.f32 %v1184_v44, %v5370_v33 }
  0x81   :  { %vm103_vm4 = vcmp.eq.f32.partialorder %v5200_v19, %v5076_v24  ;;  %2693 = vmatpush2.msra.mxu0 %v1877_v53  ;;  %2850 = vmatpush2.msra.mxu1 %v2001_v27  ;;  %vm104_vm5 = vcmp.eq.f32.partialorder %v5200_v19, %v5079_v25  ;;  %vm105_vm6 = vcmp.eq.f32.partialorder %v5200_v19, %v5088_v30 }
  0x82   :  { %vm106_vm7 = vcmp.eq.f32.partialorder %v5200_v19, %v5091_v31  ;;  %v163_v18 = vsel %vm103_vm4, %v5129_v45, 0.0  ;;  %2694 = vmatprep.subr.mxu0 %v1874_v26  ;;  %2851 = vmatprep.subr.mxu1 %v1998_v58  ;;  %v164_v44 = vsel %vm104_vm5, %v5132_v46, 0.0  ;;  %v165_v4 = vsel %vm105_vm6, %v5135_v47, 0.0 }
  0x83   :  { %v166_v53 = vsel %vm106_vm7, %v5138_v48, 0.0  ;;  %vm223_vm8 = vcmp.eq.f32.partialorder %v5200_v19, %v5107_v37  ;;  %2695 = vmatpush2.msra.mxu0 %v1873_v29  ;;  %2852 = vmatpush2.msra.mxu1 %v1997_v23  ;;  %vm224_vm9 = vcmp.eq.f32.partialorder %v5200_v19, %v5110_v38  ;;  %vm225_vm10 = vcmp.eq.f32.partialorder %v5200_v19, %v5113_v39 }
  0x84   :  { %vm226_vm11 = vcmp.eq.f32.partialorder %v5200_v19, %v5116_v40  ;;  %v281_v28 = vsel %vm223_vm8, %v5141_v49, 0.0  ;;  %2696 = vmatprep.subr.mxu0 %v1870_v36  ;;  %2853 = vmatprep.subr.mxu1 %v1994_v9  ;;  %v282_v60 = vsel %vm224_vm9, %v5144_v50, 0.0  ;;  %v283_v17 = vsel %vm225_vm10, %v5147_v51, 0.0 }
  0x85   :  { %v284_v27 = vsel %vm226_vm11, %v5150_v52, 0.0  ;;  %v5682_v58 = vadd.f32 %v281_v28, %v163_v18  ;;  %2697 = vmatpush2.msra.mxu0 %v1869_v59  ;;  %2854 = vmatpush2.msra.mxu1 %v1993_v11  ;;  %v5684_v23 = vadd.f32 %v282_v60, %v164_v44  ;;  %v5686_v26 = vadd.f32 %v283_v17, %v165_v4  ;;  %v8982_v28 = vld [vmem:[#allocation22_spill] sm:$0xff] }
  0x86   :  { %v5688_v29 = vadd.f32 %v284_v27, %v166_v53  ;;  %2698 = vmatprep.subr.mxu0 %v1866_v16  ;;  %2855 = vmatprep.subr.mxu1 %v1990_v21  ;;  %v1981_v36 = vmul.f32 %v5626_v54, %v5372_v42  ;;  %v1978_v9 = vmul.f32 %v5622_v14, %v5359_v56  ;;  %v2439_v27 = vld [vmem:[#allocation2 + $0x10] sm:$0xff] }
  0x87   :  { %v8978_v18 = vcombine.high %v5512_v22, %v5515_v41  ;;  %2699 = vmatpush2.msra.mxu0 %v1865_v6  ;;  %2856 = vmatpush2.msra.mxu1 %v1989_v1  ;;  %v1853_v11 = vmul.f32 %v5432_v35, %v5414_v15  ;;  %v958_v16 = vcombine.high %v5682_v58, %v5684_v23 }
  0x88   :  { %v960_v21 = vcombine.high %v5686_v26, %v5688_v29  ;;  %2700 = vmatprep.subr.mxu0 %v1862_v12  ;;  %2857 = vmatprep.subr.mxu1 %v1986_v63  ;;  %v1977_v14 = vmul.f32 %v5626_v54, %v5370_v33  ;;  %v1850_v22 = vmul.f32 %v5428_v55, %v5400_v57  ;;  %v8981_v63 = vld [vmem:[#allocation28_spill] sm:$0xff] }
  0x89   :  { %v5698_v59 = vrot.slane %v8978_v18, %v5217_v34  ;;  %2701 = vmatpush2.msra.mxu0 %v1861_v13  ;;  %2858 = vmatpush2.msra.mxu1 %v1985_v62  ;;  %v1974_v6 = vmul.f32 %v5301_v43, %v5403_v5  ;;  %v974_v1 = vrot.slane %v958_v16, %v5217_v34 }
  0x8a   :  { %v988_v12 = vrot.slane %v960_v21, %v5217_v34  ;;  %2702 = vmatprep.subr.mxu0 %v1858_v0  ;;  %2859 = vmatprep.subr.mxu1 %v1982_v10  ;;  %v1849_v54 = vmul.f32 %v5432_v35, %v5418_v61  ;;  %v1973_v44 = vmul.f32 %v8981_v63, %v5414_v15  ;;  %v2437_v21 = vld [vmem:[#allocation2] sm:$0xff] }
  0x8b   :  { %8979 = vst [vmem:[#allocation43_spill] sm:$0xff] %v5698_v59  ;;  %v5712_v41 = vcombine.high %v5698_v59, %v5698_v59  ;;  %v1846_v4 = vmul.f32 %v5428_v55, %v5263_v3  ;;  %2703 = vmatpush2.msra.mxu0 %v1857_v32  ;;  %2860 = vmatpush2.msra.mxu1 %v1981_v36 }
  0x8c   :  { %v1970_v62 = vmul.f32 %v5301_v43, %v5400_v57  ;;  %v991_v13 = vcombine.low %v974_v1, %v988_v12  ;;  %v992_v53 = vcombine.high %v974_v1, %v988_v12  ;;  %2704 = vmatprep.subr.mxu0 %v5632_v8  ;;  %2861 = vmatprep.subr.mxu1 %v1978_v9 }
  0x8d   :  { %8980 = vst [vmem:[#allocation44_spill] sm:$0xff] %v5712_v41  ;;  %v1845_v0 = vmul.f32 %v5432_v35, %v5322_v20  ;;  %v5731_v10 = vrot.slane %v5712_v41, %v5041_v7  ;;  %v5735_v60 = vrot.slane %v5712_v41, %v8982_v28  ;;  %2705 = vmatpush2.msra.mxu0 %v1853_v11 }
  0x8e   :  { %2862 = vmatpush2.msra.mxu1 %v1977_v14  ;;  %v1969_v43 = vmul.f32 %v8981_v63, %v5418_v61  ;;  %v5740_v32 = vrot.slane %v991_v13, %v5217_v34  ;;  %v5743_v8 = vrot.slane %v992_v53, %v5217_v34  ;;  %2706 = vmatprep.subr.mxu0 %v1850_v22 }
  0x8f   :  { %2863 = vmatprep.subr.mxu1 %v1974_v6  ;;  %v1842_v17 = vmul.f32 %v5428_v55, %v5261_v2  ;;  %2707 = vmatpush2.msra.mxu0 %v1849_v54  ;;  %v1841_v9 = vmul.f32 %v5432_v35, %v5372_v42  ;;  %v2094_v18 = vmul.f32 %v5731_v10, %v5403_v5  ;;  %v8986_v6 = vld [vmem:[#allocation38_spill] sm:$0xff] }
  0x90   :  { %8983 = vst [vmem:[#allocation28_spill] sm:$0xff] %v5740_v32  ;;  %8984 = vst [vmem:[#allocation22_spill] sm:$0xff] %v5743_v8  ;;  %2864 = vmatpush2.msra.mxu1 %v1973_v44  ;;  %v5749_v36 = vcombine.high %v5740_v32, %v5740_v32  ;;  %2708 = vmatprep.subr.mxu0 %v1846_v4  ;;  %v2093_v11 = vmul.f32 %v5735_v60, %v5414_v15 }
  0x91   :  { %2865 = vmatprep.subr.mxu1 %v1970_v62  ;;  %2709 = vmatpush2.msra.mxu0 %v1845_v0  ;;  %v1460_v35 = vrot.slane %v5743_v8, %v5041_v7  ;;  %v2090_v14 = vmul.f32 %v5731_v10, %v5400_v57  ;;  %v1456_v22 = vrot.slane %v5743_v8, %v8982_v28  ;;  %v2449_v0 = vld [vmem:[#allocation2 + $0x60] sm:$0xff] }
  0x92   :  { %8985 = vst [vmem:[#allocation45_spill] sm:$0xff] %v5749_v36  ;;  %2866 = vmatpush2.msra.mxu1 %v1969_v43  ;;  %v5759_v55 = vrot.slane %v5749_v36, %v5041_v7  ;;  %v5763_v16 = vrot.slane %v5749_v36, %v8982_v28  ;;  %2710 = vmatprep.subr.mxu0 %v1842_v17  ;;  %v2451_v17 = vld [vmem:[#allocation2 + $0x70] sm:$0xff] }
  0x93   :  { %2868 = vmatmul.mubr.f32.vlgmr.msra.gmra.mxu1 %v2439_v27  ;;  %v5773_v1 = vcombine.high %v8986_v6, %v8986_v6  ;;  %2711 = vmatpush2.msra.mxu0 %v1841_v9  ;;  %v2089_v44 = vmul.f32 %v5735_v60, %v5418_v61  ;;  %v2086_v62 = vmul.f32 %v5731_v10, %v5263_v3 }
  0x94   :  { %v2222_v12 = vmul.f32 %v5759_v55, %v5261_v2  ;;  %v2221_v54 = vmul.f32 %v5763_v16, %v5372_v42  ;;  %v2218_v63 = vmul.f32 %v5759_v55, %v5359_v56  ;;  %2713 = vmatmul.mubr.f32.vlgmr.msra.gmra.mxu0 %v2437_v21  ;;  %2958 = vmatprep.subr.mxu0 %v2094_v18  ;;  %v2448_v21 = vld [vmem:[#allocation2 + $0x58] sm:$0xff] }
  0x95   :  { %8987 = vst [vmem:[#allocation46_spill] sm:$0xff] %v5773_v1  ;;  %v2217_v4 = vmul.f32 %v5763_v16, %v5370_v33  ;;  %2959 = vmatpush1.msra.mxu0 %v2093_v11  ;;  %v2214_v13 = vmul.f32 %v1460_v35, %v5403_v5  ;;  %v2213_v53 = vmul.f32 %v1456_v22, %v5414_v15 }
  0x96   :  { %3113 = vmatprep.subr.mxu1 %v2222_v12  ;;  %2960 = vmatprep.subr.mxu0 %v2090_v14  ;;  %v2210_v43 = vmul.f32 %v1460_v35, %v5400_v57  ;;  %v2085_v27 = vmul.f32 %v5735_v60, %v5322_v20  ;;  %v5794_v9 = vrot.slane %v5773_v1, %v5041_v7  ;;  %v2450_v12 = vld [vmem:[#allocation2 + $0x68] sm:$0xff] }
  0x97   :  { %3114 = vmatpush1.msra.mxu1 %v2221_v54  ;;  %2961 = vmatpush1.msra.mxu0 %v2089_v44  ;;  %v2209_v18 = vmul.f32 %v1456_v22, %v5418_v61  ;;  %v5799_v11 = vrot.slane %v5773_v1, %v8982_v28  ;;  %v2082_v14 = vmul.f32 %v5731_v10, %v5261_v2 }
  0x98   :  { %3115 = vmatprep.subr.mxu1 %v2218_v63  ;;  %2962 = vmatprep.subr.mxu0 %v2086_v62  ;;  %v2206_v54 = vmul.f32 %v1460_v35, %v5263_v3  ;;  %v2081_v63 = vmul.f32 %v5735_v60, %v5372_v42  ;;  %v957_v44 = vcombine.low %v5682_v58, %v5684_v23  ;;  %v2460_v23 = vld [vmem:[#allocation2 + $0xb8] sm:$0xff] }
  0x99   :  { %3116 = vmatpush1.msra.mxu1 %v2217_v4  ;;  %2718 = vmatprep.mubr.f32.mxu0 %v2449_v0  ;;  %v2205_v4 = vmul.f32 %v1456_v22, %v5322_v20  ;;  %v2078_v62 = vmul.f32 %v5731_v10, %v5359_v56  ;;  %v2077_v0 = vmul.f32 %v5735_v60, %v5370_v33 }
  0x9a   :  { %3117 = vmatprep.subr.mxu1 %v2214_v13  ;;  %2873 = vmatprep.mubr.f32.mxu1 %v2451_v17  ;;  %v2074_v13 = vmul.f32 %v5794_v9, %v5403_v5  ;;  %v2073_v58 = vmul.f32 %v5799_v11, %v5414_v15  ;;  %v5821_v10 = vrot.slane %v5740_v32, %v5041_v7 }
  0x9b   :  { %3118 = vmatpush1.msra.mxu1 %v2213_v53  ;;  %2963 = vmatpush1.msra.mxu0 %v2085_v27  ;;  %v2202_v53 = vmul.f32 %v1460_v35, %v5261_v2  ;;  %v959_v17 = vcombine.low %v5686_v26, %v5688_v29  ;;  %v2462_v27 = vld [vmem:[#allocation2 + $0xc8] sm:$0xff]  ;;  %v2198_v60 = vmul.f32 %v1460_v35, %v5359_v56  ;;  %v2461_v29 = vld [vmem:[#allocation2 + $0xc0] sm:$0xff] }
  0x9c   :  { %3119 = vmatprep.subr.mxu1 %v2210_v43  ;;  %2719 = vmatmul.mubr.f32.gmra.mxu0 %v2448_v21  ;;  %v2201_v43 = vmul.f32 %v1456_v22, %v5372_v42  ;;  %v5828_v21 = vrot.slane %v957_v44, %v5217_v34  ;;  %v5834_v1 = vrot.slane %v5740_v32, %v8982_v28 }
  0x9d   :  { %3120 = vmatpush1.msra.mxu1 %v2209_v18  ;;  %2964 = vmatprep.subr.mxu0 %v2082_v14  ;;  %v2197_v18 = vmul.f32 %v1456_v22, %v5370_v33  ;;  %v2459_v14 = vld [vmem:[#allocation2 + $0xb0] sm:$0xff]  ;;  %v5837_v26 = vrot.slane %v959_v17, %v5217_v34  ;;  %v2069_v35 = vmul.f32 %v5799_v11, %v5418_v61  ;;  %v2473_v17 = vld [vmem:[#allocation2 + $0x120] sm:$0xff] }
  0x9e   :  { %2874 = vmatmul.mubr.f32.gmra.mxu1 %v2450_v12  ;;  %3121 = vmatprep.subr.mxu1 %v2206_v54  ;;  %v2070_v12 = vmul.f32 %v5794_v9, %v5400_v57  ;;  %v2066_v22 = vmul.f32 %v5794_v9, %v5263_v3  ;;  %v2065_v54 = vmul.f32 %v5799_v11, %v5322_v20 }
  0x9f   :  { %2965 = vmatpush1.msra.mxu0 %v2081_v63  ;;  %3122 = vmatpush1.msra.mxu1 %v2205_v4  ;;  %v2194_v63 = vmul.f32 %v5821_v10, %v5403_v5  ;;  %v2190_v44 = vmul.f32 %v5821_v10, %v5400_v57  ;;  %v990_v4 = vcombine.high %v5828_v21, %v5837_v26 }
  0xa0   :  { %2966 = vmatprep.subr.mxu0 %v2078_v62  ;;  %3123 = vmatprep.subr.mxu1 %v2202_v53  ;;  %v8988_v62 = vld [vmem:[#allocation25_spill] sm:$0xff]  ;;  %v2471_v53 = vld [vmem:[#allocation2 + $0x110] sm:$0xff]  ;;  %v2189_v41 = vmul.f32 %v5834_v1, %v5418_v61 }
  0xa1   :  { %2724 = vmatprep.mubr.f32.mxu0 %v2460_v23  ;;  %2879 = vmatprep.mubr.f32.mxu1 %v2462_v27  ;;  %vm107_vm12 = vcmp.eq.f32.partialorder %v8988_v62, %v5076_v24  ;;  %vm108_vm13 = vcmp.eq.f32.partialorder %v8988_v62, %v5079_v25  ;;  %vm109_vm14 = vcmp.eq.f32.partialorder %v8988_v62, %v5088_v30 }
  0xa2   :  { %2967 = vmatpush1.msra.mxu0 %v2077_v0  ;;  %3124 = vmatpush1.msra.mxu1 %v2201_v43  ;;  %v2193_v0 = vmul.f32 %v5834_v1, %v5414_v15  ;;  %v2062_v23 = vmul.f32 %v5794_v9, %v5261_v2  ;;  %vm110_vm15 = vcmp.eq.f32.partialorder %v8988_v62, %v5091_v31  ;;  %v167_v43 = vsel %vm107_vm12, %v5129_v45, 0.0 }
  0xa3   :  { %2725 = vmatmul.mubr.f32.gmra.mxu0 %v2459_v14  ;;  %2880 = vmatmul.mubr.f32.gmra.mxu1 %v2461_v29  ;;  %v168_v27 = vsel %vm108_vm13, %v5132_v46, 0.0  ;;  %v169_v14 = vsel %vm109_vm14, %v5135_v47, 0.0  ;;  %vm227_vm0 = vcmp.eq.f32.partialorder %v8988_v62, %v5107_v37  ;;  %vm228_vm2 = vcmp.eq.f32.partialorder %v8988_v62, %v5110_v38 }
  0xa4   :  { %2968 = vmatprep.subr.mxu0 %v2074_v13  ;;  %3125 = vmatprep.subr.mxu1 %v2198_v60  ;;  %v2470_v13 = vld [vmem:[#allocation2 + $0x108] sm:$0xff]  ;;  %v170_v29 = vsel %vm110_vm15, %v5138_v48, 0.0  ;;  %vm229_vm1 = vcmp.eq.f32.partialorder %v8988_v62, %v5113_v39  ;;  %vm230_vm3 = vcmp.eq.f32.partialorder %v8988_v62, %v5116_v40  ;;  %v2472_v60 = vld [vmem:[#allocation2 + $0x118] sm:$0xff]  ;;  %v5877_v32 = vrot.slane %v990_v4, %v5217_v34 }
  0xa5   :  { %2969 = vmatpush1.msra.mxu0 %v2073_v58  ;;  %3126 = vmatpush1.msra.mxu1 %v2197_v18  ;;  %v285_v58 = vsel %vm227_vm0, %v5141_v49, 0.0  ;;  %v286_v18 = vsel %vm228_vm2, %v5144_v50, 0.0  ;;  %v288_v36 = vsel %vm230_vm3, %v5150_v52, 0.0 }
  0xa6   :  { %2970 = vmatprep.subr.mxu0 %v2070_v12  ;;  %3127 = vmatprep.subr.mxu1 %v2194_v63  ;;  %8989 = vst [vmem:[#allocation47_spill] sm:$0xff] %v5877_v32  ;;  %v287_v12 = vsel %vm229_vm1, %v5147_v51, 0.0  ;;  %v5884_v6 = vadd.f32 %v285_v58, %v167_v43  ;;  %v5886_v62 = vadd.f32 %v286_v18, %v168_v27 }
  0xa7   :  { %2730 = vmatprep.mubr.f32.mxu0 %v2471_v53  ;;  %2885 = vmatprep.mubr.f32.mxu1 %v2473_v17  ;;  %v2186_v63 = vmul.f32 %v5821_v10, %v5263_v3  ;;  %v5890_v4 = vadd.f32 %v287_v12, %v169_v14  ;;  %v5892_v53 = vadd.f32 %v288_v36, %v170_v29  ;;  %v2482_v17 = vld [vmem:[#allocation2 + $0x168] sm:$0xff] }
  0xa8   :  { %2971 = vmatpush1.msra.mxu0 %v2069_v35  ;;  %3128 = vmatpush1.msra.mxu1 %v2193_v0  ;;  %v2061_v35 = vmul.f32 %v5799_v11, %v5372_v42  ;;  %v5898_v43 = vrot.slane %v5698_v59, %v5041_v7  ;;  %v2484_v0 = vld [vmem:[#allocation2 + $0x178] sm:$0xff]  ;;  %v2185_v27 = vmul.f32 %v5834_v1, %v5322_v20 }
  0xa9   :  { %2731 = vmatmul.mubr.f32.gmra.mxu0 %v2470_v13  ;;  %2886 = vmatmul.mubr.f32.gmra.mxu1 %v2472_v60  ;;  %v5904_v36 = vcombine.high %v5877_v32, %v5877_v32  ;;  %v2058_v14 = vmul.f32 %v5794_v9, %v5359_v56  ;;  %v5910_v13 = vrot.slane %v5698_v59, %v8982_v28 }
  0xaa   :  { %2972 = vmatprep.subr.mxu0 %v2066_v22  ;;  %3129 = vmatprep.subr.mxu1 %v2190_v44  ;;  %v2481_v22 = vld [vmem:[#allocation2 + $0x160] sm:$0xff]  ;;  %v2483_v44 = vld [vmem:[#allocation2 + $0x170] sm:$0xff]  ;;  %v2182_v29 = vmul.f32 %v5821_v10, %v5261_v2  ;;  %v2181_v9 = vmul.f32 %v5834_v1, %v5372_v42  ;;  %v2054_v58 = vmul.f32 %v5898_v43, %v5403_v5 }
  0xab   :  { %2973 = vmatpush1.msra.mxu0 %v2065_v54  ;;  %8990 = vst [vmem:[#allocation48_spill] sm:$0xff] %v5904_v36  ;;  %3130 = vmatpush1.msra.mxu1 %v2189_v41  ;;  %v1025_v54 = vcombine.low %v5884_v6, %v5886_v62  ;;  %v2057_v41 = vmul.f32 %v5799_v11, %v5370_v33 }
  0xac   :  { %2974 = vmatprep.subr.mxu0 %v2062_v23  ;;  %3131 = vmatprep.subr.mxu1 %v2186_v63  ;;  %v1027_v23 = vcombine.low %v5890_v4, %v5892_v53  ;;  %v2178_v60 = vmul.f32 %v5821_v10, %v5359_v56  ;;  %v5928_v18 = vrot.slane %v5904_v36, %v5041_v7  ;;  %v2493_v63 = vld [vmem:[#allocation2 + $0x1c0] sm:$0xff] }
  0xad   :  { %2736 = vmatprep.mubr.f32.mxu0 %v2482_v17  ;;  %2891 = vmatprep.mubr.f32.mxu1 %v2484_v0  ;;  %v5931_v11 = vrot.slane %v1025_v54, %v5217_v34  ;;  %v2053_v17 = vmul.f32 %v5910_v13, %v5414_v15  ;;  %v5940_v10 = vrot.slane %v5904_v36, %v8982_v28 }
  0xae   :  { %2975 = vmatpush1.msra.mxu0 %v2061_v35  ;;  %3132 = vmatpush1.msra.mxu1 %v2185_v27  ;;  %v5934_v12 = vrot.slane %v1027_v23, %v5217_v34  ;;  %v2495_v35 = vld [vmem:[#allocation2 + $0x1d0] sm:$0xff]  ;;  %v2177_v0 = vmul.f32 %v5834_v1, %v5370_v33  ;;  %v2492_v27 = vld [vmem:[#allocation2 + $0x1b8] sm:$0xff]  ;;  %v2174_v54 = vmul.f32 %v5928_v18, %v5403_v5 }
  0xaf   :  { %2737 = vmatmul.mubr.f32.gmra.mxu0 %v2481_v22  ;;  %2892 = vmatmul.mubr.f32.gmra.mxu1 %v2483_v44  ;;  %v2050_v22 = vmul.f32 %v5898_v43, %v5400_v57  ;;  %v2049_v44 = vmul.f32 %v5910_v13, %v5418_v61  ;;  %v2173_v1 = vmul.f32 %v5940_v10, %v5414_v15 }
  0xb0   :  { %2976 = vmatprep.subr.mxu0 %v2058_v14  ;;  %3133 = vmatprep.subr.mxu1 %v2182_v29  ;;  %v2494_v14 = vld [vmem:[#allocation2 + $0x1c8] sm:$0xff]  ;;  %v1058_v29 = vcombine.high %v5931_v11, %v5934_v12  ;;  %v989_v23 = vcombine.low %v5828_v21, %v5837_v26  ;;  %v2503_v21 = vld [vmem:[#allocation2 + $0x210] sm:$0xff]  ;;  %v2042_v26 = vmul.f32 %v5898_v43, %v5261_v2 }
  0xb1   :  { %2977 = vmatpush1.msra.mxu0 %v2057_v41  ;;  %3134 = vmatpush1.msra.mxu1 %v2181_v9  ;;  %v2046_v41 = vmul.f32 %v5898_v43, %v5263_v3  ;;  %v2170_v9 = vmul.f32 %v5928_v18, %v5400_v57 }
  0xb2   :  { %2978 = vmatprep.subr.mxu0 %v2054_v58  ;;  %3135 = vmatprep.subr.mxu1 %v2178_v60  ;;  %v2504_v58 = vld [vmem:[#allocation2 + $0x218] sm:$0xff]  ;;  %v2045_v60 = vmul.f32 %v5910_v13, %v5322_v20 }
  0xb3   :  { %2742 = vmatprep.mubr.f32.mxu0 %v2493_v63  ;;  %2897 = vmatprep.mubr.f32.mxu1 %v2495_v35  ;;  %v2506_v63 = vld [vmem:[#allocation2 + $0x228] sm:$0xff]  ;;  %v5965_v35 = vrot.slane %v1058_v29, %v5217_v34  ;;  %v2162_v29 = vmul.f32 %v5928_v18, %v5261_v2 }
  0xb4   :  { %2979 = vmatpush1.msra.mxu0 %v2053_v17  ;;  %3136 = vmatpush1.msra.mxu1 %v2177_v0  ;;  %v2169_v17 = vmul.f32 %v5940_v10, %v5418_v61  ;;  %v5970_v0 = vrot.slane %v989_v23, %v5217_v34  ;;  %v2515_v23 = vld [vmem:[#allocation2 + $0x270] sm:$0xff] }
  0xb5   :  { %2743 = vmatmul.mubr.f32.gmra.mxu0 %v2492_v27  ;;  %2898 = vmatmul.mubr.f32.gmra.mxu1 %v2494_v14  ;;  %v2505_v27 = vld [vmem:[#allocation2 + $0x220] sm:$0xff]  ;;  %v2041_v14 = vmul.f32 %v5910_v13, %v5372_v42 }
  0xb6   :  { %2980 = vmatprep.subr.mxu0 %v2050_v22  ;;  %3137 = vmatprep.subr.mxu1 %v2174_v54  ;;  %v2166_v22 = vmul.f32 %v5928_v18, %v5263_v3  ;;  %v2165_v54 = vmul.f32 %v5940_v10, %v5322_v20 }
  0xb7   :  { %2981 = vmatpush1.msra.mxu0 %v2049_v44  ;;  %3138 = vmatpush1.msra.mxu1 %v2173_v1  ;;  %v2038_v44 = vmul.f32 %v5898_v43, %v5359_v56  ;;  %v5984_v1 = vrot.slane %v5965_v35, %v5041_v7  ;;  %v5992_v43 = vrot.slane %v5965_v35, %v8982_v28 }
  0xb8   :  { %2982 = vmatprep.subr.mxu0 %v2046_v41  ;;  %3139 = vmatprep.subr.mxu1 %v2170_v9  ;;  %v1057_v41 = vcombine.low %v5931_v11, %v5934_v12  ;;  %v2037_v9 = vmul.f32 %v5910_v13, %v5370_v33  ;;  %v2161_v11 = vmul.f32 %v5940_v10, %v5372_v42  ;;  %v2514_v12 = vld [vmem:[#allocation2 + $0x268] sm:$0xff] }
  0xb9   :  { %2748 = vmatprep.mubr.f32.mxu0 %v2504_v58  ;;  %2903 = vmatprep.mubr.f32.mxu1 %v2506_v63  ;;  %8991 = vst [vmem:[#allocation49_spill] sm:$0xff] %v5992_v43  ;;  %v5996_v58 = vcombine.high %v5970_v0, %v5970_v0  ;;  %v8993_v63 = vld [vmem:[#allocation39_spill] sm:$0xff] }
  0xba   :  { %2983 = vmatpush1.msra.mxu0 %v2045_v60  ;;  %3140 = vmatpush1.msra.mxu1 %v2169_v17  ;;  %v2517_v60 = vld [vmem:[#allocation2 + $0x280] sm:$0xff]  ;;  %v2034_v13 = vmul.f32 %v8993_v63, %v5403_v5  ;;  %v2516_v17 = vld [vmem:[#allocation2 + $0x278] sm:$0xff] }
  0xbb   :  { %2749 = vmatmul.mubr.f32.gmra.mxu0 %v2503_v21  ;;  %2904 = vmatmul.mubr.f32.gmra.mxu1 %v2505_v27  ;;  %8992 = vst [vmem:[#allocation50_spill] sm:$0xff] %v5996_v58  ;;  %v2286_v21 = vmul.f32 %v5984_v1, %v5263_v3 }
  0xbc   :  { %2984 = vmatprep.subr.mxu0 %v2042_v26  ;;  %3141 = vmatprep.subr.mxu1 %v2166_v22  ;;  %v8994_v26 = vld [vmem:[#allocation40_spill] sm:$0xff]  ;;  %v6007_v22 = vrot.slane %v1057_v41, %v5217_v34  ;;  %v6021_v41 = vrot.slane %v5996_v58, %v8982_v28 }
  0xbd   :  { %2985 = vmatpush1.msra.mxu0 %v2041_v14  ;;  %3142 = vmatpush1.msra.mxu1 %v2165_v54  ;;  %v2033_v27 = vmul.f32 %v8994_v26, %v5414_v15  ;;  %v2285_v14 = vmul.f32 %v5992_v43, %v5322_v20  ;;  %v2158_v54 = vmul.f32 %v5928_v18, %v5359_v56  ;;  %v2528_v18 = vld [vmem:[#allocation2 + $0x2d8] sm:$0xff] }
  0xbe   :  { %2986 = vmatprep.subr.mxu0 %v2038_v44  ;;  %3143 = vmatprep.subr.mxu1 %v2162_v29  ;;  %v6015_v44 = vrot.slane %v5996_v58, %v5041_v7  ;;  %v2282_v29 = vmul.f32 %v5984_v1, %v5261_v2  ;;  %v2277_v26 = vmul.f32 %v5992_v43, %v5370_v33 }
  0xbf   :  { %2754 = vmatprep.mubr.f32.mxu0 %v2515_v23  ;;  %2909 = vmatprep.mubr.f32.mxu1 %v2517_v60  ;;  %v2526_v23 = vld [vmem:[#allocation2 + $0x2c8] sm:$0xff]  ;;  %v2281_v60 = vmul.f32 %v5992_v43, %v5372_v42  ;;  %v2141_v36 = vmul.f32 %v6021_v41, %v5372_v42  ;;  %v2137_v19 = vmul.f32 %v6021_v41, %v5370_v33  ;;  %v8995_v43 = vld [vmem:[#allocation26_spill] sm:$0xff] }
  0xc0   :  { %2987 = vmatpush1.msra.mxu0 %v2037_v9  ;;  %3144 = vmatpush1.msra.mxu1 %v2161_v11  ;;  %v2157_v9 = vmul.f32 %v5940_v10, %v5370_v33  ;;  %v6029_v11 = vrot.slane %v6007_v22, %v5041_v7  ;;  %v2154_v63 = vmul.f32 %v6015_v44, %v5403_v5 }
  0xc1   :  { %2755 = vmatmul.mubr.f32.gmra.mxu0 %v2514_v12  ;;  %2910 = vmatmul.mubr.f32.gmra.mxu1 %v2516_v17  ;;  %v2525_v12 = vld [vmem:[#allocation2 + $0x2c0] sm:$0xff]  ;;  %v2278_v10 = vmul.f32 %v5984_v1, %v5359_v56  ;;  %v2153_v17 = vmul.f32 %v6021_v41, %v5414_v15  ;;  %vm111_vm4 = vcmp.eq.f32.partialorder %v8995_v43, %v5076_v24 }
  0xc2   :  { %2988 = vmatprep.subr.mxu0 %v2034_v13  ;;  %3145 = vmatprep.subr.mxu1 %v2286_v21  ;;  %v2527_v13 = vld [vmem:[#allocation2 + $0x2d0] sm:$0xff]  ;;  %v6039_v21 = vrot.slane %v6007_v22, %v8982_v28  ;;  %vm112_vm5 = vcmp.eq.f32.partialorder %v8995_v43, %v5079_v25  ;;  %vm113_vm6 = vcmp.eq.f32.partialorder %v8995_v43, %v5088_v30 }
  0xc3   :  { %2989 = vmatpush1.msra.mxu0 %v2033_v27  ;;  %3146 = vmatpush2.msra.mxu1 %v2285_v14  ;;  %v2150_v27 = vmul.f32 %v6015_v44, %v5400_v57  ;;  %v2274_v14 = vmul.f32 %v6029_v11, %v5403_v5  ;;  %vm114_vm7 = vcmp.eq.f32.partialorder %v8995_v43, %v5091_v31 }
  0xc4   :  { %2990 = vmatprep.subr.mxu0 %v2158_v54  ;;  %3147 = vmatprep.subr.mxu1 %v2282_v29  ;;  %v6049_v54 = vrot.slane %v5877_v32, %v5041_v7  ;;  %v2537_v29 = vld [vmem:[#allocation2 + $0x320] sm:$0xff]  ;;  %v2265_v59 = vmul.f32 %v6039_v21, %v5322_v20  ;;  %vm231_vm8 = vcmp.eq.f32.partialorder %v8995_v43, %v5107_v37  ;;  %v174_v24 = vsel %vm114_vm7, %v5138_v48, 0.0  ;;  %v2560_v48 = vld [vmem:[#allocation2 + $0x3d8] sm:$0xff] }
  0xc5   :  { %2760 = vmatprep.mubr.f32.mxu0 %v2526_v23  ;;  %2915 = vmatprep.mubr.f32.mxu1 %v2528_v18  ;;  %v2149_v23 = vmul.f32 %v6021_v41, %v5418_v61  ;;  %v2539_v18 = vld [vmem:[#allocation2 + $0x330] sm:$0xff]  ;;  %vm232_vm9 = vcmp.eq.f32.partialorder %v8995_v43, %v5110_v38  ;;  %vm233_vm10 = vcmp.eq.f32.partialorder %v8995_v43, %v5113_v39 }
  0xc6   :  { %2991 = vmatpush2.msra.mxu0 %v2157_v9  ;;  %3148 = vmatpush2.msra.mxu1 %v2281_v60  ;;  %v6055_v9 = vrot.slane %v5877_v32, %v8982_v28  ;;  %v2273_v60 = vmul.f32 %v6039_v21, %v5414_v15  ;;  %v2538_v32 = vld [vmem:[#allocation2 + $0x328] sm:$0xff]  ;;  %v2134_v58 = vmul.f32 %v6049_v54, %v5403_v5  ;;  %v290_v25 = vsel %vm232_vm9, %v5144_v50, 0.0 }
  0xc7   :  { %2761 = vmatmul.mubr.f32.gmra.mxu0 %v2525_v12  ;;  %2916 = vmatmul.mubr.f32.gmra.mxu1 %v2527_v13  ;;  %v6061_v12 = vcombine.high %v5743_v8, %v5743_v8  ;;  %v2146_v13 = vmul.f32 %v6015_v44, %v5263_v3  ;;  %v2550_v8 = vld [vmem:[#allocation2 + $0x388] sm:$0xff]  ;;  %vm234_vm11 = vcmp.eq.f32.partialorder %v8995_v43, %v5116_v40  ;;  %v291_v30 = vsel %vm233_vm10, %v5147_v51, 0.0 }
  0xc8   :  { %2992 = vmatprep.subr.mxu0 %v2154_v63  ;;  %3149 = vmatprep.subr.mxu1 %v2278_v10  ;;  %v2536_v63 = vld [vmem:[#allocation2 + $0x318] sm:$0xff]  ;;  %v2270_v10 = vmul.f32 %v6029_v11, %v5400_v57  ;;  %v292_v37 = vsel %vm234_vm11, %v5150_v52, 0.0  ;;  %v2257_v31 = vmul.f32 %v6039_v21, %v5370_v33  ;;  %v2130_v38 = vmul.f32 %v6049_v54, %v5400_v57 }
  0xc9   :  { %2993 = vmatpush2.msra.mxu0 %v2153_v17  ;;  %3150 = vmatpush2.msra.mxu1 %v2277_v26  ;;  %v2145_v17 = vmul.f32 %v6021_v41, %v5322_v20  ;;  %v2269_v26 = vmul.f32 %v6039_v21, %v5418_v61  ;;  %v2261_v41 = vmul.f32 %v6039_v21, %v5372_v42  ;;  %v2570_v21 = vld [vmem:[#allocation2 + $0x428] sm:$0xff] }
  0xca   :  { %2994 = vmatprep.subr.mxu0 %v2150_v27  ;;  %3151 = vmatprep.subr.mxu1 %v2274_v14  ;;  %v2142_v27 = vmul.f32 %v6015_v44, %v5261_v2  ;;  %v6077_v14 = vmul.f32 %v6055_v9, %v5414_v15  ;;  %v312_v51 = vadd.f32 %v292_v37, %v174_v24 }
  0xcb   :  { %2766 = vmatprep.mubr.f32.mxu0 %v2537_v29  ;;  %2921 = vmatprep.mubr.f32.mxu1 %v2539_v18  ;;  %v2266_v29 = vmul.f32 %v6029_v11, %v5263_v3  ;;  %v2548_v18 = vld [vmem:[#allocation2 + $0x378] sm:$0xff] }
  0xcc   :  { %2995 = vmatpush2.msra.mxu0 %v2149_v23  ;;  %3152 = vmatpush2.msra.mxu1 %v2273_v60  ;;  %v6085_v23 = vrot.slane %v6061_v12, %v5041_v7  ;;  %v2138_v60 = vmul.f32 %v6015_v44, %v5359_v56  ;;  %v2549_v44 = vld [vmem:[#allocation2 + $0x380] sm:$0xff] }
  0xcd   :  { %2767 = vmatmul.mubr.f32.gmra.mxu0 %v2536_v63  ;;  %2922 = vmatmul.mubr.f32.gmra.mxu1 %v2538_v32  ;;  %v2262_v63 = vmul.f32 %v6029_v11, %v5261_v2  ;;  %v2547_v32 = vld [vmem:[#allocation2 + $0x370] sm:$0xff] }
  0xce   :  { %2996 = vmatprep.subr.mxu0 %v2146_v13  ;;  %3153 = vmatprep.subr.mxu1 %v2270_v10  ;;  %v2258_v13 = vmul.f32 %v6029_v11, %v5359_v56  ;;  %v6117_v10 = vrot.slane %v6061_v12, %v8982_v28  ;;  %v2559_v11 = vld [vmem:[#allocation2 + $0x3d0] sm:$0xff]  ;;  %v2254_v39 = vmul.f32 %v6085_v23, %v5403_v5 }
  0xcf   :  { %2997 = vmatpush2.msra.mxu0 %v2145_v17  ;;  %3154 = vmatpush2.msra.mxu1 %v2269_v26  ;;  %v171_v17 = vsel %vm111_vm4, %v5129_v45, 0.0  ;;  %v2561_v45 = vld [vmem:[#allocation2 + $0x3e0] sm:$0xff]  ;;  %v2125_v26 = vmul.f32 %v6055_v9, %v5322_v20 }
  0xd0   :  { %2998 = vmatprep.subr.mxu0 %v2142_v27  ;;  %3155 = vmatprep.subr.mxu1 %v2266_v29  ;;  %v2253_v52 = vmul.f32 %v6117_v10, %v5414_v15  ;;  %v2572_v27 = vld [vmem:[#allocation2 + $0x438] sm:$0xff]  ;;  %v2241_v37 = vmul.f32 %v6117_v10, %v5372_v42 }
  0xd1   :  { %2772 = vmatprep.mubr.f32.mxu0 %v2548_v18  ;;  %2927 = vmatprep.mubr.f32.mxu1 %v2550_v8  ;;  %v172_v8 = vsel %vm112_vm5, %v5132_v46, 0.0  ;;  %v2558_v46 = vld [vmem:[#allocation2 + $0x3c8] sm:$0xff] }
  0xd2   :  { %2999 = vmatpush2.msra.mxu0 %v2141_v36  ;;  %3156 = vmatpush2.msra.mxu1 %v2265_v59  ;;  %v173_v36 = vsel %vm113_vm6, %v5135_v47, 0.0  ;;  %v289_v59 = vsel %vm231_vm8, %v5141_v49, 0.0  ;;  %v2129_v47 = vmul.f32 %v6055_v9, %v5418_v61  ;;  %v310_v49 = vadd.f32 %v290_v25, %v172_v8 }
  0xd3   :  { %2773 = vmatmul.mubr.f32.gmra.mxu0 %v2547_v32  ;;  %2928 = vmatmul.mubr.f32.gmra.mxu1 %v2549_v44  ;;  %v309_v40 = vadd.f32 %v289_v59, %v171_v17  ;;  %v311_v50 = vadd.f32 %v291_v30, %v173_v36  ;;  %v1026_v32 = vcombine.high %v5884_v6, %v5886_v62  ;;  %v2583_v30 = vld [vmem:[#allocation2 + $0x490] sm:$0xff] }
  0xd4   :  { %3000 = vmatprep.subr.mxu0 %v2138_v60  ;;  %3157 = vmatprep.subr.mxu1 %v2262_v63  ;;  %v2569_v60 = vld [vmem:[#allocation2 + $0x420] sm:$0xff]  ;;  %v2122_v63 = vmul.f32 %v6049_v54, %v5261_v2  ;;  %v1028_v44 = vcombine.high %v5890_v4, %v5892_v53  ;;  %v2121_v17 = vmul.f32 %v6055_v9, %v5372_v42 }
  0xd5   :  { %3001 = vmatpush2.msra.mxu0 %v2137_v19  ;;  %3158 = vmatpush2.msra.mxu1 %v2261_v41  ;;  %v2126_v19 = vmul.f32 %v6049_v54, %v5263_v3  ;;  %v1093_v29 = vcombine.low %v309_v40, %v310_v49  ;;  %v1094_v18 = vcombine.low %v311_v50, %v312_v51  ;;  %v2571_v41 = vld [vmem:[#allocation2 + $0x430] sm:$0xff]  ;;  %v2592_v49 = vld [vmem:[#allocation2 + $0x4d8] sm:$0xff] }
  0xd6   :  { %3002 = vmatprep.subr.mxu0 %v2134_v58  ;;  %3159 = vmatprep.subr.mxu1 %v2258_v13  ;;  %v2250_v58 = vmul.f32 %v6085_v23, %v5400_v57  ;;  %v2246_v13 = vmul.f32 %v6085_v23, %v5263_v3  ;;  %v2245_v8 = vmul.f32 %v6117_v10, %v5322_v20 }
  0xd7   :  { %2778 = vmatprep.mubr.f32.mxu0 %v2559_v11  ;;  %2933 = vmatprep.mubr.f32.mxu1 %v2561_v45  ;;  %v2118_v6 = vmul.f32 %v6049_v54, %v5359_v56  ;;  %v2242_v62 = vmul.f32 %v6085_v23, %v5261_v2  ;;  %v6188_v4 = vrot.slane %v5970_v0, %v5041_v7  ;;  %v2581_v54 = vld [vmem:[#allocation2 + $0x480] sm:$0xff]  ;;  %v2580_v45 = vld [vmem:[#allocation2 + $0x478] sm:$0xff] }
  0xd8   :  { %3003 = vmatpush2.msra.mxu0 %v6077_v14  ;;  %3160 = vmatpush2.msra.mxu1 %v2257_v31  ;;  %v2249_v14 = vmul.f32 %v6117_v10, %v5418_v61  ;;  %v6192_v53 = vrot.slane %v5970_v0, %v8982_v28  ;;  %v1101_v36 = vrot.slane %v1093_v29, %v5217_v34 }
  0xd9   :  { %2779 = vmatmul.mubr.f32.gmra.mxu0 %v2558_v46  ;;  %2934 = vmatmul.mubr.f32.gmra.mxu1 %v2560_v48  ;;  %v1108_v59 = vrot.slane %v1094_v18, %v5217_v34  ;;  %v2117_v11 = vmul.f32 %v6055_v9, %v5370_v33  ;;  %v6199_v24 = vrot.slane %v1026_v32, %v5217_v34  ;;  %v2582_v9 = vld [vmem:[#allocation2 + $0x488] sm:$0xff] }
  0xda   :  { %3004 = vmatprep.subr.mxu0 %v2130_v38  ;;  %3161 = vmatprep.subr.mxu1 %v2254_v39  ;;  %v6202_v25 = vrot.slane %v1028_v44, %v5217_v34  ;;  %v2114_v31 = vmul.f32 %v6188_v4, %v5403_v5  ;;  %v2238_v38 = vmul.f32 %v6085_v23, %v5359_v56 }
  0xdb   :  { %3005 = vmatpush2.msra.mxu0 %v2129_v47  ;;  %3162 = vmatpush2.msra.mxu1 %v2253_v52  ;;  %v2113_v46 = vmul.f32 %v6192_v53, %v5414_v15  ;;  %v1109_v39 = vcombine.low %v1101_v36, %v1108_v59  ;;  %v2237_v47 = vmul.f32 %v6117_v10, %v5370_v33  ;;  %v2594_v10 = vld [vmem:[#allocation2 + $0x4e8] sm:$0xff]  ;;  %v2441_v59 = vld [vmem:[#allocation2 + $0x20] sm:$0xff] }
  0xdc   :  { %3006 = vmatprep.subr.mxu0 %v2126_v19  ;;  %3163 = vmatprep.subr.mxu1 %v2250_v58  ;;  %v2110_v40 = vmul.f32 %v6188_v4, %v5400_v57  ;;  %v1059_v48 = vcombine.low %v6199_v24, %v6202_v25  ;;  %v2234_v23 = vmul.f32 %v5759_v55, %v5403_v5  ;;  %v2591_v19 = vld [vmem:[#allocation2 + $0x4d0] sm:$0xff] }
  0xdd   :  { %2784 = vmatprep.mubr.f32.mxu0 %v2570_v21  ;;  %2939 = vmatprep.mubr.f32.mxu1 %v2572_v27  ;;  %v2109_v50 = vmul.f32 %v6192_v53, %v5418_v61  ;;  %v2233_v51 = vmul.f32 %v5763_v16, %v5414_v15  ;;  %v6225_v52 = vrot.slane %v1109_v39, %v5217_v34  ;;  %v2452_v39 = vld [vmem:[#allocation2 + $0x78] sm:$0xff] }
  0xde   :  { %3007 = vmatpush2.msra.mxu0 %v2125_v26  ;;  %3164 = vmatpush2.msra.mxu1 %v2249_v14  ;;  %v2106_v58 = vmul.f32 %v6188_v4, %v5263_v3  ;;  %v6230_v21 = vrot.slane %v1059_v48, %v5217_v34  ;;  %v2593_v26 = vld [vmem:[#allocation2 + $0x4e0] sm:$0xff]  ;;  %v2230_v27 = vmul.f32 %v5759_v55, %v5400_v57  ;;  %v2466_v48 = vld [vmem:[#allocation2 + $0xe8] sm:$0xff] }
  0xdf   :  { %2785 = vmatmul.mubr.f32.gmra.mxu0 %v2569_v60  ;;  %2940 = vmatmul.mubr.f32.gmra.mxu1 %v2571_v41  ;;  %v2105_v14 = vmul.f32 %v6192_v53, %v5322_v20  ;;  %v2229_v29 = vmul.f32 %v5763_v16, %v5418_v61  ;;  %v2102_v18 = vmul.f32 %v6188_v4, %v5261_v2 }
  0xe0   :  { %3008 = vmatprep.subr.mxu0 %v2122_v63  ;;  %3165 = vmatprep.subr.mxu1 %v2246_v13  ;;  %v2226_v60 = vmul.f32 %v5759_v55, %v5263_v3  ;;  %v2101_v63 = vmul.f32 %v6192_v53, %v5372_v42  ;;  %v6246_v32 = vrot.slane %v6225_v52, %v5041_v7  ;;  %v2444_v55 = vld [vmem:[#allocation2 + $0x38] sm:$0xff] }
  0xe1   :  { %3009 = vmatpush2.msra.mxu0 %v2121_v17  ;;  %3166 = vmatpush2.msra.mxu1 %v2245_v8  ;;  %v2225_v44 = vmul.f32 %v5763_v16, %v5322_v20  ;;  %v6252_v41 = vrot.slane %v6230_v21, %v5041_v7  ;;  %v6256_v13 = vrot.slane %v6225_v52, %v8982_v28  ;;  %v2443_v16 = vld [vmem:[#allocation2 + $0x30] sm:$0xff] }
  0xe2   :  { %3010 = vmatprep.subr.mxu0 %v2118_v6  ;;  %3167 = vmatprep.subr.mxu1 %v2242_v62  ;;  %v2098_v17 = vmul.f32 %v6188_v4, %v5359_v56  ;;  %v6262_v8 = vrot.slane %v6230_v21, %v8982_v28  ;;  %v2097_v6 = vmul.f32 %v6192_v53, %v5370_v33  ;;  %v2442_v62 = vld [vmem:[#allocation2 + $0x28] sm:$0xff] }
  0xe3   :  { %2790 = vmatprep.mubr.f32.mxu0 %v2581_v54  ;;  %2945 = vmatprep.mubr.f32.mxu1 %v2583_v30  ;;  %v2434_v36 = vmul.f32 %v6246_v32, %v5403_v5  ;;  %v2350_v4 = vmul.f32 %v6252_v41, %v5400_v57  ;;  %v2433_v54 = vmul.f32 %v6256_v13, %v5414_v15  ;;  %v2455_v30 = vld [vmem:[#allocation2 + $0x90] sm:$0xff] }
  0xe4   :  { %3011 = vmatpush2.msra.mxu0 %v2117_v11  ;;  %3168 = vmatpush2.msra.mxu1 %v2241_v37  ;;  %v6274_v11 = vcombine.high %v5965_v35, %v5965_v35  ;;  %v2349_v53 = vmul.f32 %v6262_v8, %v5418_v61  ;;  %v2346_v37 = vmul.f32 %v6252_v41, %v5263_v3 }
  0xe5   :  { %2791 = vmatmul.mubr.f32.gmra.mxu0 %v2580_v45  ;;  %2946 = vmatmul.mubr.f32.gmra.mxu1 %v2582_v9  ;;  %v2454_v45 = vld [vmem:[#allocation2 + $0x88] sm:$0xff]  ;;  %v2453_v9 = vld [vmem:[#allocation2 + $0x80] sm:$0xff] }
  0xe6   :  { %3012 = vmatprep.subr.mxu0 %v2114_v31  ;;  %3169 = vmatprep.subr.mxu1 %v2238_v38  ;;  %v2345_v31 = vmul.f32 %v6262_v8, %v5322_v20  ;;  %v2342_v38 = vmul.f32 %v6252_v41, %v5261_v2 }
  0xe7   :  { %3013 = vmatpush2.msra.mxu0 %v2113_v46  ;;  %3170 = vmatpush2.msra.mxu1 %v2237_v47  ;;  %v1556_v46 = vrot.slane %v6274_v11, %v5041_v7  ;;  %v2341_v47 = vmul.f32 %v6262_v8, %v5372_v42 }
  0xe8   :  { %3014 = vmatprep.subr.mxu0 %v2110_v40  ;;  %3171 = vmatprep.subr.mxu1 %v2234_v23  ;;  %v1552_v40 = vrot.slane %v6274_v11, %v8982_v28  ;;  %v2338_v23 = vmul.f32 %v6252_v41, %v5359_v56 }
  0xe9   :  { %2796 = vmatprep.mubr.f32.mxu0 %v2592_v49  ;;  %2951 = vmatprep.mubr.f32.mxu1 %v2594_v10  ;;  %v2465_v49 = vld [vmem:[#allocation2 + $0xe0] sm:$0xff]  ;;  %v2464_v10 = vld [vmem:[#allocation2 + $0xd8] sm:$0xff] }
  0xea   :  { %3015 = vmatpush2.msra.mxu0 %v2109_v50  ;;  %3172 = vmatpush2.msra.mxu1 %v2233_v51  ;;  %v2337_v50 = vmul.f32 %v6262_v8, %v5370_v33  ;;  %v2334_v51 = vmul.f32 %v1556_v46, %v5403_v5 }
  0xeb   :  { %2797 = vmatmul.mubr.f32.gmra.mxu0 %v2591_v19  ;;  %2952 = vmatmul.mubr.f32.gmra.mxu1 %v2593_v26  ;;  %v2463_v19 = vld [vmem:[#allocation2 + $0xd0] sm:$0xff]  ;;  %v2477_v26 = vld [vmem:[#allocation2 + $0x140] sm:$0xff] }
  0xec   :  { %3016 = vmatprep.subr.mxu0 %v2106_v58  ;;  %3173 = vmatprep.subr.mxu1 %v2230_v27  ;;  %v2333_v58 = vmul.f32 %v1552_v40, %v5414_v15  ;;  %v2330_v27 = vmul.f32 %v1556_v46, %v5400_v57 }
  0xed   :  { %3017 = vmatpush2.msra.mxu0 %v2105_v14  ;;  %3174 = vmatpush2.msra.mxu1 %v2229_v29  ;;  %v2476_v14 = vld [vmem:[#allocation2 + $0x138] sm:$0xff]  ;;  %v2329_v29 = vmul.f32 %v1552_v40, %v5418_v61 }
  0xee   :  { %3018 = vmatprep.subr.mxu0 %v2102_v18  ;;  %3175 = vmatprep.subr.mxu1 %v2226_v60  ;;  %v6300_v18 = vcombine.high %v6007_v22, %v6007_v22  ;;  %v2475_v60 = vld [vmem:[#allocation2 + $0x130] sm:$0xff] }
  0xef   :  { %3019 = vmatpush2.msra.mxu0 %v2101_v63  ;;  %3176 = vmatpush2.msra.mxu1 %v2225_v44  ;;  %v2430_v63 = vmul.f32 %v6246_v32, %v5400_v57  ;;  %v2474_v44 = vld [vmem:[#allocation2 + $0x128] sm:$0xff] }
  0xf0   :  { %3177 = vmatprep.mubr.f32.mxu1 %v2444_v55  ;;  %3020 = vmatprep.subr.mxu0 %v2098_v17  ;;  %8996 = vst [vmem:[#allocation39_spill] sm:$0xff] %v6300_v18  ;;  %v2326_v55 = vmul.f32 %v1556_v46, %v5263_v3  ;;  %v2429_v17 = vmul.f32 %v6256_v13, %v5418_v61 }
  0xf1   :  { %3178 = vmatmul.mubr.f32.vlgmr.msra.gmra.mxu1 %v2443_v16  ;;  %3021 = vmatpush2.msra.mxu0 %v2097_v6  ;;  %v2325_v16 = vmul.f32 %v1552_v40, %v5322_v20  ;;  %v2488_v6 = vld [vmem:[#allocation2 + $0x198] sm:$0xff] }
  0xf2   :  { %3022 = vmatprep.mubr.f32.mxu0 %v2442_v62  ;;  %3445 = vmatprep.subr.mxu1 %v2434_v36  ;;  %v2322_v62 = vmul.f32 %v1556_v46, %v5261_v2  ;;  %v1540_v36 = vrot.slane %v6300_v18, %v5041_v7 }
  0xf3   :  { %3023 = vmatmul.mubr.f32.vlgmr.msra.gmra.mxu0 %v2441_v59  ;;  %3268 = vmatprep.subr.mxu0 %v2350_v4  ;;  %v2487_v59 = vld [vmem:[#allocation2 + $0x190] sm:$0xff]  ;;  %v2321_v4 = vmul.f32 %v1552_v40, %v5372_v42 }
  0xf4   :  { %3446 = vmatpush1.msra.mxu1 %v2433_v54  ;;  %3183 = vmatprep.mubr.f32.mxu1 %v2455_v30  ;;  %v1536_v54 = vrot.slane %v6300_v18, %v8982_v28  ;;  %v2318_v30 = vmul.f32 %v1556_v46, %v5359_v56  ;;  %v2497_v46 = vld [vmem:[#allocation2 + $0x1e0] sm:$0xff] }
  0xf5   :  { %3269 = vmatpush1.msra.mxu0 %v2349_v53  ;;  %3184 = vmatmul.mubr.f32.gmra.mxu1 %v2454_v45  ;;  %v2486_v53 = vld [vmem:[#allocation2 + $0x188] sm:$0xff]  ;;  %v2485_v45 = vld [vmem:[#allocation2 + $0x180] sm:$0xff] }
  0xf6   :  { %3270 = vmatprep.subr.mxu0 %v2346_v37  ;;  %3028 = vmatprep.mubr.f32.mxu0 %v2453_v9  ;;  %v1060_v37 = vcombine.high %v6199_v24, %v6202_v25  ;;  %v2499_v9 = vld [vmem:[#allocation2 + $0x1f0] sm:$0xff]  ;;  %v2310_v24 = vmul.f32 %v1540_v36, %v5400_v57  ;;  %v2496_v25 = vld [vmem:[#allocation2 + $0x1d8] sm:$0xff] }
  0xf7   :  { %3271 = vmatpush1.msra.mxu0 %v2345_v31  ;;  %3189 = vmatprep.mubr.f32.mxu1 %v2466_v48  ;;  %v2317_v31 = vmul.f32 %v1552_v40, %v5370_v33  ;;  %v2309_v40 = vmul.f32 %v1536_v54, %v5418_v61 }
  0xf8   :  { %3029 = vmatmul.mubr.f32.gmra.mxu0 %v2452_v39  ;;  %3272 = vmatprep.subr.mxu0 %v2342_v38  ;;  %v2314_v38 = vmul.f32 %v1540_v36, %v5403_v5  ;;  %v2498_v39 = vld [vmem:[#allocation2 + $0x1e8] sm:$0xff]  ;;  %v6323_v48 = vrot.slane %v1060_v37, %v5217_v34  ;;  %v2507_v34 = vld [vmem:[#allocation2 + $0x230] sm:$0xff] }
  0xf9   :  { %3273 = vmatpush1.msra.mxu0 %v2341_v47  ;;  %3190 = vmatmul.mubr.f32.gmra.mxu1 %v2465_v49  ;;  %v2313_v47 = vmul.f32 %v1536_v54, %v5414_v15  ;;  %v2306_v49 = vmul.f32 %v1540_v36, %v5263_v3 }
  0xfa   :  { %3274 = vmatprep.subr.mxu0 %v2338_v23  ;;  %3034 = vmatprep.mubr.f32.mxu0 %v2464_v10  ;;  %8997 = vst [vmem:[#allocation40_spill] sm:$0xff] %v6323_v48  ;;  %v2510_v23 = vld [vmem:[#allocation2 + $0x248] sm:$0xff]  ;;  %v2305_v10 = vmul.f32 %v1536_v54, %v5322_v20 }
  0xfb   :  { %3275 = vmatpush1.msra.mxu0 %v2337_v50  ;;  %3195 = vmatprep.mubr.f32.mxu1 %v2477_v26  ;;  %v2509_v50 = vld [vmem:[#allocation2 + $0x240] sm:$0xff]  ;;  %v2425_v26 = vmul.f32 %v6256_v13, %v5322_v20 }
  0xfc   :  { %3035 = vmatmul.mubr.f32.gmra.mxu0 %v2463_v19  ;;  %3276 = vmatprep.subr.mxu0 %v2334_v51  ;;  %v2508_v51 = vld [vmem:[#allocation2 + $0x238] sm:$0xff]  ;;  %v2426_v19 = vmul.f32 %v6246_v32, %v5263_v3 }
  0xfd   :  { %3277 = vmatpush1.msra.mxu0 %v2333_v58  ;;  %3196 = vmatmul.mubr.f32.gmra.mxu1 %v2476_v14  ;;  %v2302_v58 = vmul.f32 %v1540_v36, %v5261_v2  ;;  %v2301_v14 = vmul.f32 %v1536_v54, %v5372_v42 }
  0xfe   :  { %3278 = vmatprep.subr.mxu0 %v2330_v27  ;;  %3040 = vmatprep.mubr.f32.mxu0 %v2475_v60  ;;  %v6334_v27 = vcombine.high %v6323_v48, %v6323_v48  ;;  %v9000_v60 = vld [vmem:[#allocation13_spill] sm:$0xff] }
  0xff   :  { %3279 = vmatpush1.msra.mxu0 %v2329_v29  ;;  %3447 = vmatprep.subr.mxu1 %v2430_v63  ;;  %v8999_v29 = vld [vmem:[#allocation21_spill] sm:$0xff] }
 0x100   :  { %3041 = vmatmul.mubr.f32.gmra.mxu0 %v2474_v44  ;;  %3280 = vmatprep.subr.mxu0 %v2326_v55  ;;  %8998 = vst [vmem:[#allocation51_spill] sm:$0xff] %v6334_v27  ;;  %v328_v63 = vrot.slane %v9000_v60, %v8999_v29  ;;  %v2521_v44 = vld [vmem:[#allocation2 + $0x2a0] sm:$0xff]  ;;  %v2298_v55 = vmul.f32 %v1540_v36, %v5359_v56  ;;  %v2518_v36 = vld [vmem:[#allocation2 + $0x288] sm:$0xff] }
 0x101   :  { %3448 = vmatpush1.msra.mxu1 %v2429_v17  ;;  %3201 = vmatprep.mubr.f32.mxu1 %v2488_v6  ;;  %v2520_v17 = vld [vmem:[#allocation2 + $0x298] sm:$0xff]  ;;  %v2519_v6 = vld [vmem:[#allocation2 + $0x290] sm:$0xff] }
 0x102   :  { %3281 = vmatpush1.msra.mxu0 %v2325_v16  ;;  %3202 = vmatmul.mubr.f32.gmra.mxu1 %v2487_v59  ;;  %v2297_v16 = vmul.f32 %v1536_v54, %v5370_v33  ;;  %v6345_v59 = vrot.slane %v6334_v27, %v5041_v7  ;;  %v6353_v54 = vrot.slane %v6334_v27, %v8982_v28 }
 0x103   :  { %3282 = vmatprep.subr.mxu0 %v2322_v62  ;;  %3046 = vmatprep.mubr.f32.mxu0 %v2486_v53  ;;  %v2294_v62 = vmul.f32 %v5984_v1, %v5403_v5 }
 0x104   :  { %3283 = vmatpush1.msra.mxu0 %v2321_v4  ;;  %3207 = vmatprep.mubr.f32.mxu1 %v2499_v9  ;;  %v9001_v4 = vld [vmem:[#allocation17_spill] sm:$0xff] }
 0x105   :  { %3047 = vmatmul.mubr.f32.gmra.mxu0 %v2485_v45  ;;  %3284 = vmatprep.subr.mxu0 %v2318_v30  ;;  %v440_v53 = vrot.slane %v9001_v4, %v8999_v29  ;;  %v9002_v30 = vld [vmem:[#allocation49_spill] sm:$0xff]  ;;  %v6356_v45 = vrot.slane %v328_v63, %v8982_v28 }
 0x106   :  { %3285 = vmatpush1.msra.mxu0 %v2317_v31  ;;  %3208 = vmatmul.mubr.f32.gmra.mxu1 %v2498_v39  ;;  %v2293_v37 = vmul.f32 %v9002_v30, %v5414_v15  ;;  %v9003_v31 = vld [vmem:[#allocation20_spill] sm:$0xff]  ;;  %v2290_v39 = vmul.f32 %v5984_v1, %v5400_v57  ;;  %v2529_v1 = vld [vmem:[#allocation2 + $0x2e0] sm:$0xff]  ;;  %v9008_v63 = vld [vmem:[#allocation25_spill] sm:$0xff] }
 0x107   :  { %3286 = vmatprep.subr.mxu0 %v2314_v38  ;;  %3052 = vmatprep.mubr.f32.mxu0 %v2497_v46  ;;  %v384_v9 = vrot.slane %v9003_v31, %v8999_v29  ;;  %v2532_v38 = vld [vmem:[#allocation2 + $0x2f8] sm:$0xff]  ;;  %v2289_v46 = vmul.f32 %v9002_v30, %v5418_v61  ;;  %vm364_vm14 = vcmp.eq.f32.partialorder %v9008_v63, %v6356_v45  ;;  %v2554_v30 = vld [vmem:[#allocation2 + $0x3a8] sm:$0xff] }
 0x108   :  { %3287 = vmatpush1.msra.mxu0 %v2313_v47  ;;  %3213 = vmatprep.mubr.f32.mxu1 %v2510_v23  ;;  %v2531_v47 = vld [vmem:[#allocation2 + $0x2f0] sm:$0xff]  ;;  %v2414_v23 = vmul.f32 %v6345_v59, %v5403_v5  ;;  %vm368_vm0 = vcmp.eq.f32.partialorder %v8995_v43, %v6356_v45 }
 0x109   :  { %3053 = vmatmul.mubr.f32.gmra.mxu0 %v2496_v25  ;;  %3288 = vmatprep.subr.mxu0 %v2310_v24  ;;  %v9004_v24 = vld [vmem:[#allocation15_spill] sm:$0xff] }
 0x10a   :  { %3289 = vmatpush1.msra.mxu0 %v2309_v40  ;;  %3214 = vmatmul.mubr.f32.gmra.mxu1 %v2509_v50  ;;  %v496_v25 = vrot.slane %v9004_v24, %v8999_v29  ;;  %v2530_v40 = vld [vmem:[#allocation2 + $0x2e8] sm:$0xff]  ;;  %v2413_v50 = vmul.f32 %v6353_v54, %v5414_v15  ;;  %v6386_v29 = vcombine.high %v6230_v21, %v6230_v21 }
 0x10b   :  { %3290 = vmatprep.subr.mxu0 %v2306_v49  ;;  %3058 = vmatprep.mubr.f32.mxu0 %v2508_v51  ;;  %v6369_v49 = vrot.slane %v440_v53, %v8982_v28  ;;  %v6376_v51 = vrot.slane %v384_v9, %v8982_v28  ;;  %v2405_v53 = vmul.f32 %v6353_v54, %v5322_v20 }
 0x10c   :  { %3291 = vmatpush1.msra.mxu0 %v2305_v10  ;;  %3449 = vmatprep.subr.mxu1 %v2426_v19  ;;  %v9005_v10 = vld [vmem:[#allocation24_spill] sm:$0xff]  ;;  %9007 = vst [vmem:[#allocation21_spill] sm:$0xff] %v6386_v29  ;;  %v6417_v9 = vrot.slane %v6386_v29, %v5041_v7 }
 0x10d   :  { %3059 = vmatmul.mubr.f32.gmra.mxu0 %v2507_v34  ;;  %3292 = vmatprep.subr.mxu0 %v2302_v58  ;;  %vm352_vm12 = vcmp.eq.f32.partialorder %v9005_v10, %v6356_v45  ;;  %v2543_v19 = vld [vmem:[#allocation2 + $0x350] sm:$0xff]  ;;  %v2410_v34 = vmul.f32 %v6345_v59, %v5400_v57  ;;  %v9006_v58 = vld [vmem:[#allocation23_spill] sm:$0xff]  ;;  %vm464_vm15 = vcmp.eq.f32.partialorder %v9005_v10, %v6369_v49 }
 0x10e   :  { %3450 = vmatpush1.msra.mxu1 %v2425_v26  ;;  %3219 = vmatprep.mubr.f32.mxu1 %v2521_v44  ;;  %vm360_vm13 = vcmp.eq.f32.partialorder %v9006_v58, %v6356_v45  ;;  %v2542_v26 = vld [vmem:[#allocation2 + $0x348] sm:$0xff]  ;;  %v6391_v44 = vrot.slane %v496_v25, %v8982_v28  ;;  %vm472_vm2 = vcmp.eq.f32.partialorder %v9006_v58, %v6369_v49 }
 0x10f   :  { %3293 = vmatpush1.msra.mxu0 %v2301_v14  ;;  %3220 = vmatmul.mubr.f32.gmra.mxu1 %v2520_v17  ;;  %v2409_v14 = vmul.f32 %v6353_v54, %v5418_v61  ;;  %v2422_v17 = vmul.f32 %v6246_v32, %v5261_v2  ;;  %vm476_vm1 = vcmp.eq.f32.partialorder %v9008_v63, %v6369_v49  ;;  %v416_v25 = vsel %vm360_vm13, %v6376_v51, 0.0 }
 0x110   :  { %3294 = vmatprep.subr.mxu0 %v2298_v55  ;;  %3064 = vmatprep.mubr.f32.mxu0 %v2519_v6  ;;  %v2541_v55 = vld [vmem:[#allocation2 + $0x340] sm:$0xff]  ;;  %v2406_v6 = vmul.f32 %v6345_v59, %v5263_v3  ;;  %vm480_vm3 = vcmp.eq.f32.partialorder %v8995_v43, %v6369_v49 }
 0x111   :  { %3295 = vmatpush1.msra.mxu0 %v2297_v16  ;;  %3225 = vmatprep.mubr.f32.mxu1 %v2532_v38  ;;  %v2540_v16 = vld [vmem:[#allocation2 + $0x338] sm:$0xff]  ;;  %v520_v38 = vsel %vm464_vm15, %v6391_v44, 0.0 }
 0x112   :  { %3065 = vmatmul.mubr.f32.gmra.mxu0 %v2518_v36  ;;  %3296 = vmatprep.subr.mxu0 %v2294_v62  ;;  %v2421_v62 = vmul.f32 %v6256_v13, %v5372_v42  ;;  %v408_v36 = vsel %vm352_vm12, %v6376_v51, 0.0 }
 0x113   :  { %3297 = vmatpush1.msra.mxu0 %v2293_v37  ;;  %3226 = vmatmul.mubr.f32.gmra.mxu1 %v2531_v47  ;;  %v2402_v37 = vmul.f32 %v6345_v59, %v5261_v2  ;;  %v2401_v47 = vmul.f32 %v6353_v54, %v5372_v42 }
 0x114   :  { %3298 = vmatprep.subr.mxu0 %v2290_v39  ;;  %3070 = vmatprep.mubr.f32.mxu0 %v2530_v40  ;;  %v2553_v39 = vld [vmem:[#allocation2 + $0x3a0] sm:$0xff]  ;;  %v2552_v40 = vld [vmem:[#allocation2 + $0x398] sm:$0xff] }
 0x115   :  { %3299 = vmatpush1.msra.mxu0 %v2289_v46  ;;  %3231 = vmatprep.mubr.f32.mxu1 %v2543_v19  ;;  %v6429_v46 = vrot.slane %v6386_v29, %v8982_v28  ;;  %v532_v19 = vsel %vm476_vm1, %v6391_v44, 0.0  ;;  %v9031_v29 = vld [vmem:[#allocation42_spill] sm:$0xff] }
 0x116   :  { %3071 = vmatmul.mubr.f32.gmra.mxu0 %v2529_v1  ;;  %3300 = vmatprep.subr.mxu0 %v2414_v23  ;;  %v2398_v23 = vmul.f32 %v6345_v59, %v5359_v56  ;;  %v420_v1 = vsel %vm364_vm14, %v6376_v51, 0.0  ;;  %v2397_v59 = vmul.f32 %v6353_v54, %v5370_v33  ;;  %v2564_v54 = vld [vmem:[#allocation2 + $0x3f8] sm:$0xff] }
 0x117   :  { %3301 = vmatpush2.msra.mxu0 %v2413_v50  ;;  %3232 = vmatmul.mubr.f32.gmra.mxu1 %v2542_v26  ;;  %v528_v50 = vsel %vm472_vm2, %v6391_v44, 0.0  ;;  %v424_v26 = vsel %vm368_vm0, %v6376_v51, 0.0  ;;  %vm2602_vm0 = vcmask 326656  }
 0x118   :  { %3302 = vmatprep.subr.mxu0 %v2410_v34  ;;  %3076 = vmatprep.mubr.f32.mxu0 %v2541_v55  ;;  %v2551_v34 = vld [vmem:[#allocation2 + $0x390] sm:$0xff]  ;;  %v6459_v55 = vadd.f32 %v520_v38, %v408_v36  ;;  %v6469_v36 = vadd.f32 %v528_v50, %v416_v25  ;;  %v2390_v38 = vmul.f32 %v6417_v9, %v5400_v57 }
 0x119   :  { %3303 = vmatpush2.msra.mxu0 %v2409_v14  ;;  %3451 = vmatprep.subr.mxu1 %v2422_v17  ;;  %v536_v14 = vsel %vm480_vm3, %v6391_v44, 0.0  ;;  %v2565_v17 = vld [vmem:[#allocation2 + $0x400] sm:$0xff]  ;;  %v2389_v25 = vmul.f32 %v6429_v46, %v5418_v61  ;;  %v2386_v50 = vmul.f32 %v6417_v9, %v5263_v3 }
 0x11a   :  { %3077 = vmatmul.mubr.f32.gmra.mxu0 %v2540_v16  ;;  %3304 = vmatprep.subr.mxu0 %v2406_v6  ;;  %v2394_v16 = vmul.f32 %v6417_v9, %v5403_v5  ;;  %v2393_v6 = vmul.f32 %v6429_v46, %v5414_v15 }
 0x11b   :  { %3452 = vmatpush1.msra.mxu1 %v2421_v62  ;;  %3237 = vmatprep.mubr.f32.mxu1 %v2554_v30  ;;  %v324_v62 = vrot.slane %v9000_v60, %v8982_v28  ;;  %v6471_v30 = vadd.f32 %v532_v19, %v420_v1  ;;  %v6483_v1 = vrot.slane %v6323_v48, %v5041_v7 }
 0x11c   :  { %3305 = vmatpush2.msra.mxu0 %v2405_v53  ;;  %3238 = vmatmul.mubr.f32.gmra.mxu1 %v2553_v39  ;;  %v436_v53 = vrot.slane %v9001_v4, %v8982_v28  ;;  %v9009_v39 = vld [vmem:[#allocation18_spill] sm:$0xff]  ;;  %v380_v19 = vrot.slane %v9003_v31, %v8982_v28  ;;  %v2385_v7 = vmul.f32 %v6429_v46, %v5322_v20  ;;  %v9014_v31 = vld [vmem:[#allocation33_spill] sm:$0xff] }
 0x11d   :  { %3306 = vmatprep.subr.mxu0 %v2402_v37  ;;  %3082 = vmatprep.mubr.f32.mxu0 %v2552_v40  ;;  %v2563_v37 = vld [vmem:[#allocation2 + $0x3f0] sm:$0xff]  ;;  %vm356_vm4 = vcmp.eq.f32.partialorder %v9009_v39, %v6356_v45  ;;  %v2562_v40 = vld [vmem:[#allocation2 + $0x3e8] sm:$0xff]  ;;  %vm468_vm5 = vcmp.eq.f32.partialorder %v9009_v39, %v6369_v49 }
 0x11e   :  { %3307 = vmatpush2.msra.mxu0 %v2401_v47  ;;  %v6477_v47 = vadd.f32 %v536_v14, %v424_v26  ;;  %3243 = vmatprep.mubr.f32.mxu1 %v2565_v17  ;;  %v6496_v26 = vrot.slane %v324_v62, %v8982_v28  ;;  %v6499_v14 = vrot.slane %v436_v53, %v8982_v28  ;;  %v2574_v17 = vld [vmem:[#allocation2 + $0x448] sm:$0xff]  ;;  %v2573_v62 = vld [vmem:[#allocation2 + $0x440] sm:$0xff]  ;;  %v524_v45 = vsel %vm468_vm5, %v6391_v44, 0.0 }
 0x11f   :  { %3083 = vmatmul.mubr.f32.gmra.mxu0 %v2551_v34  ;;  %3308 = vmatprep.subr.mxu0 %v2398_v23  ;;  %v2576_v23 = vld [vmem:[#allocation2 + $0x458] sm:$0xff]  ;;  %v492_v34 = vrot.slane %v9004_v24, %v8982_v28  ;;  %v2382_v53 = vmul.f32 %v6417_v9, %v5261_v2  ;;  %v2587_v24 = vld [vmem:[#allocation2 + $0x4b0] sm:$0xff] }
 0x120   :  { %9010 = vst [vmem:[#allocation49_spill] sm:$0xff] %v6477_v47  ;;  %3309 = vmatpush2.msra.mxu0 %v2397_v59  ;;  %3244 = vmatmul.mubr.f32.gmra.mxu1 %v2564_v54  ;;  %v2575_v59 = vld [vmem:[#allocation2 + $0x450] sm:$0xff]  ;;  %v2417_v54 = vmul.f32 %v6256_v13, %v5370_v33  ;;  %v2377_v13 = vmul.f32 %v6429_v46, %v5370_v33 }
 0x121   :  { %3310 = vmatprep.subr.mxu0 %v2394_v16  ;;  %3088 = vmatprep.mubr.f32.mxu0 %v2563_v37  ;;  %v2418_v16 = vmul.f32 %v6246_v32, %v5359_v56  ;;  %v2381_v37 = vmul.f32 %v6429_v46, %v5372_v42  ;;  %v9011_v32 = vld [vmem:[#allocation11_spill] sm:$0xff]  ;;  %vm351_vm6 = vcmp.eq.f32.partialorder %v9005_v10, %v6496_v26 }
 0x122   :  { %3311 = vmatpush2.msra.mxu0 %v2393_v6  ;;  %v6507_v6 = vrot.slane %v6323_v48, %v8982_v28  ;;  %3249 = vmatprep.mubr.f32.mxu1 %v2576_v23  ;;  %v6524_v23 = vrot.slane %v492_v34, %v8982_v28  ;;  %vm463_vm7 = vcmp.eq.f32.partialorder %v9005_v10, %v6499_v14  ;;  %v6533_v46 = vsub.s32 2, %v9011_v32 }
 0x123   :  { %3089 = vmatmul.mubr.f32.gmra.mxu0 %v2562_v40  ;;  %3312 = vmatprep.subr.mxu0 %v2390_v38  ;;  %v2378_v38 = vmul.f32 %v6417_v9, %v5359_v56  ;;  %v6516_v40 = vsub.s32 3, %v9011_v32  ;;  %v2374_v9 = vmul.f32 %v6483_v1, %v5403_v5  ;;  %vm367_vm8 = vcmp.eq.f32.partialorder %v8995_v43, %v6496_v26 }
 0x124   :  { %3313 = vmatpush2.msra.mxu0 %v2389_v25  ;;  %3250 = vmatmul.mubr.f32.gmra.mxu1 %v2575_v59  ;;  %v6521_v25 = vrot.slane %v380_v19, %v8982_v28  ;;  %9012 = vst [vmem:[#allocation52_spill] sm:$0xff] %v6533_v46  ;;  %v2373_v28 = vmul.f32 %v6507_v6, %v5414_v15  ;;  %v2585_v19 = vld [vmem:[#allocation2 + $0x4a0] sm:$0xff] }
 0x125   :  { %3314 = vmatprep.subr.mxu0 %v2386_v50  ;;  %3094 = vmatprep.mubr.f32.mxu0 %v2574_v17  ;;  %v2586_v50 = vld [vmem:[#allocation2 + $0x4a8] sm:$0xff]  ;;  %vm479_vm9 = vcmp.eq.f32.partialorder %v8995_v43, %v6499_v14  ;;  %v2370_v34 = vmul.f32 %v6483_v1, %v5400_v57  ;;  %v2369_v59 = vmul.f32 %v6507_v6, %v5418_v61  ;;  %v2584_v17 = vld [vmem:[#allocation2 + $0x498] sm:$0xff] }
 0x126   :  { %3315 = vmatpush2.msra.mxu0 %v2385_v7  ;;  %3453 = vmatprep.subr.mxu1 %v2418_v16  ;;  %v2366_v7 = vmul.f32 %v6483_v1, %v5263_v3  ;;  %v2365_v16 = vmul.f32 %v6507_v6, %v5322_v20  ;;  %v407_v57 = vsel %vm351_vm6, %v6521_v25, 0.0  ;;  %v519_v3 = vsel %vm463_vm7, %v6524_v23, 0.0  ;;  %v2598_v61 = vld [vmem:[#allocation2 + $0x508] sm:$0xff] }
 0x127   :  { %3095 = vmatmul.mubr.f32.gmra.mxu0 %v2573_v62  ;;  %3316 = vmatprep.subr.mxu0 %v2382_v53  ;;  %v9013_v62 = vld [vmem:[#allocation32_spill] sm:$0xff]  ;;  %v423_v20 = vsel %vm367_vm8, %v6521_v25, 0.0  ;;  %vm363_vm10 = vcmp.eq.f32.partialorder %v9008_v63, %v6496_v26  ;;  %vm475_vm11 = vcmp.eq.f32.partialorder %v9008_v63, %v6499_v14  ;;  %v6585_v4 = vrot.slane %v9014_v31, %v6516_v40 }
 0x128   :  { %3454 = vmatpush1.msra.mxu1 %v2417_v54  ;;  %3255 = vmatprep.mubr.f32.mxu1 %v2587_v24  ;;  %v6551_v53 = vrot.slane %v9013_v62, %v6516_v40  ;;  %v535_v24 = vsel %vm479_vm9, %v6524_v23, 0.0  ;;  %v412_v54 = vsel %vm356_vm4, %v6376_v51, 0.0  ;;  %v2596_v51 = vld [vmem:[#allocation2 + $0x4f8] sm:$0xff]  ;;  %vm359_vm12 = vcmp.eq.f32.partialorder %v9006_v58, %v6496_v26 }
 0x129   :  { %3317 = vmatpush2.msra.mxu0 %v2381_v37  ;;  %3256 = vmatmul.mubr.f32.gmra.mxu1 %v2586_v50  ;;  %v2597_v37 = vld [vmem:[#allocation2 + $0x500] sm:$0xff]  ;;  %v6581_v50 = vrot.slane %v9013_v62, %v6533_v46  ;;  %vm471_vm13 = vcmp.eq.f32.partialorder %v9006_v58, %v6499_v14  ;;  %v6601_v49 = vrot.slane %v9014_v31, %v6533_v46  ;;  %v419_v44 = vsel %vm363_vm10, %v6521_v25, 0.0 }
 0x12a   :  { %3318 = vmatprep.subr.mxu0 %v2378_v38  ;;  %3100 = vmatprep.mubr.f32.mxu0 %v2585_v19  ;;  %v2362_v38 = vmul.f32 %v6483_v1, %v5261_v2  ;;  %v2595_v2 = vld [vmem:[#allocation2 + $0x4f0] sm:$0xff]  ;;  %v6597_v19 = vadd.f32 %v535_v24, %v423_v20  ;;  %v2358_v31 = vmul.f32 %v6483_v1, %v5359_v56  ;;  %v415_v62 = vsel %vm359_vm12, %v6521_v25, 0.0  ;;  %v9016_v24 = vld [vmem:[#allocation27_spill] sm:$0xff] }
 0x12b   :  { %3319 = vmatpush2.msra.mxu0 %v2377_v13  ;;  %v6591_v13 = vadd.f32 %v519_v3, %v407_v57  ;;  %3261 = vmatprep.mubr.f32.mxu1 %v2598_v61  ;;  %vm355_vm14 = vcmp.eq.f32.partialorder %v9009_v39, %v6496_v26  ;;  %vm467_vm15 = vcmp.eq.f32.partialorder %v9009_v39, %v6499_v14  ;;  %v2447_v56 = vld [vmem:[#allocation2 + $0x50] sm:$0xff]  ;;  %v8909_v57 = vmov 0.0  }
 0x12c   :  { %3101 = vmatmul.mubr.f32.gmra.mxu0 %v2584_v17  ;;  %3320 = vmatprep.subr.mxu0 %v2374_v9  ;;  %9015 = vst [vmem:[#allocation32_spill] sm:$0xff] %v6597_v19  ;;  %v531_v9 = vsel %vm475_vm11, %v6524_v23, 0.0  ;;  %v2361_v17 = vmul.f32 %v6507_v6, %v5372_v42  ;;  %v1836_v1 = vmul.f32 %v6585_v4, %v6477_v47 }
 0x12d   :  { %3321 = vmatpush2.msra.mxu0 %v2373_v28  ;;  %3262 = vmatmul.mubr.f32.gmra.mxu1 %v2597_v37  ;;  %v1840_v28 = vmul.f32 %v6551_v53, %v6459_v55  ;;  %v1839_v42 = vmul.f32 %v6581_v50, %v6591_v13  ;;  %v1835_v3 = vmul.f32 %v6601_v49, %v6597_v19 }
 0x12e   :  { %3322 = vmatprep.subr.mxu0 %v2370_v34  ;;  %3106 = vmatprep.mubr.f32.mxu0 %v2596_v51  ;;  %v527_v34 = vsel %vm471_vm13, %v6524_v23, 0.0  ;;  %v2354_v61 = vmul.f32 %v6252_v41, %v5403_v5  ;;  %v6646_v37 = vrot.slane %v9016_v24, %v6516_v40  ;;  %v1832_v5 = vmul.f32 %v6585_v4, %v6471_v30 }
 0x12f   :  { %3323 = vmatpush2.msra.mxu0 %v2369_v59  ;;  %v6633_v59 = vadd.f32 %v531_v9, %v419_v44  ;;  %3487 = vmatprep.mubr.f32.mxu1 %v8909_v57  ;;  %v6642_v20 = vadd.f32 %v527_v34, %v415_v62  ;;  %v2353_v41 = vmul.f32 %v6262_v8, %v5414_v15  ;;  %v2445_v15 = vld [vmem:[#allocation2 + $0x40] sm:$0xff] }
 0x130   :  { %3107 = vmatmul.mubr.f32.gmra.mxu0 %v2595_v2  ;;  %3324 = vmatprep.subr.mxu0 %v2366_v7  ;;  %v2357_v7 = vmul.f32 %v6507_v6, %v5370_v33  ;;  %v523_v33 = vsel %vm467_vm15, %v6524_v23, 0.0  ;;  %v6656_v6 = vadd.f32 %v524_v45, %v412_v54  ;;  %v6667_v14 = vrot.slane %v9016_v24, %v6533_v46  ;;  %v2458_v2 = vld [vmem:[#allocation2 + $0xa8] sm:$0xff]  ;;  %v2457_v34 = vld [vmem:[#allocation2 + $0xa0] sm:$0xff] }
 0x131   :  { %3325 = vmatpush2.msra.mxu0 %v2365_v16  ;;  %3578 = vmatprep.subr.mxu1 %v1840_v28  ;;  %v411_v16 = vsel %vm355_vm14, %v6521_v25, 0.0  ;;  %v1831_v26 = vmul.f32 %v6601_v49, %v6633_v59  ;;  %v2446_v25 = vld [vmem:[#allocation2 + $0x48] sm:$0xff]  ;;  %v1828_v23 = vmul.f32 %v6585_v4, %v6469_v36  ;;  %v1827_v8 = vmul.f32 %v6601_v49, %v6642_v20  ;;  %v9018_v28 = vld [vmem:[#allocation29_spill] sm:$0xff] }
 0x132   :  { %3326 = vmatprep.subr.mxu0 %v2362_v38  ;;  %4742 = vmatmul.mubr.msk.f32.vlgmr.msra.gmra.mxu1 %vm2602_vm0, %v2447_v56  ;;  %v6671_v54 = vadd.f32 %v523_v33, %v411_v16  ;;  %v1968_v38 = vmul.f32 %v6646_v37, %v6469_v36  ;;  %v1824_v45 = vmul.f32 %v6585_v4, %v6656_v6  ;;  %v2469_v16 = vld [vmem:[#allocation2 + $0x100] sm:$0xff] }
 0x133   :  { %3327 = vmatpush2.msra.mxu0 %v2361_v17  ;;  %3579 = vmatpush1.msra.mxu1 %v1839_v42  ;;  %v1967_v51 = vmul.f32 %v6667_v14, %v6642_v20  ;;  %v1964_v9 = vmul.f32 %v6646_v37, %v6656_v6  ;;  %v6687_v17 = vrot.slane %v9018_v28, %v6516_v40 }
 0x134   :  { %3328 = vmatprep.subr.mxu0 %v2358_v31  ;;  %3580 = vmatprep.subr.mxu1 %v1836_v1  ;;  %9017 = vst [vmem:[#allocation33_spill] sm:$0xff] %v6671_v54  ;;  %v1823_v44 = vmul.f32 %v6601_v49, %v6671_v54  ;;  %v1820_v31 = vmul.f32 %v6585_v4, %v6459_v55  ;;  %v9019_v1 = vld [vmem:[#allocation31_spill] sm:$0xff] }
 0x135   :  { %3329 = vmatpush2.msra.mxu0 %v2357_v7  ;;  %3581 = vmatpush1.msra.mxu1 %v1835_v3  ;;  %v1819_v62 = vmul.f32 %v6601_v49, %v6591_v13  ;;  %v1963_v56 = vmul.f32 %v6667_v14, %v6671_v54  ;;  %v6698_v42 = vrot.slane %v9018_v28, %v6533_v46  ;;  %v2456_v49 = vld [vmem:[#allocation2 + $0x98] sm:$0xff]  ;;  %v2479_v28 = vld [vmem:[#allocation2 + $0x150] sm:$0xff] }
 0x136   :  { %3330 = vmatprep.subr.mxu0 %v2354_v61  ;;  %3582 = vmatprep.subr.mxu1 %v1832_v5  ;;  %v6702_v3 = vrot.slane %v9019_v1, %v6516_v40  ;;  %v1960_v4 = vmul.f32 %v6646_v37, %v6459_v55  ;;  %v1816_v7 = vmul.f32 %v6687_v17, %v6477_v47 }
 0x137   :  { %3331 = vmatpush2.msra.mxu0 %v2353_v41  ;;  %3583 = vmatpush1.msra.mxu1 %v1831_v26  ;;  %v6711_v61 = vrot.slane %v9019_v1, %v6533_v46  ;;  %v1959_v24 = vmul.f32 %v6667_v14, %v6591_v13  ;;  %v1815_v33 = vmul.f32 %v6698_v42, %v6597_v19  ;;  %v2468_v26 = vld [vmem:[#allocation2 + $0xf8] sm:$0xff] }
 0x138   :  { %3332 = vmatprep.mubr.f32.mxu0 %v2446_v25  ;;  %3584 = vmatprep.subr.mxu1 %v1828_v23  ;;  %v1956_v5 = vmul.f32 %v6702_v3, %v6477_v47  ;;  %v1812_v41 = vmul.f32 %v6687_v17, %v6471_v30  ;;  %v1811_v23 = vmul.f32 %v6698_v42, %v6633_v59 }
 0x139   :  { %3333 = vmatmul.mubr.f32.vlgmr.msra.gmra.mxu0 %v2445_v15  ;;  %3585 = vmatpush1.msra.mxu1 %v1827_v8  ;;  %v1955_v25 = vmul.f32 %v6711_v61, %v6597_v19  ;;  %v1952_v15 = vmul.f32 %v6702_v3, %v6471_v30  ;;  %v2467_v8 = vld [vmem:[#allocation2 + $0xf0] sm:$0xff]  ;;  %v6986_v27 = vrot.slane %v9031_v29, %v6516_v40 }
 0x13a   :  { %3733 = vmatprep.subr.mxu0 %v1968_v38  ;;  %3493 = vmatprep.mubr.f32.mxu1 %v8909_v57  ;;  %v1808_v38 = vmul.f32 %v6687_v17, %v6469_v36 }
 0x13b   :  { %3586 = vmatprep.subr.mxu1 %v1824_v45  ;;  %3734 = vmatpush1.msra.mxu0 %v1967_v51  ;;  %v1951_v45 = vmul.f32 %v6711_v61, %v6633_v59  ;;  %v2480_v51 = vld [vmem:[#allocation2 + $0x158] sm:$0xff] }
 0x13c   :  { %4743 = vmatmul.mubr.msk.f32.gmra.mxu1 %vm2602_vm0, %v2458_v2  ;;  %3735 = vmatprep.subr.mxu0 %v1964_v9  ;;  %v1807_v2 = vmul.f32 %v6698_v42, %v6642_v20  ;;  %v1804_v9 = vmul.f32 %v6687_v17, %v6656_v6 }
 0x13d   :  { %3587 = vmatpush1.msra.mxu1 %v1823_v44  ;;  %3338 = vmatprep.mubr.f32.mxu0 %v2457_v34  ;;  %v1948_v44 = vmul.f32 %v6702_v3, %v6469_v36  ;;  %v1944_v34 = vmul.f32 %v6702_v3, %v6656_v6 }
 0x13e   :  { %3588 = vmatprep.subr.mxu1 %v1820_v31  ;;  %3736 = vmatpush1.msra.mxu0 %v1963_v56  ;;  %v1947_v31 = vmul.f32 %v6711_v61, %v6642_v20  ;;  %v9020_v56 = vld [vmem:[#allocation30_spill] sm:$0xff] }
 0x13f   :  { %3589 = vmatpush1.msra.mxu1 %v1819_v62  ;;  %3339 = vmatmul.mubr.f32.gmra.mxu0 %v2456_v49  ;;  %v1803_v62 = vmul.f32 %v6698_v42, %v6671_v54  ;;  %v6749_v1 = vrot.slane %v9020_v56, %v6516_v40  ;;  %v1800_v49 = vmul.f32 %v6687_v17, %v6459_v55 }
 0x140   :  { %3737 = vmatprep.subr.mxu0 %v1960_v4  ;;  %3499 = vmatprep.mubr.f32.mxu1 %v8909_v57  ;;  %v2478_v4 = vld [vmem:[#allocation2 + $0x148] sm:$0xff]  ;;  %v1940_v17 = vmul.f32 %v6702_v3, %v6459_v55 }
 0x141   :  { %3590 = vmatprep.subr.mxu1 %v1816_v7  ;;  %3738 = vmatpush1.msra.mxu0 %v1959_v24  ;;  %v6755_v7 = vrot.slane %v9020_v56, %v6533_v46  ;;  %v1943_v24 = vmul.f32 %v6711_v61, %v6671_v54  ;;  %v1784_v56 = vmul.f32 %v6749_v1, %v6656_v6 }
 0x142   :  { %4744 = vmatmul.mubr.msk.f32.gmra.mxu1 %vm2602_vm0, %v2469_v16  ;;  %3739 = vmatprep.subr.mxu0 %v1956_v5  ;;  %v9021_v16 = vld [vmem:[#allocation35_spill] sm:$0xff]  ;;  %v2491_v5 = vld [vmem:[#allocation2 + $0x1b0] sm:$0xff] }
 0x143   :  { %3591 = vmatpush1.msra.mxu1 %v1815_v33  ;;  %3344 = vmatprep.mubr.f32.mxu0 %v2468_v26  ;;  %v6761_v33 = vrot.slane %v9021_v16, %v6516_v40  ;;  %v1796_v26 = vmul.f32 %v6749_v1, %v6477_v47 }
 0x144   :  { %3592 = vmatprep.subr.mxu1 %v1812_v41  ;;  %3740 = vmatpush1.msra.mxu0 %v1955_v25  ;;  %v1799_v41 = vmul.f32 %v6698_v42, %v6591_v13  ;;  %v6771_v25 = vrot.slane %v9021_v16, %v6533_v46  ;;  %v1795_v42 = vmul.f32 %v6755_v7, %v6597_v19 }
 0x145   :  { %3593 = vmatpush1.msra.mxu1 %v1811_v23  ;;  %3345 = vmatmul.mubr.f32.gmra.mxu0 %v2467_v8  ;;  %v2490_v23 = vld [vmem:[#allocation2 + $0x1a8] sm:$0xff]  ;;  %v1936_v3 = vmul.f32 %v6761_v33, %v6477_v47  ;;  %v2489_v8 = vld [vmem:[#allocation2 + $0x1a0] sm:$0xff] }
 0x146   :  { %3741 = vmatprep.subr.mxu0 %v1952_v15  ;;  %3505 = vmatprep.mubr.f32.mxu1 %v8909_v57  ;;  %v1939_v15 = vmul.f32 %v6711_v61, %v6591_v13  ;;  %v1935_v61 = vmul.f32 %v6771_v25, %v6597_v19 }
 0x147   :  { %3594 = vmatprep.subr.mxu1 %v1808_v38  ;;  %3742 = vmatpush1.msra.mxu0 %v1951_v45  ;;  %v1792_v38 = vmul.f32 %v6749_v1, %v6471_v30  ;;  %v2502_v45 = vld [vmem:[#allocation2 + $0x208] sm:$0xff] }
 0x148   :  { %4745 = vmatmul.mubr.msk.f32.gmra.mxu1 %vm2602_vm0, %v2480_v51  ;;  %3743 = vmatprep.subr.mxu0 %v1948_v44  ;;  %v1791_v51 = vmul.f32 %v6755_v7, %v6633_v59  ;;  %v1788_v44 = vmul.f32 %v6749_v1, %v6469_v36 }
 0x149   :  { %3595 = vmatpush1.msra.mxu1 %v1807_v2  ;;  %3350 = vmatprep.mubr.f32.mxu0 %v2479_v28  ;;  %v1932_v2 = vmul.f32 %v6761_v33, %v6471_v30  ;;  %v1931_v28 = vmul.f32 %v6771_v25, %v6633_v59 }
 0x14a   :  { %3596 = vmatprep.subr.mxu1 %v1804_v9  ;;  %3744 = vmatpush1.msra.mxu0 %v1947_v31  ;;  %v2501_v9 = vld [vmem:[#allocation2 + $0x200] sm:$0xff]  ;;  %v1787_v31 = vmul.f32 %v6755_v7, %v6642_v20 }
 0x14b   :  { %3597 = vmatpush1.msra.mxu1 %v1803_v62  ;;  %3351 = vmatmul.mubr.f32.gmra.mxu0 %v2478_v4  ;;  %v1928_v62 = vmul.f32 %v6761_v33, %v6469_v36 }
 0x14c   :  { %3745 = vmatprep.subr.mxu0 %v1944_v34  ;;  %3511 = vmatprep.mubr.f32.mxu1 %v8909_v57  ;;  %v2500_v34 = vld [vmem:[#allocation2 + $0x1f8] sm:$0xff] }
 0x14d   :  { %3598 = vmatprep.subr.mxu1 %v1800_v49  ;;  %3746 = vmatpush1.msra.mxu0 %v1943_v24  ;;  %v1927_v24 = vmul.f32 %v6771_v25, %v6642_v20 }
 0x14e   :  { %4746 = vmatmul.mubr.msk.f32.gmra.mxu1 %vm2602_vm0, %v2491_v5  ;;  %3747 = vmatprep.subr.mxu0 %v1940_v17  ;;  %v2513_v5 = vld [vmem:[#allocation2 + $0x260] sm:$0xff]  ;;  %v1924_v17 = vmul.f32 %v6761_v33, %v6656_v6 }
 0x14f   :  { %3599 = vmatpush1.msra.mxu1 %v1799_v41  ;;  %3356 = vmatprep.mubr.f32.mxu0 %v2490_v23  ;;  %v1783_v41 = vmul.f32 %v6755_v7, %v6671_v54 }
 0x150   :  { %3600 = vmatprep.subr.mxu1 %v1796_v26  ;;  %3748 = vmatpush1.msra.mxu0 %v1939_v15  ;;  %v9022_v26 = vld [vmem:[#allocation37_spill] sm:$0xff]  ;;  %v1780_v15 = vmul.f32 %v6749_v1, %v6459_v55  ;;  %v1920_v1 = vmul.f32 %v6761_v33, %v6459_v55  ;;  %v9023_v33 = vld [vmem:[#allocation34_spill] sm:$0xff] }
 0x151   :  { %3601 = vmatpush1.msra.mxu1 %v1795_v42  ;;  %3357 = vmatmul.mubr.f32.gmra.mxu0 %v2489_v8  ;;  %v1228_v23 = vrot.slane %v9022_v26, %v6516_v40  ;;  %v2512_v42 = vld [vmem:[#allocation2 + $0x258] sm:$0xff]  ;;  %v1779_v8 = vmul.f32 %v6755_v7, %v6591_v13  ;;  %v1919_v7 = vmul.f32 %v6771_v25, %v6591_v13 }
 0x152   :  { %3749 = vmatprep.subr.mxu0 %v1936_v3  ;;  %3517 = vmatprep.mubr.f32.mxu1 %v8909_v57  ;;  %v1923_v3 = vmul.f32 %v6771_v25, %v6671_v54  ;;  %v6839_v25 = vrot.slane %v9023_v33, %v6533_v46 }
 0x153   :  { %3602 = vmatprep.subr.mxu1 %v1792_v38  ;;  %3750 = vmatpush1.msra.mxu0 %v1935_v61  ;;  %v2869_v4 = vpop.f32.mrf.mxu1  ;;  %v1224_v38 = vrot.slane %v9022_v26, %v6533_v46 }
 0x154   :  { %4747 = vmatmul.mubr.msk.f32.gmra.mxu1 %vm2602_vm0, %v2502_v45  ;;  %3751 = vmatprep.subr.mxu0 %v1932_v2  ;;  %v2714_v49 = vpop.f32.mrf.mxu0  ;;  %v2511_v45 = vld [vmem:[#allocation2 + $0x250] sm:$0xff] }
 0x155   :  { %3603 = vmatpush1.msra.mxu1 %v1791_v51  ;;  %3362 = vmatprep.mubr.f32.mxu0 %v2501_v9  ;;  %v6803_v16 = vadd.f32 %v2869_v4, %v2714_v49  ;;  %v1904_v51 = vmul.f32 %v1228_v23, %v6656_v6  ;;  %v6828_v2 = vpop.f32.mrf.mxu1  ;;  %v1903_v9 = vmul.f32 %v1224_v38, %v6671_v54  ;;  %v2523_v4 = vld [vmem:[#allocation2 + $0x2b0] sm:$0xff] }
 0x156   :  { %3604 = vmatprep.subr.mxu1 %v1788_v44  ;;  %3752 = vmatpush1.msra.mxu0 %v1931_v28  ;;  %v6820_v61 = vpop.f32.mrf.mxu0  ;;  %v2524_v44 = vld [vmem:[#allocation2 + $0x2b8] sm:$0xff]  ;;  %v1916_v28 = vmul.f32 %v1228_v23, %v6477_v47  ;;  %v1915_v49 = vmul.f32 %v1224_v38, %v6597_v19 }
 0x157   :  { %3605 = vmatpush1.msra.mxu1 %v1787_v31  ;;  %3363 = vmatmul.mubr.f32.gmra.mxu0 %v2500_v34  ;;  %v6834_v31 = vrot.slane %v9023_v33, %v6516_v40  ;;  %v1900_v34 = vmul.f32 %v1228_v23, %v6459_v55 }
 0x158   :  { %3753 = vmatprep.subr.mxu0 %v1928_v62  ;;  %3523 = vmatprep.mubr.f32.mxu1 %v8909_v57 }
 0x159   :  { %3606 = vmatprep.subr.mxu1 %v1784_v56  ;;  %3754 = vmatpush1.msra.mxu0 %v1927_v24  ;;  %v1899_v24 = vmul.f32 %v1224_v38, %v6591_v13 }
 0x15a   :  { %4748 = vmatmul.mubr.msk.f32.gmra.mxu1 %vm2602_vm0, %v2513_v5  ;;  %3755 = vmatprep.subr.mxu0 %v1924_v17  ;;  %v1912_v17 = vmul.f32 %v1228_v23, %v6471_v30 }
 0x15b   :  { %3607 = vmatpush1.msra.mxu1 %v1783_v41  ;;  %3368 = vmatprep.mubr.f32.mxu0 %v2512_v42  ;;  %v1896_v42 = vmul.f32 %v6834_v31, %v6477_v47 }
 0x15c   :  { %3608 = vmatprep.subr.mxu1 %v1780_v15  ;;  %3756 = vmatpush1.msra.mxu0 %v1923_v3  ;;  %v2720_v62 = vpop.f32.mrf.mxu0  ;;  %v2522_v15 = vld [vmem:[#allocation2 + $0x2a8] sm:$0xff]  ;;  %v1911_v3 = vmul.f32 %v1224_v38, %v6633_v59 }
 0x15d   :  { %3609 = vmatpush1.msra.mxu1 %v1779_v8  ;;  %3369 = vmatmul.mubr.f32.gmra.mxu0 %v2511_v45  ;;  %v9024_v8 = vld [vmem:[#allocation38_spill] sm:$0xff]  ;;  %v2535_v45 = vld [vmem:[#allocation2 + $0x310] sm:$0xff] }
 0x15e   :  { %3757 = vmatprep.subr.mxu0 %v1920_v1  ;;  %v2875_v56 = vpop.f32.mrf.mxu1  ;;  %3529 = vmatprep.mubr.f32.mxu1 %v8909_v57  ;;  %v6846_v41 = vpop.f32.mrf.mxu0  ;;  %v6857_v1 = vrot.slane %v9024_v8, %v6516_v40 }
 0x15f   :  { %3610 = vmatprep.subr.mxu1 %v1904_v51  ;;  %v6844_v5 = vadd.f32 %v2875_v56, %v2720_v62  ;;  %3758 = vmatpush1.msra.mxu0 %v1919_v7  ;;  %v1895_v51 = vmul.f32 %v6839_v25, %v6597_v19  ;;  %v1908_v7 = vmul.f32 %v1228_v23, %v6469_v36  ;;  %v2534_v62 = vld [vmem:[#allocation2 + $0x308] sm:$0xff] }
 0x160   :  { %4749 = vmatmul.mubr.msk.f32.gmra.mxu1 %vm2602_vm0, %v2524_v44  ;;  %v6850_v26 = vpop.f32.mrf.mxu1  ;;  %3759 = vmatprep.subr.mxu0 %v1916_v28  ;;  %v6866_v28 = vrot.slane %v9024_v8, %v6533_v46  ;;  %v1891_v23 = vmul.f32 %v6839_v25, %v6633_v59  ;;  %v2028_v8 = vmul.f32 %v6857_v1, %v6469_v36 }
 0x161   :  { %3611 = vmatpush2.msra.mxu1 %v1903_v9  ;;  %3374 = vmatprep.mubr.f32.mxu0 %v2523_v4  ;;  %v1892_v9 = vmul.f32 %v6834_v31, %v6471_v30 }
 0x162   :  { %3612 = vmatprep.subr.mxu1 %v1900_v34  ;;  %3760 = vmatpush1.msra.mxu0 %v1915_v49  ;;  %v1907_v34 = vmul.f32 %v1224_v38, %v6642_v20  ;;  %v2032_v49 = vmul.f32 %v6857_v1, %v6471_v30  ;;  %v1888_v38 = vmul.f32 %v6834_v31, %v6469_v36 }
 0x163   :  { %3613 = vmatpush2.msra.mxu1 %v1899_v24  ;;  %v2726_v44 = vpop.f32.mrf.mxu0  ;;  %3375 = vmatmul.mubr.f32.gmra.mxu0 %v2522_v15  ;;  %v2881_v33 = vpop.f32.mrf.mxu1  ;;  %v2031_v15 = vmul.f32 %v6866_v28, %v6633_v59 }
 0x164   :  { %3761 = vmatprep.subr.mxu0 %v1912_v17  ;;  %3535 = vmatprep.mubr.f32.mxu1 %v8909_v57  ;;  %v6872_v56 = vadd.f32 %v2881_v33, %v2726_v44  ;;  %v2533_v17 = vld [vmem:[#allocation2 + $0x300] sm:$0xff]  ;;  %v1883_v33 = vmul.f32 %v6839_v25, %v6671_v54 }
 0x165   :  { %3614 = vmatprep.subr.mxu1 %v1896_v42  ;;  %v6874_v4 = vpop.f32.mrf.mxu0  ;;  %3762 = vmatpush1.msra.mxu0 %v1911_v3  ;;  %v6879_v24 = vpop.f32.mrf.mxu1  ;;  %v2546_v42 = vld [vmem:[#allocation2 + $0x368] sm:$0xff]  ;;  %v1887_v3 = vmul.f32 %v6839_v25, %v6642_v20  ;;  %v2545_v44 = vld [vmem:[#allocation2 + $0x360] sm:$0xff] }
 0x166   :  { %4750 = vmatmul.mubr.msk.f32.gmra.mxu1 %vm2602_vm0, %v2535_v45  ;;  %3763 = vmatprep.subr.mxu0 %v1908_v7 }
 0x167   :  { %3615 = vmatpush2.msra.mxu1 %v1895_v51  ;;  %3380 = vmatprep.mubr.f32.mxu0 %v2534_v62  ;;  %v1884_v51 = vmul.f32 %v6834_v31, %v6656_v6 }
 0x168   :  { %3616 = vmatprep.subr.mxu1 %v1892_v9  ;;  %3764 = vmatpush1.msra.mxu0 %v1907_v34  ;;  %v2027_v9 = vmul.f32 %v6866_v28, %v6642_v20 }
 0x169   :  { %3617 = vmatpush2.msra.mxu1 %v1891_v23  ;;  %v2732_v45 = vpop.f32.mrf.mxu0  ;;  %3381 = vmatmul.mubr.f32.gmra.mxu0 %v2533_v17  ;;  %v2887_v7 = vpop.f32.mrf.mxu1  ;;  %v2024_v23 = vmul.f32 %v6857_v1, %v6656_v6 }
 0x16a   :  { %3765 = vmatprep.subr.mxu0 %v2032_v49  ;;  %3541 = vmatprep.mubr.f32.mxu1 %v8909_v57  ;;  %v6896_v62 = vadd.f32 %v2887_v7, %v2732_v45  ;;  %v9025_v49 = vld [vmem:[#allocation36_spill] sm:$0xff]  ;;  %v2544_v57 = vld [vmem:[#allocation2 + $0x358] sm:$0xff]  ;;  %v1880_v45 = vmul.f32 %v6834_v31, %v6459_v55  ;;  %v2020_v31 = vmul.f32 %v6857_v1, %v6459_v55 }
 0x16b   :  { %3618 = vmatprep.subr.mxu1 %v1888_v38  ;;  %v6898_v34 = vpop.f32.mrf.mxu0  ;;  %3766 = vmatpush2.msra.mxu0 %v2031_v15  ;;  %v6905_v17 = vrot.slane %v9025_v49, %v6516_v40  ;;  %v6907_v38 = vpop.f32.mrf.mxu1  ;;  %v6913_v15 = vrot.slane %v9025_v49, %v6533_v46  ;;  %v9026_v7 = vld [vmem:[#allocation41_spill] sm:$0xff] }
 0x16c   :  { %4751 = vmatmul.mubr.msk.f32.gmra.mxu1 %vm2602_vm0, %v2546_v42  ;;  %3767 = vmatprep.subr.mxu0 %v2028_v8  ;;  %v2023_v42 = vmul.f32 %v6866_v28, %v6671_v54  ;;  %v6919_v60 = vrot.slane %v9026_v7, %v6516_v40  ;;  %v1879_v8 = vmul.f32 %v6839_v25, %v6591_v13 }
 0x16d   :  { %3619 = vmatpush2.msra.mxu1 %v1887_v3  ;;  %3386 = vmatprep.mubr.f32.mxu0 %v2545_v44  ;;  %v2557_v3 = vld [vmem:[#allocation2 + $0x3c0] sm:$0xff]  ;;  %v6929_v44 = vrot.slane %v9026_v7, %v6533_v46  ;;  %v2019_v25 = vmul.f32 %v6866_v28, %v6591_v13  ;;  %v1875_v63 = vmul.f32 %v6913_v15, %v6597_v19 }
 0x16e   :  { %3620 = vmatprep.subr.mxu1 %v1884_v51  ;;  %3768 = vmatpush2.msra.mxu0 %v2027_v9  ;;  %v1876_v51 = vmul.f32 %v6905_v17, %v6477_v47  ;;  %v9027_v9 = vmov 0.0   ;;  %v2016_v7 = vmul.f32 %v6919_v60, %v6477_v47  ;;  %v1872_v32 = vmul.f32 %v6905_v17, %v6471_v30 }
 0x16f   :  { %3621 = vmatpush2.msra.mxu1 %v1883_v33  ;;  %v2738_v49 = vpop.f32.mrf.mxu0  ;;  %3387 = vmatmul.mubr.f32.gmra.mxu0 %v2544_v57  ;;  %v2893_v43 = vpop.f32.mrf.mxu1  ;;  %v2556_v33 = vld [vmem:[#allocation2 + $0x3b8] sm:$0xff]  ;;  %v1864_v10 = vmul.f32 %v6905_v17, %v6656_v6 }
 0x170   :  { %3769 = vmatprep.subr.mxu0 %v2024_v23  ;;  %3547 = vmatprep.mubr.f32.mxu1 %v9027_v9  ;;  %v6936_v57 = vadd.f32 %v2893_v43, %v2738_v49  ;;  %v2015_v43 = vmul.f32 %v6929_v44, %v6597_v19  ;;  %v2012_v49 = vmul.f32 %v6919_v60, %v6471_v30 }
 0x171   :  { %3622 = vmatprep.subr.mxu1 %v1880_v45  ;;  %v6938_v23 = vpop.f32.mrf.mxu0  ;;  %3770 = vmatpush2.msra.mxu0 %v2023_v42  ;;  %v6943_v48 = vpop.f32.mrf.mxu1  ;;  %v2555_v45 = vld [vmem:[#allocation2 + $0x3b0] sm:$0xff]  ;;  %v2568_v42 = vld [vmem:[#allocation2 + $0x418] sm:$0xff] }
 0x172   :  { %4752 = vmatmul.mubr.msk.f32.gmra.mxu1 %vm2602_vm0, %v2557_v3  ;;  %9028 = vst [vmem:[#allocation27_spill] sm:$0xff] %v6943_v48  ;;  %3771 = vmatprep.subr.mxu0 %v2020_v31  ;;  %v1871_v3 = vmul.f32 %v6913_v15, %v6633_v59  ;;  %v1868_v31 = vmul.f32 %v6905_v17, %v6469_v36  ;;  %v4793_v48 = vld [vmem:[#allocation2 + $0x120] sm:$0xff] }
 0x173   :  { %3623 = vmatpush2.msra.mxu1 %v1879_v8  ;;  %3392 = vmatprep.mubr.f32.mxu0 %v2556_v33 }
 0x174   :  { %3624 = vmatprep.subr.mxu1 %v1876_v51  ;;  %3772 = vmatpush2.msra.mxu0 %v2019_v25  ;;  %v2567_v51 = vld [vmem:[#allocation2 + $0x410] sm:$0xff]  ;;  %v1867_v25 = vmul.f32 %v6913_v15, %v6642_v20 }
 0x175   :  { %3625 = vmatpush2.msra.mxu1 %v1875_v63  ;;  %v2744_v8 = vpop.f32.mrf.mxu0  ;;  %3393 = vmatmul.mubr.f32.gmra.mxu0 %v2555_v45  ;;  %v2899_v33 = vpop.f32.mrf.mxu1  ;;  %v2011_v63 = vmul.f32 %v6929_v44, %v6633_v59 }
 0x176   :  { %3773 = vmatprep.subr.mxu0 %v2016_v7  ;;  %3553 = vmatprep.mubr.f32.mxu1 %v9027_v9  ;;  %v6960_v58 = vadd.f32 %v2899_v33, %v2744_v8  ;;  %v2008_v7 = vmul.f32 %v6919_v60, %v6469_v36  ;;  %v2007_v8 = vmul.f32 %v6929_v44, %v6642_v20 }
 0x177   :  { %3626 = vmatprep.subr.mxu1 %v1872_v32  ;;  %v6962_v39 = vpop.f32.mrf.mxu0  ;;  %3774 = vmatpush2.msra.mxu0 %v2015_v43  ;;  %v6967_v45 = vpop.f32.mrf.mxu1  ;;  %v2566_v32 = vld [vmem:[#allocation2 + $0x408] sm:$0xff]  ;;  %v2579_v43 = vld [vmem:[#allocation2 + $0x470] sm:$0xff]  ;;  %v2004_v33 = vmul.f32 %v6919_v60, %v6656_v6 }
 0x178   :  { %9029 = vst [vmem:[#allocation29_spill] sm:$0xff] %v6962_v39  ;;  %4753 = vmatmul.mubr.msk.f32.gmra.mxu1 %vm2602_vm0, %v2568_v42  ;;  %9030 = vst [vmem:[#allocation31_spill] sm:$0xff] %v6967_v45  ;;  %3775 = vmatprep.subr.mxu0 %v2012_v49  ;;  %v1863_v42 = vmul.f32 %v6913_v15, %v6671_v54  ;;  %v1860_v49 = vmul.f32 %v6905_v17, %v6459_v55 }
 0x179   :  { %3627 = vmatpush2.msra.mxu1 %v1871_v3  ;;  %3398 = vmatprep.mubr.f32.mxu0 %v2567_v51  ;;  %v2000_v17 = vmul.f32 %v6919_v60, %v6459_v55  ;;  %v2590_v60 = vld [vmem:[#allocation2 + $0x4c8] sm:$0xff] }
 0x17a   :  { %3628 = vmatprep.subr.mxu1 %v1868_v31  ;;  %3776 = vmatpush2.msra.mxu0 %v2011_v63  ;;  %v2003_v31 = vmul.f32 %v6929_v44, %v6671_v54  ;;  %v2578_v63 = vld [vmem:[#allocation2 + $0x468] sm:$0xff] }
 0x17b   :  { %3629 = vmatpush2.msra.mxu1 %v1867_v25  ;;  %v2750_v3 = vpop.f32.mrf.mxu0  ;;  %3399 = vmatmul.mubr.f32.gmra.mxu0 %v2566_v32  ;;  %v2905_v51 = vpop.f32.mrf.mxu1  ;;  %v1859_v25 = vmul.f32 %v6913_v15, %v6591_v13  ;;  %v1856_v15 = vmul.f32 %v6551_v53, %v6477_v47 }
 0x17c   :  { %3777 = vmatprep.subr.mxu0 %v2008_v7  ;;  %3559 = vmatprep.mubr.f32.mxu1 %v9027_v9  ;;  %v6988_v32 = vadd.f32 %v2905_v51, %v2750_v3  ;;  %v7001_v3 = vrot.slane %v9031_v29, %v6533_v46  ;;  %v1852_v29 = vmul.f32 %v6551_v53, %v6471_v30 }
 0x17d   :  { %3630 = vmatprep.subr.mxu1 %v1864_v10  ;;  %v6990_v7 = vpop.f32.mrf.mxu0  ;;  %3778 = vmatpush2.msra.mxu0 %v2007_v8  ;;  %v6995_v18 = vpop.f32.mrf.mxu1  ;;  %v2577_v10 = vld [vmem:[#allocation2 + $0x460] sm:$0xff]  ;;  %v1999_v8 = vmul.f32 %v6929_v44, %v6591_v13 }
 0x17e   :  { %9032 = vst [vmem:[#allocation30_spill] sm:$0xff] %v6990_v7  ;;  %4754 = vmatmul.mubr.msk.f32.gmra.mxu1 %vm2602_vm0, %v2579_v43  ;;  %9033 = vst [vmem:[#allocation35_spill] sm:$0xff] %v6995_v18  ;;  %3779 = vmatprep.subr.mxu0 %v2004_v33  ;;  %v1855_v43 = vmul.f32 %v6581_v50, %v6597_v19  ;;  %v2589_v44 = vld [vmem:[#allocation2 + $0x4c0] sm:$0xff]  ;;  %v1848_v18 = vmul.f32 %v6551_v53, %v6469_v36 }
 0x17f   :  { %3631 = vmatpush2.msra.mxu1 %v1863_v42  ;;  %3404 = vmatprep.mubr.f32.mxu0 %v2578_v63  ;;  %v1996_v42 = vmul.f32 %v6986_v27, %v6477_v47  ;;  %v1984_v7 = vmul.f32 %v6986_v27, %v6656_v6 }
 0x180   :  { %3632 = vmatprep.subr.mxu1 %v1860_v49  ;;  %3780 = vmatpush2.msra.mxu0 %v2003_v31  ;;  %v1995_v49 = vmul.f32 %v7001_v3, %v6597_v19  ;;  %v1851_v31 = vmul.f32 %v6581_v50, %v6633_v59 }
 0x181   :  { %3633 = vmatpush2.msra.mxu1 %v1859_v25  ;;  %v2756_v33 = vpop.f32.mrf.mxu0  ;;  %3405 = vmatmul.mubr.f32.gmra.mxu0 %v2577_v10  ;;  %v2911_v51 = vpop.f32.mrf.mxu1 }
 0x182   :  { %3781 = vmatprep.subr.mxu0 %v2000_v17  ;;  %3565 = vmatprep.mubr.f32.mxu1 %v9027_v9  ;;  %v7016_v63 = vadd.f32 %v2911_v51, %v2756_v33  ;;  %v1992_v17 = vmul.f32 %v6986_v27, %v6471_v30  ;;  %v1991_v33 = vmul.f32 %v7001_v3, %v6633_v59 }
 0x183   :  { %3634 = vmatprep.subr.mxu1 %v1856_v15  ;;  %v7018_v25 = vpop.f32.mrf.mxu0  ;;  %3782 = vmatpush2.msra.mxu0 %v1999_v8  ;;  %v7023_v10 = vpop.f32.mrf.mxu1  ;;  %v2588_v15 = vld [vmem:[#allocation2 + $0x4b8] sm:$0xff]  ;;  %v2601_v8 = vld [vmem:[#allocation2 + $0x520] sm:$0xff]  ;;  %v1988_v51 = vmul.f32 %v6986_v27, %v6469_v36 }
 0x184   :  { %9034 = vst [vmem:[#allocation37_spill] sm:$0xff] %v7018_v25  ;;  %4755 = vmatmul.mubr.msk.f32.gmra.mxu1 %vm2602_vm0, %v2590_v60  ;;  %9035 = vst [vmem:[#allocation34_spill] sm:$0xff] %v7023_v10  ;;  %3783 = vmatprep.subr.mxu0 %v1996_v42  ;;  %v1847_v60 = vmul.f32 %v6581_v50, %v6642_v20  ;;  %v1844_v42 = vmul.f32 %v6551_v53, %v6656_v6  ;;  %v2600_v10 = vld [vmem:[#allocation2 + $0x518] sm:$0xff] }
 0x185   :  { %3635 = vmatpush2.msra.mxu1 %v1855_v43  ;;  %3410 = vmatprep.mubr.f32.mxu0 %v2589_v44  ;;  %v9036_v44 = vld [vmem:[#allocation44_spill] sm:$0xff]  ;;  %v1843_v25 = vmul.f32 %v6581_v50, %v6671_v54  ;;  %v1983_v50 = vmul.f32 %v7001_v3, %v6671_v54 }
 0x186   :  { %3636 = vmatprep.subr.mxu1 %v1852_v29  ;;  %3784 = vmatpush2.msra.mxu0 %v1995_v49  ;;  %v1987_v29 = vmul.f32 %v7001_v3, %v6642_v20  ;;  %v7039_v49 = vrot.slane %v9036_v44, %v6516_v40 }
 0x187   :  { %3637 = vmatpush2.msra.mxu1 %v1851_v31  ;;  %v2762_v43 = vpop.f32.mrf.mxu0  ;;  %3411 = vmatmul.mubr.f32.gmra.mxu0 %v2588_v15  ;;  %v2917_v31 = vpop.f32.mrf.mxu1 }
 0x188   :  { %3785 = vmatprep.subr.mxu0 %v1992_v17  ;;  %3571 = vmatprep.mubr.f32.mxu1 %v9027_v9  ;;  %v7046_v17 = vrot.slane %v9036_v44, %v6533_v46  ;;  %v7048_v53 = vadd.f32 %v2917_v31, %v2762_v43  ;;  %v2096_v43 = vmul.f32 %v7039_v49, %v6477_v47 }
 0x189   :  { %3638 = vmatprep.subr.mxu1 %v1848_v18  ;;  %v7050_v15 = vpop.f32.mrf.mxu0  ;;  %3786 = vmatpush2.msra.mxu0 %v1991_v33  ;;  %v7055_v9 = vpop.f32.mrf.mxu1  ;;  %v2599_v18 = vld [vmem:[#allocation2 + $0x510] sm:$0xff]  ;;  %v1980_v33 = vmul.f32 %v6986_v27, %v6459_v55 }
 0x18a   :  { %9037 = vst [vmem:[#allocation38_spill] sm:$0xff] %v7050_v15  ;;  %4756 = vmatmul.mubr.msk.f32.gmra.mxu1 %vm2602_vm0, %v2601_v8  ;;  %9038 = vst [vmem:[#allocation36_spill] sm:$0xff] %v7055_v9  ;;  %3787 = vmatprep.subr.mxu0 %v1988_v51  ;;  %v2095_v8 = vmul.f32 %v7046_v17, %v6597_v19  ;;  %v2091_v27 = vmul.f32 %v7046_v17, %v6633_v59 }
 0x18b   :  { %3639 = vmatpush2.msra.mxu1 %v1847_v60  ;;  %3416 = vmatprep.mubr.f32.mxu0 %v2600_v10  ;;  %v1979_v60 = vmul.f32 %v7001_v3, %v6591_v13  ;;  %v2092_v10 = vmul.f32 %v7039_v49, %v6471_v30  ;;  %v1975_v3 = vmul.f32 %v6667_v14, %v6597_v19 }
 0x18c   :  { %3640 = vmatprep.subr.mxu1 %v1844_v42  ;;  %3788 = vmatpush2.msra.mxu0 %v1987_v29  ;;  %v4779_v42 = vld [vmem:[#allocation2 + $0x8] sm:$0xff] }
 0x18d   :  { %3641 = vmatpush2.msra.mxu1 %v1843_v25  ;;  %v2768_v44 = vpop.f32.mrf.mxu0  ;;  %3417 = vmatmul.mubr.f32.gmra.mxu0 %v2599_v18  ;;  %v2923_v51 = vpop.f32.mrf.mxu1  ;;  %v1976_v25 = vmul.f32 %v6646_v37, %v6477_v47  ;;  %v2088_v18 = vmul.f32 %v7039_v49, %v6469_v36 }
 0x18e   :  { %3789 = vmatprep.subr.mxu0 %v1984_v7  ;;  %3642 = vmatprep.mubr.f32.mxu1 %v4779_v42  ;;  %v7073_v29 = vadd.f32 %v2923_v51, %v2768_v44  ;;  %v4780_v7 = vld [vmem:[#allocation2] sm:$0xff]  ;;  %v1972_v42 = vmul.f32 %v6646_v37, %v6471_v30  ;;  %v2087_v44 = vmul.f32 %v7046_v17, %v6642_v20 }
 0x18f   :  { %3790 = vmatpush2.msra.mxu0 %v1983_v50  ;;  %v7075_v31 = vpop.f32.mrf.mxu0  ;;  %3888 = vmatprep.subr.mxu1 %v2096_v43  ;;  %v7081_v50 = vpop.f32.mrf.mxu1  ;;  %v9041_v43 = vld [vmem:[#allocation45_spill] sm:$0xff]  ;;  %v2084_v37 = vmul.f32 %v7039_v49, %v6656_v6 }
 0x190   :  { %9039 = vst [vmem:[#allocation41_spill] sm:$0xff] %v7075_v31  ;;  %3643 = vmatmul.mubr.f32.vlgmr.msra.gmra.mxu1 %v4780_v7  ;;  %9040 = vst [vmem:[#allocation42_spill] sm:$0xff] %v7081_v50  ;;  %3791 = vmatprep.subr.mxu0 %v1980_v33  ;;  %v7089_v51 = vrot.slane %v9041_v43, %v6516_v40  ;;  %v1971_v7 = vmul.f32 %v6667_v14, %v6633_v59 }
 0x191   :  { %3889 = vmatpush1.msra.mxu1 %v2095_v8  ;;  %3792 = vmatpush2.msra.mxu0 %v1979_v60  ;;  %v7095_v50 = vrot.slane %v9041_v43, %v6533_v46  ;;  %v2083_v8 = vmul.f32 %v7046_v17, %v6671_v54  ;;  %v9042_v60 = vld [vmem:[#allocation46_spill] sm:$0xff] }
 0x192   :  { %3890 = vmatprep.subr.mxu1 %v2092_v10  ;;  %3793 = vmatprep.subr.mxu0 %v1976_v25  ;;  %v7103_v10 = vrot.slane %v9042_v60, %v6516_v40  ;;  %v2224_v25 = vmul.f32 %v7089_v51, %v6656_v6 }
 0x193   :  { %3891 = vmatpush1.msra.mxu1 %v2091_v27  ;;  %v2774_v33 = vpop.f32.mrf.mxu0  ;;  %3794 = vmatpush2.msra.mxu0 %v1975_v3  ;;  %v2929_v14 = vpop.f32.mrf.mxu1  ;;  %v4781_v3 = vld [vmem:[#allocation2 + $0x18] sm:$0xff]  ;;  %v2223_v31 = vmul.f32 %v7095_v50, %v6671_v54 }
 0x194   :  { %3892 = vmatprep.subr.mxu1 %v2088_v18  ;;  %3795 = vmatprep.subr.mxu0 %v1972_v42  ;;  %v7107_v27 = vadd.f32 %v2929_v14, %v2774_v33  ;;  %v2080_v18 = vmul.f32 %v7039_v49, %v6459_v55  ;;  %v7117_v42 = vrot.slane %v9042_v60, %v6533_v46  ;;  %v4782_v33 = vld [vmem:[#allocation2 + $0x60] sm:$0xff] }
 0x195   :  { %3893 = vmatpush1.msra.mxu1 %v2087_v44  ;;  %v7109_v43 = vpop.f32.mrf.mxu0  ;;  %3796 = vmatpush2.msra.mxu0 %v1971_v7  ;;  %v7119_v44 = vpop.f32.mrf.mxu1  ;;  %v2079_v7 = vmul.f32 %v7046_v17, %v6591_v13  ;;  %v2220_v14 = vmul.f32 %v7089_v51, %v6459_v55  ;;  %v9045_v49 = vld [vmem:[#allocation22_spill] sm:$0xff]  ;;  %v2076_v60 = vmul.f32 %v7103_v10, %v6477_v47 }
 0x196   :  { %9043 = vst [vmem:[#allocation44_spill] sm:$0xff] %v7109_v43  ;;  %3797 = vmatprep.mubr.f32.mxu0 %v4781_v3  ;;  %9044 = vst [vmem:[#allocation45_spill] sm:$0xff] %v7119_v44  ;;  %3894 = vmatprep.subr.mxu1 %v2084_v37  ;;  %v7127_v3 = vrot.slane %v9045_v49, %v6516_v40  ;;  %v4783_v43 = vld [vmem:[#allocation2 + $0x10] sm:$0xff]  ;;  %v7133_v37 = vrot.slane %v9045_v49, %v6533_v46 }
 0x197   :  { %3648 = vmatprep.mubr.f32.mxu1 %v4782_v33  ;;  %3798 = vmatmul.mubr.f32.vlgmr.msra.gmra.mxu0 %v4783_v43  ;;  %v4784_v33 = vld [vmem:[#allocation2 + $0x58] sm:$0xff]  ;;  %v2219_v17 = vmul.f32 %v7095_v50, %v6591_v13  ;;  %v2075_v43 = vmul.f32 %v7117_v42, %v6597_v19 }
 0x198   :  { %3895 = vmatpush1.msra.mxu1 %v2083_v8  ;;  %4043 = vmatprep.subr.mxu0 %v2224_v25  ;;  %v2216_v9 = vmul.f32 %v7127_v3, %v6477_v47 }
 0x199   :  { %3649 = vmatmul.mubr.f32.gmra.mxu1 %v4784_v33  ;;  %v2780_v44 = vpop.f32.mrf.mxu0  ;;  %3896 = vmatprep.subr.mxu1 %v2080_v18  ;;  %v2935_v8 = vpop.f32.mrf.mxu1  ;;  %v4785_v33 = vld [vmem:[#allocation2 + $0x70] sm:$0xff]  ;;  %v2072_v18 = vmul.f32 %v7103_v10, %v6471_v30 }
 0x19a   :  { %4044 = vmatpush1.msra.mxu0 %v2223_v31  ;;  %3897 = vmatpush1.msra.mxu1 %v2079_v7  ;;  %v7141_v49 = vadd.f32 %v2935_v8, %v2780_v44  ;;  %v2215_v31 = vmul.f32 %v7133_v37, %v6597_v19  ;;  %v4786_v7 = vld [vmem:[#allocation2 + $0xb8] sm:$0xff]  ;;  %v2071_v44 = vmul.f32 %v7117_v42, %v6633_v59  ;;  %v4787_v8 = vld [vmem:[#allocation2 + $0x68] sm:$0xff] }
 0x19b   :  { %4045 = vmatprep.subr.mxu0 %v2220_v14  ;;  %v7143_v25 = vpop.f32.mrf.mxu0  ;;  %3803 = vmatprep.mubr.f32.mxu0 %v4785_v33  ;;  %v7149_v15 = vpop.f32.mrf.mxu1  ;;  %v2212_v14 = vmul.f32 %v7127_v3, %v6471_v30  ;;  %v4788_v33 = vld [vmem:[#allocation2 + $0xb0] sm:$0xff] }
 0x19c   :  { %9046 = vst [vmem:[#allocation46_spill] sm:$0xff] %v7143_v25  ;;  %3898 = vmatprep.subr.mxu1 %v2076_v60  ;;  %9047 = vst [vmem:[#allocation22_spill] sm:$0xff] %v7149_v15  ;;  %4046 = vmatpush1.msra.mxu0 %v2219_v17  ;;  %v2068_v60 = vmul.f32 %v7103_v10, %v6469_v36  ;;  %v2211_v17 = vmul.f32 %v7133_v37, %v6633_v59 }
 0x19d   :  { %3654 = vmatprep.mubr.f32.mxu1 %v4786_v7  ;;  %3804 = vmatmul.mubr.f32.gmra.mxu0 %v4787_v8  ;;  %v2067_v7 = vmul.f32 %v7117_v42, %v6642_v20 }
 0x19e   :  { %3899 = vmatpush1.msra.mxu1 %v2075_v43  ;;  %4047 = vmatprep.subr.mxu0 %v2216_v9  ;;  %v2208_v43 = vmul.f32 %v7127_v3, %v6469_v36 }
 0x19f   :  { %3655 = vmatmul.mubr.f32.gmra.mxu1 %v4788_v33  ;;  %v2786_v15 = vpop.f32.mrf.mxu0  ;;  %3900 = vmatprep.subr.mxu1 %v2072_v18  ;;  %v2941_v25 = vpop.f32.mrf.mxu1  ;;  %v4789_v33 = vld [vmem:[#allocation2 + $0xc8] sm:$0xff]  ;;  %v2064_v18 = vmul.f32 %v7103_v10, %v6656_v6 }
 0x1a0   :  { %4048 = vmatpush1.msra.mxu0 %v2215_v31  ;;  %3901 = vmatpush1.msra.mxu1 %v2071_v44  ;;  %v7163_v8 = vadd.f32 %v2941_v25, %v2786_v15  ;;  %v2207_v31 = vmul.f32 %v7133_v37, %v6642_v20  ;;  %v4790_v44 = vld [vmem:[#allocation2 + $0x110] sm:$0xff]  ;;  %v2063_v15 = vmul.f32 %v7117_v42, %v6671_v54 }
 0x1a1   :  { %4049 = vmatprep.subr.mxu0 %v2212_v14  ;;  %v7165_v9 = vpop.f32.mrf.mxu0  ;;  %3809 = vmatprep.mubr.f32.mxu0 %v4789_v33  ;;  %v7171_v45 = vpop.f32.mrf.mxu1  ;;  %v2204_v25 = vmul.f32 %v7127_v3, %v6656_v6  ;;  %v4791_v14 = vld [vmem:[#allocation2 + $0xc0] sm:$0xff]  ;;  %v9051_v33 = vld [vmem:[#allocation43_spill] sm:$0xff] }
 0x1a2   :  { %9048 = vst [vmem:[#allocation53_spill] sm:$0xff] %v7163_v8  ;;  %9049 = vst [vmem:[#allocation54_spill] sm:$0xff] %v7165_v9  ;;  %3902 = vmatprep.subr.mxu1 %v2068_v60  ;;  %4050 = vmatpush1.msra.mxu0 %v2211_v17  ;;  %v2060_v60 = vmul.f32 %v7103_v10, %v6459_v55  ;;  %v7181_v8 = vrot.slane %v9051_v33, %v6516_v40  ;;  %v4792_v17 = vld [vmem:[#allocation2 + $0x108] sm:$0xff] }
 0x1a3   :  { %9050 = vst [vmem:[#allocation55_spill] sm:$0xff] %v7171_v45  ;;  %3660 = vmatprep.mubr.f32.mxu1 %v4790_v44  ;;  %3810 = vmatmul.mubr.f32.gmra.mxu0 %v4791_v14  ;;  %v2203_v44 = vmul.f32 %v7133_v37, %v6671_v54  ;;  %v7187_v45 = vrot.slane %v9051_v33, %v6533_v46  ;;  %v9052_v14 = vld [vmem:[#allocation28_spill] sm:$0xff] }
 0x1a4   :  { %3903 = vmatpush1.msra.mxu1 %v2067_v7  ;;  %4051 = vmatprep.subr.mxu0 %v2208_v43  ;;  %v7191_v7 = vrot.slane %v9052_v14, %v6516_v40  ;;  %v2059_v10 = vmul.f32 %v7117_v42, %v6591_v13  ;;  %v7199_v33 = vrot.slane %v9052_v14, %v6533_v46 }
 0x1a5   :  { %3661 = vmatmul.mubr.f32.gmra.mxu1 %v4792_v17  ;;  %v2792_v9 = vpop.f32.mrf.mxu0  ;;  %3904 = vmatprep.subr.mxu1 %v2064_v18  ;;  %v2947_v43 = vpop.f32.mrf.mxu1  ;;  %v2200_v17 = vmul.f32 %v7127_v3, %v6459_v55  ;;  %v2056_v18 = vmul.f32 %v7181_v8, %v6477_v47  ;;  %v2199_v42 = vmul.f32 %v7133_v37, %v6591_v13  ;;  %v4794_v3 = vld [vmem:[#allocation2 + $0x168] sm:$0xff]  ;;  %v4796_v37 = vld [vmem:[#allocation2 + $0x160] sm:$0xff] }
 0x1a6   :  { %4052 = vmatpush1.msra.mxu0 %v2207_v31  ;;  %3905 = vmatpush1.msra.mxu1 %v2063_v15  ;;  %v7201_v39 = vadd.f32 %v2947_v43, %v2792_v9  ;;  %v2055_v9 = vmul.f32 %v7187_v45, %v6597_v19  ;;  %v2051_v14 = vmul.f32 %v7187_v45, %v6633_v59 }
 0x1a7   :  { %4053 = vmatprep.subr.mxu0 %v2204_v25  ;;  %3815 = vmatprep.mubr.f32.mxu0 %v4793_v48  ;;  %v7207_v31 = vpop.f32.mrf.mxu0  ;;  %v7209_v15 = vpop.f32.mrf.mxu1  ;;  %v2196_v48 = vmul.f32 %v7191_v7, %v6477_v47  ;;  %v4795_v25 = vld [vmem:[#allocation2 + $0x118] sm:$0xff] }
 0x1a8   :  { %9053 = vst [vmem:[#allocation43_spill] sm:$0xff] %v7201_v39  ;;  %3906 = vmatprep.subr.mxu1 %v2060_v60  ;;  %9054 = vst [vmem:[#allocation28_spill] sm:$0xff] %v7207_v31  ;;  %4054 = vmatpush1.msra.mxu0 %v2203_v44  ;;  %v2052_v60 = vmul.f32 %v7181_v8, %v6471_v30  ;;  %v2195_v44 = vmul.f32 %v7199_v33, %v6597_v19  ;;  %v4798_v39 = vld [vmem:[#allocation2 + $0x1c0] sm:$0xff] }
 0x1a9   :  { %9055 = vst [vmem:[#allocation56_spill] sm:$0xff] %v7209_v15  ;;  %3666 = vmatprep.mubr.f32.mxu1 %v4794_v3  ;;  %3816 = vmatmul.mubr.f32.gmra.mxu0 %v4795_v25 }
 0x1aa   :  { %3907 = vmatpush1.msra.mxu1 %v2059_v10  ;;  %4055 = vmatprep.subr.mxu0 %v2200_v17  ;;  %v2192_v10 = vmul.f32 %v7191_v7, %v6471_v30  ;;  %v4797_v17 = vld [vmem:[#allocation2 + $0x178] sm:$0xff] }
 0x1ab   :  { %3667 = vmatmul.mubr.f32.gmra.mxu1 %v4796_v37  ;;  %3908 = vmatprep.subr.mxu1 %v2056_v18  ;;  %v2798_v43 = vpop.f32.mrf.mxu0  ;;  %v2953_v3 = vpop.f32.mrf.mxu1  ;;  %v2048_v37 = vmul.f32 %v7181_v8, %v6469_v36  ;;  %v2191_v18 = vmul.f32 %v7199_v33, %v6633_v59 }
 0x1ac   :  { %4056 = vmatpush1.msra.mxu0 %v2199_v42  ;;  %3909 = vmatpush1.msra.mxu1 %v2055_v9  ;;  %v7223_v25 = vadd.f32 %v2953_v3, %v2798_v43  ;;  %v2047_v9 = vmul.f32 %v7187_v45, %v6642_v20  ;;  %v4799_v43 = vld [vmem:[#allocation2 + $0x170] sm:$0xff]  ;;  %v4800_v3 = vld [vmem:[#allocation2 + $0x1b8] sm:$0xff] }
 0x1ad   :  { %4057 = vmatprep.subr.mxu0 %v2196_v48  ;;  %3821 = vmatprep.mubr.f32.mxu0 %v4797_v17  ;;  %v7229_v42 = vpop.f32.mrf.mxu1  ;;  %v2188_v48 = vmul.f32 %v7191_v7, %v6469_v36  ;;  %v7239_v17 = vpop.f32.mrf.mxu0 }
 0x1ae   :  { %9056 = vst [vmem:[#allocation57_spill] sm:$0xff] %v7223_v25  ;;  %3910 = vmatprep.subr.mxu1 %v2052_v60  ;;  %9057 = vst [vmem:[#allocation58_spill] sm:$0xff] %v7229_v42  ;;  %4058 = vmatpush1.msra.mxu0 %v2195_v44  ;;  %v2044_v60 = vmul.f32 %v7181_v8, %v6656_v6  ;;  %v2187_v44 = vmul.f32 %v7199_v33, %v6642_v20 }
 0x1af   :  { %3672 = vmatprep.mubr.f32.mxu1 %v4798_v39  ;;  %3822 = vmatmul.mubr.f32.gmra.mxu0 %v4799_v43  ;;  %9058 = vst [vmem:[#allocation59_spill] sm:$0xff] %v7239_v17  ;;  %v2043_v25 = vmul.f32 %v7187_v45, %v6671_v54  ;;  %v2040_v42 = vmul.f32 %v7181_v8, %v6459_v55  ;;  %v4803_v8 = vld [vmem:[#allocation2 + $0x1c8] sm:$0xff] }
 0x1b0   :  { %3911 = vmatpush1.msra.mxu1 %v2051_v14  ;;  %4059 = vmatprep.subr.mxu0 %v2192_v10  ;;  %v2184_v14 = vmul.f32 %v7191_v7, %v6656_v6  ;;  %v2180_v17 = vmul.f32 %v7191_v7, %v6459_v55  ;;  %v4804_v7 = vld [vmem:[#allocation2 + $0x210] sm:$0xff] }
 0x1b1   :  { %3673 = vmatmul.mubr.f32.gmra.mxu1 %v4800_v3  ;;  %v3179_v39 = vpop.f32.mrf.mxu1  ;;  %3912 = vmatprep.subr.mxu1 %v2048_v37  ;;  %v4801_v3 = vld [vmem:[#allocation2 + $0x1d0] sm:$0xff]  ;;  %v2183_v37 = vmul.f32 %v7199_v33, %v6671_v54 }
 0x1b2   :  { %4060 = vmatpush1.msra.mxu0 %v2191_v18  ;;  %3913 = vmatpush1.msra.mxu1 %v2047_v9  ;;  %v4802_v9 = vld [vmem:[#allocation2 + $0x218] sm:$0xff] }
 0x1b3   :  { %4061 = vmatprep.subr.mxu0 %v2188_v48  ;;  %v3024_v43 = vpop.f32.mrf.mxu0  ;;  %v7245_v10 = vpop.f32.mrf.mxu1  ;;  %3827 = vmatprep.mubr.f32.mxu0 %v4801_v3  ;;  %v2039_v48 = vmul.f32 %v7187_v45, %v6591_v13  ;;  %v9060_v3 = vld [vmem:[#allocation48_spill] sm:$0xff] }
 0x1b4   :  { %9059 = vst [vmem:[#allocation60_spill] sm:$0xff] %v7245_v10  ;;  %3914 = vmatprep.subr.mxu1 %v2044_v60  ;;  %v3025_v18 = vadd.f32 %v3024_v43, %v6803_v16  ;;  %4062 = vmatpush1.msra.mxu0 %v2187_v44  ;;  %v7258_v60 = vrot.slane %v9060_v3, %v6516_v40 }
 0x1b5   :  { %3678 = vmatprep.mubr.f32.mxu1 %v4802_v9  ;;  %v7260_v15 = vpop.f32.mrf.mxu0  ;;  %3828 = vmatmul.mubr.f32.gmra.mxu0 %v4803_v8  ;;  %v2036_v16 = vmul.f32 %v6857_v1, %v6477_v47  ;;  %v7266_v44 = vrot.slane %v9060_v3, %v6533_v46  ;;  %v7268_v45 = vpop.f32.mrf.mxu1  ;;  %v2179_v9 = vmul.f32 %v7199_v33, %v6591_v13  ;;  %v9062_v1 = vld [vmem:[#allocation50_spill] sm:$0xff]  ;;  %v4805_v33 = vld [vmem:[#allocation2 + $0x228] sm:$0xff] }
 0x1b6   :  { %9061 = vst [vmem:[#allocation48_spill] sm:$0xff] %v7260_v15  ;;  %3915 = vmatpush1.msra.mxu1 %v2043_v25  ;;  %v7270_v43 = vadd.f32 %v3179_v39, %v3025_v18  ;;  %4063 = vmatprep.subr.mxu0 %v2184_v14  ;;  %v2035_v25 = vmul.f32 %v6866_v28, %v6597_v19 }
 0x1b7   :  { %3679 = vmatmul.mubr.f32.gmra.mxu1 %v4804_v7  ;;  %3916 = vmatprep.subr.mxu1 %v2040_v42  ;;  %v7278_v8 = vrot.slane %v9062_v1, %v6516_v40  ;;  %v7280_v31 = vpop.f32.mrf.mxu1  ;;  %v2176_v39 = vmul.f32 %v7258_v60, %v6477_v47  ;;  %v2160_v28 = vmul.f32 %v7258_v60, %v6459_v55  ;;  %v4807_v7 = vld [vmem:[#allocation2 + $0x220] sm:$0xff] }
 0x1b8   :  { %4064 = vmatpush1.msra.mxu0 %v2183_v37  ;;  %v3030_v3 = vpop.f32.mrf.mxu0  ;;  %9063 = vst [vmem:[#allocation50_spill] sm:$0xff] %v7280_v31  ;;  %3917 = vmatpush1.msra.mxu1 %v2039_v48  ;;  %v2175_v42 = vmul.f32 %v7266_v44, %v6597_v19  ;;  %v7291_v37 = vrot.slane %v9062_v1, %v6533_v46  ;;  %v4806_v48 = vld [vmem:[#allocation2 + $0x270] sm:$0xff]  ;;  %v4808_v31 = vld [vmem:[#allocation2 + $0x268] sm:$0xff] }
 0x1b9   :  { %4065 = vmatprep.subr.mxu0 %v2180_v17  ;;  %v3031_v14 = vadd.f32 %v3030_v3, %v6844_v5  ;;  %3833 = vmatprep.mubr.f32.mxu0 %v4805_v33  ;;  %v7295_v17 = vpop.f32.mrf.mxu1  ;;  %v2159_v5 = vmul.f32 %v7266_v44, %v6591_v13  ;;  %v2156_v1 = vmul.f32 %v7278_v8, %v6477_v47 }
 0x1ba   :  { %3918 = vmatprep.subr.mxu1 %v2036_v16  ;;  %v7293_v18 = vpop.f32.mrf.mxu0  ;;  %4066 = vmatpush1.msra.mxu0 %v2179_v9  ;;  %v2172_v16 = vmul.f32 %v7258_v60, %v6471_v30  ;;  %v2171_v9 = vmul.f32 %v7266_v44, %v6633_v59 }
 0x1bb   :  { %9064 = vst [vmem:[#allocation61_spill] sm:$0xff] %v7293_v18  ;;  %3684 = vmatprep.mubr.f32.mxu1 %v4806_v48  ;;  %3834 = vmatmul.mubr.f32.gmra.mxu0 %v4807_v7  ;;  %v7303_v33 = vpop.f32.mrf.mxu1  ;;  %v2155_v7 = vmul.f32 %v7291_v37, %v6597_v19  ;;  %v2148_v18 = vmul.f32 %v7278_v8, %v6469_v36 }
 0x1bc   :  { %3919 = vmatpush1.msra.mxu1 %v2035_v25  ;;  %v3036_v3 = vpop.f32.mrf.mxu0  ;;  %9065 = vst [vmem:[#allocation62_spill] sm:$0xff] %v7303_v33  ;;  %4067 = vmatprep.subr.mxu0 %v2176_v39  ;;  %v2168_v39 = vmul.f32 %v7258_v60, %v6469_v36 }
 0x1bd   :  { %3685 = vmatmul.mubr.f32.gmra.mxu1 %v4808_v31  ;;  %v3037_v48 = vadd.f32 %v3036_v3, %v6872_v56  ;;  %3920 = vmatprep.subr.mxu1 %v2160_v28  ;;  %v7312_v10 = vpop.f32.mrf.mxu1  ;;  %v4809_v31 = vld [vmem:[#allocation2 + $0x280] sm:$0xff]  ;;  %v2152_v56 = vmul.f32 %v7278_v8, %v6471_v30  ;;  %v2167_v28 = vmul.f32 %v7266_v44, %v6642_v20 }
 0x1be   :  { %4068 = vmatpush1.msra.mxu0 %v2175_v42  ;;  %v7310_v25 = vpop.f32.mrf.mxu0  ;;  %3921 = vmatpush2.msra.mxu1 %v2159_v5  ;;  %v2151_v42 = vmul.f32 %v7291_v37, %v6633_v59  ;;  %v4810_v5 = vld [vmem:[#allocation2 + $0x2c8] sm:$0xff] }
 0x1bf   :  { %9066 = vst [vmem:[#allocation63_spill] sm:$0xff] %v7310_v25  ;;  %4069 = vmatprep.subr.mxu0 %v2172_v16  ;;  %3839 = vmatprep.mubr.f32.mxu0 %v4809_v31  ;;  %v7322_v33 = vpop.f32.mrf.mxu1  ;;  %v2164_v16 = vmul.f32 %v7258_v60, %v6656_v6  ;;  %v4811_v25 = vld [vmem:[#allocation2 + $0x278] sm:$0xff]  ;;  %v7340_v60 = vadd.f32 %v7268_v45, %v3031_v14 }
 0x1c0   :  { %3922 = vmatprep.subr.mxu1 %v2156_v1  ;;  %v3042_v3 = vpop.f32.mrf.mxu0  ;;  %9067 = vst [vmem:[#allocation64_spill] sm:$0xff] %v7322_v33  ;;  %4070 = vmatpush1.msra.mxu0 %v2171_v9  ;;  %v7328_v1 = vrot.slane %v5965_v35, %v6516_v40  ;;  %v7335_v9 = vrot.slane %v5965_v35, %v6533_v46  ;;  %v4812_v33 = vld [vmem:[#allocation2 + $0x2c0] sm:$0xff] }
 0x1c1   :  { %3690 = vmatprep.mubr.f32.mxu1 %v4810_v5  ;;  %v3043_v31 = vadd.f32 %v3042_v3, %v6896_v62  ;;  %3840 = vmatmul.mubr.f32.gmra.mxu0 %v4811_v25  ;;  %v2163_v62 = vmul.f32 %v7266_v44, %v6671_v54  ;;  %v2144_v44 = vmul.f32 %v7278_v8, %v6656_v6 }
 0x1c2   :  { %3923 = vmatpush2.msra.mxu1 %v2155_v7  ;;  %v7337_v5 = vpop.f32.mrf.mxu0  ;;  %4071 = vmatprep.subr.mxu0 %v2168_v39  ;;  %v7344_v25 = vpop.f32.mrf.mxu1  ;;  %v2147_v7 = vmul.f32 %v7291_v37, %v6642_v20  ;;  %v2288_v35 = vmul.f32 %v7328_v1, %v6469_v36  ;;  %v4813_v39 = vld [vmem:[#allocation2 + $0x2d8] sm:$0xff]  ;;  %v2284_v3 = vmul.f32 %v7328_v1, %v6656_v6 }
 0x1c3   :  { %9068 = vst [vmem:[#allocation65_spill] sm:$0xff] %v7337_v5  ;;  %3691 = vmatmul.mubr.f32.gmra.mxu1 %v4812_v33  ;;  %3924 = vmatprep.subr.mxu1 %v2152_v56  ;;  %v2287_v33 = vmul.f32 %v7335_v9, %v6642_v20  ;;  %v4816_v5 = vld [vmem:[#allocation2 + $0x318] sm:$0xff] }
 0x1c4   :  { %4072 = vmatpush1.msra.mxu0 %v2167_v28  ;;  %3925 = vmatpush2.msra.mxu1 %v2151_v42  ;;  %v7350_v14 = vpop.f32.mrf.mxu1  ;;  %v4814_v28 = vld [vmem:[#allocation2 + $0x320] sm:$0xff]  ;;  %v2143_v42 = vmul.f32 %v7291_v37, %v6671_v54 }
 0x1c5   :  { %4073 = vmatprep.subr.mxu0 %v2164_v16  ;;  %v3048_v45 = vpop.f32.mrf.mxu0  ;;  %9069 = vst [vmem:[#allocation66_spill] sm:$0xff] %v7350_v14  ;;  %3845 = vmatprep.mubr.f32.mxu0 %v4813_v39  ;;  %v7364_v39 = vadd.f32 %v7295_v17, %v3037_v48  ;;  %v4815_v14 = vld [vmem:[#allocation2 + $0x2d0] sm:$0xff]  ;;  %v7380_v48 = vrot.slane %v6007_v22, %v6516_v40 }
 0x1c6   :  { %3926 = vmatprep.subr.mxu1 %v2148_v18  ;;  %v3049_v56 = vadd.f32 %v3048_v45, %v6936_v57  ;;  %4074 = vmatpush1.msra.mxu0 %v2163_v62  ;;  %v3209_v18 = vpop.f32.mrf.mxu1  ;;  %v2140_v57 = vmul.f32 %v7278_v8, %v6459_v55  ;;  %v2283_v62 = vmul.f32 %v7335_v9, %v6671_v54  ;;  %v9071_v45 = vld [vmem:[#allocation47_spill] sm:$0xff] }
 0x1c7   :  { %3696 = vmatprep.mubr.f32.mxu1 %v4814_v28  ;;  %v7361_v16 = vpop.f32.mrf.mxu0  ;;  %3846 = vmatmul.mubr.f32.gmra.mxu0 %v4815_v14  ;;  %v7372_v28 = vrot.slane %v9071_v45, %v6516_v40  ;;  %v7376_v17 = vrot.slane %v9071_v45, %v6533_v46  ;;  %v7385_v14 = vadd.f32 %v7312_v10, %v3043_v31  ;;  %v4817_v31 = vld [vmem:[#allocation2 + $0x330] sm:$0xff] }
 0x1c8   :  { %9070 = vst [vmem:[#allocation67_spill] sm:$0xff] %v7361_v16  ;;  %3927 = vmatpush2.msra.mxu1 %v2147_v7  ;;  %4075 = vmatprep.subr.mxu0 %v2288_v35  ;;  %v7382_v8 = vpop.f32.mrf.mxu1  ;;  %v2139_v35 = vmul.f32 %v7291_v37, %v6591_v13  ;;  %v2280_v45 = vmul.f32 %v7328_v1, %v6459_v55 }
 0x1c9   :  { %3697 = vmatmul.mubr.f32.gmra.mxu1 %v4816_v5  ;;  %v3054_v7 = vpop.f32.mrf.mxu0  ;;  %9072 = vst [vmem:[#allocation47_spill] sm:$0xff] %v7382_v8  ;;  %9073 = vst [vmem:[#allocation68_spill] sm:$0xff] %v7385_v14  ;;  %3928 = vmatprep.subr.mxu1 %v2144_v44  ;;  %v7394_v16 = vrot.slane %v6007_v22, %v6533_v46  ;;  %v2136_v37 = vmul.f32 %v7372_v28, %v6477_v47  ;;  %v4818_v44 = vld [vmem:[#allocation2 + $0x378] sm:$0xff]  ;;  %v4822_v14 = vld [vmem:[#allocation2 + $0x3d0] sm:$0xff] }
 0x1ca   :  { %4076 = vmatpush2.msra.mxu0 %v2287_v33  ;;  %v3055_v5 = vadd.f32 %v3054_v7, %v6960_v58  ;;  %3929 = vmatpush2.msra.mxu1 %v2143_v42  ;;  %v3215_v10 = vpop.f32.mrf.mxu1  ;;  %v2279_v58 = vmul.f32 %v7335_v9, %v6591_v13  ;;  %v2135_v33 = vmul.f32 %v7376_v17, %v6597_v19  ;;  %v4819_v7 = vld [vmem:[#allocation2 + $0x328] sm:$0xff] }
 0x1cb   :  { %4077 = vmatprep.subr.mxu0 %v2284_v3  ;;  %v7396_v8 = vpop.f32.mrf.mxu0  ;;  %3851 = vmatprep.mubr.f32.mxu0 %v4817_v31  ;;  %v2276_v22 = vmul.f32 %v7380_v48, %v6477_v47 }
 0x1cc   :  { %9074 = vst [vmem:[#allocation69_spill] sm:$0xff] %v7396_v8  ;;  %3930 = vmatprep.subr.mxu1 %v2140_v57  ;;  %4078 = vmatpush2.msra.mxu0 %v2283_v62  ;;  %v7406_v3 = vpop.f32.mrf.mxu1  ;;  %v2132_v57 = vmul.f32 %v7372_v28, %v6471_v30  ;;  %v7412_v62 = vadd.f32 %v7344_v25, %v3049_v56 }
 0x1cd   :  { %3702 = vmatprep.mubr.f32.mxu1 %v4818_v44  ;;  %v3060_v42 = vpop.f32.mrf.mxu0  ;;  %9075 = vst [vmem:[#allocation70_spill] sm:$0xff] %v7406_v3  ;;  %3852 = vmatmul.mubr.f32.gmra.mxu0 %v4819_v7  ;;  %v4820_v44 = vld [vmem:[#allocation2 + $0x370] sm:$0xff]  ;;  %v2275_v8 = vmul.f32 %v7394_v16, %v6597_v19  ;;  %v2131_v3 = vmul.f32 %v7376_v17, %v6633_v59 }
 0x1ce   :  { %3931 = vmatpush2.msra.mxu1 %v2139_v35  ;;  %v3061_v31 = vadd.f32 %v3060_v42, %v6988_v32  ;;  %9076 = vst [vmem:[#allocation71_spill] sm:$0xff] %v7412_v62  ;;  %4079 = vmatprep.subr.mxu0 %v2280_v45  ;;  %v2272_v35 = vmul.f32 %v7380_v48, %v6471_v30 }
 0x1cf   :  { %3703 = vmatmul.mubr.f32.gmra.mxu1 %v4820_v44  ;;  %v7420_v7 = vpop.f32.mrf.mxu0  ;;  %3932 = vmatprep.subr.mxu1 %v2136_v37  ;;  %v2128_v32 = vmul.f32 %v7372_v28, %v6469_v36  ;;  %v2271_v25 = vmul.f32 %v7394_v16, %v6633_v59  ;;  %v2127_v56 = vmul.f32 %v7376_v17, %v6642_v20  ;;  %v3221_v45 = vpop.f32.mrf.mxu1 }
 0x1d0   :  { %9077 = vst [vmem:[#allocation72_spill] sm:$0xff] %v7420_v7  ;;  %4080 = vmatpush2.msra.mxu0 %v2279_v58  ;;  %3933 = vmatpush2.msra.mxu1 %v2135_v33  ;;  %v2268_v42 = vmul.f32 %v7380_v48, %v6469_v36  ;;  %v2124_v44 = vmul.f32 %v7372_v28, %v6656_v6  ;;  %v4821_v7 = vld [vmem:[#allocation2 + $0x388] sm:$0xff] }
 0x1d1   :  { %4081 = vmatprep.subr.mxu0 %v2276_v22  ;;  %v7432_v37 = vadd.f32 %v3209_v18, %v3055_v5  ;;  %v7436_v58 = vadd.f32 %v6828_v2, %v6820_v61  ;;  %3857 = vmatprep.mubr.f32.mxu0 %v4821_v7  ;;  %v2267_v62 = vmul.f32 %v7394_v16, %v6642_v20  ;;  %v7440_v22 = vpop.f32.mrf.mxu1  ;;  %v4823_v5 = vld [vmem:[#allocation2 + $0x380] sm:$0xff]  ;;  %v4824_v7 = vld [vmem:[#allocation2 + $0x3c8] sm:$0xff] }
 0x1d2   :  { %3934 = vmatprep.subr.mxu1 %v2132_v57  ;;  %v3066_v33 = vpop.f32.mrf.mxu0  ;;  %9080 = vst [vmem:[#allocation75_spill] sm:$0xff] %v7440_v22  ;;  %v7442_v15 = vadd.f32 %v3215_v10, %v3061_v31  ;;  %4082 = vmatpush2.msra.mxu0 %v2275_v8  ;;  %v2123_v18 = vmul.f32 %v7376_v17, %v6671_v54 }
 0x1d3   :  { %9078 = vst [vmem:[#allocation73_spill] sm:$0xff] %v7432_v37  ;;  %9079 = vst [vmem:[#allocation74_spill] sm:$0xff] %v7436_v58  ;;  %3708 = vmatprep.mubr.f32.mxu1 %v4822_v14  ;;  %v7448_v61 = vrot.slane %v5970_v0, %v6516_v40  ;;  %v3067_v2 = vadd.f32 %v3066_v33, %v7016_v63  ;;  %3858 = vmatmul.mubr.f32.gmra.mxu0 %v4823_v5  ;;  %v3227_v31 = vpop.f32.mrf.mxu1  ;;  %v9135_v58 = vld [vmem:[#allocation42_spill] sm:$0xff] }
 0x1d4   :  { %9081 = vst [vmem:[#allocation76_spill] sm:$0xff] %v7442_v15  ;;  %3935 = vmatpush2.msra.mxu1 %v2131_v3  ;;  %v2264_v57 = vmul.f32 %v7380_v48, %v6656_v6  ;;  %v7455_v8 = vrot.slane %v5970_v0, %v6533_v46  ;;  %v7459_v14 = vrot.slane %v6061_v12, %v6516_v40  ;;  %v7461_v10 = vpop.f32.mrf.mxu0 }
 0x1d5   :  { %9082 = vst [vmem:[#allocation77_spill] sm:$0xff] %v7461_v10  ;;  %4083 = vmatprep.subr.mxu0 %v2272_v35  ;;  %3709 = vmatmul.mubr.f32.gmra.mxu1 %v4824_v7  ;;  %v2120_v63 = vmul.f32 %v7372_v28, %v6459_v55  ;;  %v7467_v3 = vrot.slane %v6061_v12, %v6533_v46  ;;  %v7477_v22 = vpop.f32.mrf.mxu1 }
 0x1d6   :  { %v7469_v33 = vadd.f32 %v3221_v45, %v3067_v2  ;;  %3936 = vmatprep.subr.mxu1 %v2128_v32  ;;  %4084 = vmatpush2.msra.mxu0 %v2271_v25  ;;  %v2263_v0 = vmul.f32 %v7394_v16, %v6671_v54  ;;  %v2119_v5 = vmul.f32 %v7376_v17, %v6591_v13  ;;  %v3072_v7 = vpop.f32.mrf.mxu0  ;;  %v4825_v25 = vld [vmem:[#allocation2 + $0x3e0] sm:$0xff] }
 0x1d7   :  { %v2260_v35 = vmul.f32 %v7380_v48, %v6459_v55  ;;  %9084 = vst [vmem:[#allocation79_spill] sm:$0xff] %v7477_v22  ;;  %3937 = vmatpush2.msra.mxu1 %v2127_v56  ;;  %4085 = vmatprep.subr.mxu0 %v2268_v42  ;;  %v2116_v12 = vmul.f32 %v7448_v61, %v6477_v47  ;;  %v3233_v42 = vpop.f32.mrf.mxu1 }
 0x1d8   :  { %9083 = vst [vmem:[#allocation78_spill] sm:$0xff] %v7469_v33  ;;  %v2259_v28 = vmul.f32 %v7394_v16, %v6591_v13  ;;  %v3073_v32 = vadd.f32 %v3072_v7, %v7048_v53  ;;  %3863 = vmatprep.mubr.f32.mxu0 %v4825_v25  ;;  %3938 = vmatprep.subr.mxu1 %v2124_v44  ;;  %v7490_v45 = vpop.f32.mrf.mxu0  ;;  %v4826_v53 = vld [vmem:[#allocation2 + $0x428] sm:$0xff]  ;;  %v4827_v7 = vld [vmem:[#allocation2 + $0x3d8] sm:$0xff] }
 0x1d9   :  { %v2115_v17 = vmul.f32 %v7455_v8, %v6597_v19  ;;  %v2256_v48 = vmul.f32 %v7459_v14, %v6477_v47  ;;  %v2112_v56 = vmul.f32 %v7448_v61, %v6471_v30  ;;  %9085 = vst [vmem:[#allocation80_spill] sm:$0xff] %v7490_v45  ;;  %v7494_v16 = vadd.f32 %v6850_v26, %v6846_v41  ;;  %v9115_v33 = vld [vmem:[#allocation35_spill] sm:$0xff] }
 0x1da   :  { %4086 = vmatpush2.msra.mxu0 %v2267_v62  ;;  %3714 = vmatprep.mubr.f32.mxu1 %v4826_v53  ;;  %v2255_v44 = vmul.f32 %v7467_v3, %v6597_v19  ;;  %v7498_v2 = vadd.f32 %v3227_v31, %v3073_v32  ;;  %v2111_v25 = vmul.f32 %v7455_v8, %v6633_v59  ;;  %v3078_v26 = vpop.f32.mrf.mxu0  ;;  %v7506_v62 = vpop.f32.mrf.mxu1  ;;  %v4828_v53 = vld [vmem:[#allocation2 + $0x420] sm:$0xff] }
 0x1db   :  { %9086 = vst [vmem:[#allocation81_spill] sm:$0xff] %v7494_v16  ;;  %3864 = vmatmul.mubr.f32.gmra.mxu0 %v4827_v7  ;;  %3939 = vmatpush2.msra.mxu1 %v2123_v18  ;;  %v2252_v22 = vmul.f32 %v7459_v14, %v6471_v30  ;;  %v2108_v41 = vmul.f32 %v7448_v61, %v6469_v36  ;;  %9088 = vst [vmem:[#allocation83_spill] sm:$0xff] %v7506_v62  ;;  %v4842_v16 = vld [vmem:[#allocation2 + $0x78] sm:$0xff] }
 0x1dc   :  { %9087 = vst [vmem:[#allocation82_spill] sm:$0xff] %v7498_v2  ;;  %4087 = vmatprep.subr.mxu0 %v2264_v57  ;;  %3715 = vmatmul.mubr.f32.gmra.mxu1 %v4828_v53  ;;  %v2251_v31 = vmul.f32 %v7467_v3, %v6633_v59  ;;  %v7512_v18 = vmul.f32 %v7455_v8, %v6642_v20  ;;  %v7527_v62 = vpop.f32.mrf.mxu0 }
 0x1dd   :  { %v3079_v32 = vadd.f32 %v3078_v26, %v7073_v29  ;;  %3940 = vmatprep.subr.mxu1 %v2120_v63  ;;  %4088 = vmatpush2.msra.mxu0 %v2263_v0  ;;  %v7517_v7 = vmul.f32 %v7459_v14, %v6469_v36  ;;  %v7521_v57 = vmul.f32 %v7448_v61, %v6656_v6  ;;  %v3239_v63 = vpop.f32.mrf.mxu1  ;;  %v4829_v26 = vld [vmem:[#allocation2 + $0x438] sm:$0xff] }
 0x1de   :  { %v7525_v53 = vmul.f32 %v7467_v3, %v6642_v20  ;;  %9089 = vst [vmem:[#allocation84_spill] sm:$0xff] %v7527_v62  ;;  %v7531_v2 = vadd.f32 %v6879_v24, %v6874_v4  ;;  %3941 = vmatpush2.msra.mxu1 %v2119_v5  ;;  %4089 = vmatprep.subr.mxu0 %v2260_v35  ;;  %v4830_v5 = vld [vmem:[#allocation2 + $0x480] sm:$0xff]  ;;  %v4835_v62 = vld [vmem:[#allocation2 + $0x488] sm:$0xff] }
 0x1df   :  { %v7535_v29 = vrot.slane %v6230_v21, %v6516_v40  ;;  %v7537_v0 = vadd.f32 %v3233_v42, %v3079_v32  ;;  %3869 = vmatprep.mubr.f32.mxu0 %v4829_v26  ;;  %3942 = vmatprep.subr.mxu1 %v2116_v12  ;;  %v7541_v45 = vmul.f32 %v7455_v8, %v6671_v54  ;;  %v3084_v32 = vpop.f32.mrf.mxu0  ;;  %v7563_v26 = vpop.f32.mrf.mxu1 }
 0x1e0   :  { %9090 = vst [vmem:[#allocation85_spill] sm:$0xff] %v7531_v2  ;;  %v7545_v4 = vmul.f32 %v7459_v14, %v6656_v6  ;;  %v7549_v24 = vrot.slane %v6230_v21, %v6533_v46  ;;  %4090 = vmatpush2.msra.mxu0 %v2259_v28  ;;  %3720 = vmatprep.mubr.f32.mxu1 %v4830_v5  ;;  %9094 = vst [vmem:[#allocation89_spill] sm:$0xff] %v7563_v26  ;;  %v4831_v21 = vld [vmem:[#allocation2 + $0x430] sm:$0xff] }
 0x1e1   :  { %9091 = vst [vmem:[#allocation86_spill] sm:$0xff] %v7535_v29  ;;  %9092 = vst [vmem:[#allocation87_spill] sm:$0xff] %v7537_v0  ;;  %v7553_v35 = vmul.f32 %v7448_v61, %v6459_v55  ;;  %v7557_v12 = vmul.f32 %v7467_v3, %v6671_v54  ;;  %v7561_v42 = vmul.f32 %v7455_v8, %v6591_v13  ;;  %3870 = vmatmul.mubr.f32.gmra.mxu0 %v4831_v21  ;;  %v4832_v0 = vld [vmem:[#allocation2 + $0x478] sm:$0xff]  ;;  %v7586_v21 = vpop.f32.mrf.mxu0  ;;  %v4833_v26 = vld [vmem:[#allocation2 + $0x490] sm:$0xff] }
 0x1e2   :  { %9093 = vst [vmem:[#allocation88_spill] sm:$0xff] %v7549_v24  ;;  %3943 = vmatpush2.msra.mxu1 %v2115_v17  ;;  %v7567_v28 = vmul.f32 %v7459_v14, %v6459_v55  ;;  %v7571_v61 = vmul.f32 %v7467_v3, %v6591_v13  ;;  %v3085_v5 = vadd.f32 %v3084_v32, %v7107_v27  ;;  %9096 = vst [vmem:[#allocation91_spill] sm:$0xff] %v7586_v21  ;;  %v3245_v3 = vpop.f32.mrf.mxu1 }
 0x1e3   :  { %v7576_v8 = vadd.f32 %v6907_v38, %v6898_v34  ;;  %4091 = vmatprep.subr.mxu0 %v2256_v48  ;;  %3721 = vmatmul.mubr.f32.gmra.mxu1 %v4832_v0  ;;  %v7580_v17 = vmul.f32 %v7535_v29, %v6471_v30  ;;  %v7584_v14 = vmul.f32 %v7089_v51, %v6477_v47  ;;  %v3090_v0 = vpop.f32.mrf.mxu0 }
 0x1e4   :  { %3944 = vmatprep.subr.mxu1 %v2112_v56  ;;  %4092 = vmatpush2.msra.mxu0 %v2255_v44  ;;  %v7590_v34 = vmul.f32 %v7549_v24, %v6633_v59  ;;  %v7594_v38 = vmul.f32 %v7095_v50, %v6597_v19  ;;  %v7596_v27 = vadd.f32 %v3239_v63, %v3085_v5  ;;  %v7610_v32 = vpop.f32.mrf.mxu1  ;;  %v4834_v5 = vld [vmem:[#allocation2 + $0x4d8] sm:$0xff] }
 0x1e5   :  { %9095 = vst [vmem:[#allocation90_spill] sm:$0xff] %v7576_v8  ;;  %3945 = vmatpush2.msra.mxu1 %v2111_v25  ;;  %4093 = vmatprep.subr.mxu0 %v2252_v22  ;;  %v7600_v48 = vmul.f32 %v7535_v29, %v6469_v36  ;;  %v7604_v56 = vmul.f32 %v7089_v51, %v6471_v30  ;;  %9098 = vst [vmem:[#allocation93_spill] sm:$0xff] %v7610_v32  ;;  %v7629_v32 = vpop.f32.mrf.mxu0  ;;  %v9127_v8 = vld [vmem:[#allocation36_spill] sm:$0xff] }
 0x1e6   :  { %9097 = vst [vmem:[#allocation92_spill] sm:$0xff] %v7596_v27  ;;  %v7608_v44 = vmul.f32 %v7549_v24, %v6642_v20  ;;  %3875 = vmatprep.mubr.f32.mxu0 %v4833_v26  ;;  %3946 = vmatprep.subr.mxu1 %v2108_v41  ;;  %v7614_v22 = vmul.f32 %v7095_v50, %v6633_v59  ;;  %9099 = vst [vmem:[#allocation94_spill] sm:$0xff] %v7629_v32  ;;  %v7631_v27 = vpop.f32.mrf.mxu1  ;;  %v4838_v32 = vld [vmem:[#allocation2 + $0x4e0] sm:$0xff] }
 0x1e7   :  { %v1564_v25 = vrot.slane %v6274_v11, %v6516_v40  ;;  %v3091_v63 = vadd.f32 %v3090_v0, %v7141_v49  ;;  %4094 = vmatpush2.msra.mxu0 %v2251_v31  ;;  %3726 = vmatprep.mubr.f32.mxu1 %v4834_v5  ;;  %v7621_v21 = vmul.f32 %v7535_v29, %v6656_v6 }
 0x1e8   :  { %v7625_v26 = vrot.slane %v6225_v52, %v6516_v40  ;;  %v1560_v41 = vrot.slane %v6274_v11, %v6533_v46  ;;  %9100 = vst [vmem:[#allocation95_spill] sm:$0xff] %v7631_v27  ;;  %3876 = vmatmul.mubr.f32.gmra.mxu0 %v4835_v62  ;;  %3947 = vmatpush2.msra.mxu1 %v7512_v18  ;;  %v9102_v11 = vld [vmem:[#allocation27_spill] sm:$0xff]  ;;  %v4836_v27 = vld [vmem:[#allocation2 + $0x4d0] sm:$0xff]  ;;  %v7657_v18 = vpop.f32.mrf.mxu0 }
 0x1e9   :  { %v7636_v49 = vmul.f32 %v7089_v51, %v6469_v36  ;;  %v7640_v31 = vmul.f32 %v7549_v24, %v6671_v54  ;;  %v7642_v0 = vadd.f32 %v3245_v3, %v3091_v63  ;;  %v7646_v5 = vadd.f32 %v9102_v11, %v6938_v23  ;;  %4095 = vmatprep.subr.mxu0 %v7517_v7  ;;  %v7659_v3 = vpop.f32.mrf.mxu1 }
 0x1ea   :  { %3727 = vmatmul.mubr.f32.gmra.mxu1 %v4836_v27  ;;  %v7651_v62 = vmul.f32 %v7095_v50, %v6642_v20  ;;  %v7655_v51 = vrot.slane %v6225_v52, %v6533_v46  ;;  %9104 = vst [vmem:[#allocation97_spill] sm:$0xff] %v7657_v18  ;;  %9105 = vst [vmem:[#allocation98_spill] sm:$0xff] %v7659_v3  ;;  %3948 = vmatprep.subr.mxu1 %v7521_v57  ;;  %v9106_v52 = vld [vmem:[#allocation29_spill] sm:$0xff]  ;;  %v9107_v27 = vld [vmem:[#allocation31_spill] sm:$0xff]  ;;  %v7687_v11 = vpop.f32.mrf.mxu0 }
 0x1eb   :  { %9101 = vst [vmem:[#allocation96_spill] sm:$0xff] %v7642_v0  ;;  %9103 = vst [vmem:[#allocation27_spill] sm:$0xff] %v7646_v5  ;;  %4096 = vmatpush2.msra.mxu0 %v7525_v53  ;;  %v7665_v23 = vmul.f32 %v7535_v29, %v6459_v55  ;;  %v7669_v50 = vmul.f32 %v7549_v24, %v6591_v13  ;;  %v7672_v7 = vmul.f32 %v1564_v25, %v6477_v47  ;;  %v4837_v3 = vld [vmem:[#allocation2 + $0x4e8] sm:$0xff]  ;;  %v7697_v18 = vpop.f32.mrf.mxu1  ;;  %v9114_v29 = vld [vmem:[#allocation30_spill] sm:$0xff] }
 0x1ec   :  { %v7676_v63 = vadd.f32 %v9107_v27, %v9106_v52  ;;  %3949 = vmatpush2.msra.mxu1 %v7541_v45  ;;  %4097 = vmatprep.subr.mxu0 %v7545_v4  ;;  %v7682_v57 = vmul.f32 %v7625_v26, %v6477_v47  ;;  %v7685_v53 = vmul.f32 %v1560_v41, %v6597_v19  ;;  %v9110_v45 = vld [vmem:[#allocation39_spill] sm:$0xff]  ;;  %v9126_v5 = vld [vmem:[#allocation38_spill] sm:$0xff] }
 0x1ed   :  { %9109 = vst [vmem:[#allocation31_spill] sm:$0xff] %v7687_v11  ;;  %3881 = vmatprep.mubr.f32.mxu0 %v4837_v3  ;;  %3950 = vmatprep.subr.mxu1 %v7553_v35  ;;  %v7691_v52 = vmul.f32 %v1564_v25, %v6471_v30  ;;  %v1548_v27 = vrot.slane %v9110_v45, %v6516_v40  ;;  %9111 = vst [vmem:[#allocation39_spill] sm:$0xff] %v7697_v18  ;;  %v4839_v0 = vld [vmem:[#allocation2 + $0x28] sm:$0xff]  ;;  %v7720_v18 = vpop.f32.mrf.mxu0  ;;  %v7722_v24 = vpop.f32.mrf.mxu1 }
 0x1ee   :  { %9108 = vst [vmem:[#allocation29_spill] sm:$0xff] %v7676_v63  ;;  %v1544_v4 = vrot.slane %v9110_v45, %v6533_v46  ;;  %4098 = vmatpush2.msra.mxu0 %v7557_v12  ;;  %3951 = vmatpush2.msra.mxu1 %v7561_v42  ;;  %v7703_v3 = vmul.f32 %v7655_v51, %v6597_v19  ;;  %9112 = vst [vmem:[#allocation99_spill] sm:$0xff] %v7720_v18  ;;  %v9125_v63 = vld [vmem:[#allocation16_spill] sm:$0xff] }
 0x1ef   :  { %v7706_v35 = vmul.f32 %v1560_v41, %v6633_v59  ;;  %v7709_v11 = vmul.f32 %v1564_v25, %v6469_v36  ;;  %3882 = vmatmul.mubr.f32.gmra.mxu0 %v4838_v32  ;;  %3952 = vmatprep.mubr.f32.mxu1 %v4839_v0  ;;  %v7712_v45 = vmul.f32 %v1560_v41, %v6642_v20  ;;  %v4840_v32 = vld [vmem:[#allocation2 + $0x20] sm:$0xff] }
 0x1f0   :  { %v7715_v12 = vmul.f32 %v1564_v25, %v6656_v6  ;;  %v7718_v42 = vmul.f32 %v1560_v41, %v6671_v54  ;;  %9113 = vst [vmem:[#allocation100_spill] sm:$0xff] %v7722_v24  ;;  %v7726_v10 = vadd.f32 %v9115_v33, %v9114_v29  ;;  %4099 = vmatprep.subr.mxu0 %v7567_v28  ;;  %v7746_v28 = vpop.f32.mrf.mxu1 }
 0x1f1   :  { %3953 = vmatmul.mubr.f32.vlgmr.msra.gmra.mxu1 %v4840_v32  ;;  %v7730_v0 = vmul.f32 %v1564_v25, %v6459_v55  ;;  %v7733_v15 = vmul.f32 %v1560_v41, %v6591_v13  ;;  %4100 = vmatpush2.msra.mxu0 %v7571_v61  ;;  %v7738_v24 = vmul.f32 %v1548_v27, %v6477_v47  ;;  %v9118_v25 = vld [vmem:[#allocation37_spill] sm:$0xff]  ;;  %v9119_v32 = vld [vmem:[#allocation34_spill] sm:$0xff]  ;;  %v7761_v41 = vpop.f32.mrf.mxu0 }
 0x1f2   :  { %9116 = vst [vmem:[#allocation30_spill] sm:$0xff] %v7726_v10  ;;  %4198 = vmatprep.subr.mxu1 %v7580_v17  ;;  %v7741_v33 = vmul.f32 %v1544_v4, %v6597_v19  ;;  %v7744_v29 = vmul.f32 %v1548_v27, %v6471_v30  ;;  %9117 = vst [vmem:[#allocation35_spill] sm:$0xff] %v7746_v28  ;;  %v7750_v18 = vadd.f32 %v9119_v32, %v9118_v25  ;;  %v4841_v32 = vld [vmem:[#allocation2 + $0x80] sm:$0xff] }
 0x1f3   :  { %4101 = vmatprep.subr.mxu0 %v7584_v14  ;;  %4199 = vmatpush1.msra.mxu1 %v7590_v34  ;;  %v7756_v61 = vmul.f32 %v7625_v26, %v6471_v30  ;;  %v7759_v17 = vmul.f32 %v1544_v4, %v6633_v59  ;;  %9121 = vst [vmem:[#allocation34_spill] sm:$0xff] %v7761_v41 }
 0x1f4   :  { %9120 = vst [vmem:[#allocation37_spill] sm:$0xff] %v7750_v18  ;;  %4102 = vmatpush2.msra.mxu0 %v7594_v38  ;;  %4200 = vmatprep.subr.mxu1 %v7600_v48  ;;  %v7767_v25 = vmul.f32 %v7655_v51, %v6633_v59  ;;  %v7770_v14 = vmul.f32 %v1548_v27, %v6469_v36  ;;  %v9122_v48 = vld [vmem:[#allocation12_spill] sm:$0xff] }
 0x1f5   :  { %v7773_v34 = vmul.f32 %v1544_v4, %v6642_v20  ;;  %3958 = vmatprep.mubr.f32.mxu1 %v4841_v32  ;;  %4103 = vmatprep.subr.mxu0 %v7604_v56  ;;  %v7777_v28 = vmul.f32 %v1548_v27, %v6656_v6  ;;  %v7780_v38 = vmul.f32 %v1544_v4, %v6671_v54  ;;  %v9123_v32 = vld [vmem:[#allocation51_spill] sm:$0xff]  ;;  %v7793_v56 = vpop.f32.mrf.mxu1 }
 0x1f6   :  { %v560_v41 = vrot.slane %v9122_v48, %v6533_v46  ;;  %4201 = vmatpush1.msra.mxu1 %v7608_v44  ;;  %4104 = vmatpush2.msra.mxu0 %v7614_v22  ;;  %v7787_v18 = vmul.f32 %v1548_v27, %v6459_v55  ;;  %v7791_v10 = vrot.slane %v9123_v32, %v6516_v40  ;;  %v7809_v27 = vpop.f32.mrf.mxu0 }
 0x1f7   :  { %9124 = vst [vmem:[#allocation12_spill] sm:$0xff] %v7793_v56  ;;  %v672_v37 = vrot.slane %v9125_v63, %v6533_v46  ;;  %v7799_v2 = vadd.f32 %v9127_v8, %v9126_v5  ;;  %3959 = vmatmul.mubr.f32.gmra.mxu1 %v4842_v16  ;;  %4202 = vmatprep.subr.mxu1 %v7621_v21  ;;  %9129 = vst [vmem:[#allocation16_spill] sm:$0xff] %v7809_v27  ;;  %v9130_v21 = vld [vmem:[#allocation19_spill] sm:$0xff]  ;;  %v4844_v27 = vld [vmem:[#allocation2 + $0xd8] sm:$0xff] }
 0x1f8   :  { %v7803_v44 = vmul.f32 %v1544_v4, %v6591_v13  ;;  %v7807_v22 = vrot.slane %v9123_v32, %v6533_v46  ;;  %4105 = vmatprep.subr.mxu0 %v7636_v49  ;;  %4203 = vmatpush1.msra.mxu1 %v7640_v31  ;;  %v7815_v8 = vmul.f32 %v7328_v1, %v6477_v47  ;;  %v4843_v4 = vld [vmem:[#allocation2 + $0x38] sm:$0xff]  ;;  %v9132_v32 = vld [vmem:[#allocation14_spill] sm:$0xff] }
 0x1f9   :  { %9128 = vst [vmem:[#allocation51_spill] sm:$0xff] %v7799_v2  ;;  %v7819_v16 = vmul.f32 %v7335_v9, %v6597_v19  ;;  %v616_v5 = vrot.slane %v9130_v21, %v6533_v46  ;;  %4106 = vmatpush2.msra.mxu0 %v7651_v62  ;;  %4107 = vmatprep.mubr.f32.mxu0 %v4843_v4  ;;  %v9134_v4 = vld [vmem:[#allocation41_spill] sm:$0xff] }
 0x1fa   :  { %v7826_v49 = vmul.f32 %v7328_v1, %v6471_v30  ;;  %v7829_v31 = vrot.slane %v560_v41, %v6533_v46  ;;  %v728_v56 = vrot.slane %v9132_v32, %v6533_v46  ;;  %4204 = vmatprep.subr.mxu1 %v7665_v23  ;;  %3964 = vmatprep.mubr.f32.mxu1 %v4844_v27  ;;  %v7842_v1 = vpop.f32.mrf.mxu1  ;;  %v4845_v23 = vld [vmem:[#allocation2 + $0x30] sm:$0xff] }
 0x1fb   :  { %v7836_v2 = vmul.f32 %v7335_v9, %v6633_v59  ;;  %v7840_v62 = vmul.f32 %v7791_v10, %v6477_v47  ;;  %v7845_v41 = vrot.slane %v672_v37, %v6533_v46  ;;  %4108 = vmatmul.mubr.f32.vlgmr.msra.gmra.mxu0 %v4845_v23  ;;  %4205 = vmatpush1.msra.mxu1 %v7669_v50  ;;  %v4846_v37 = vld [vmem:[#allocation2 + $0xd0] sm:$0xff]  ;;  %v9140_v23 = vld [vmem:[#allocation21_spill] sm:$0xff] }
 0x1fc   :  { %9131 = vst [vmem:[#allocation38_spill] sm:$0xff] %v7826_v49  ;;  %v7849_v49 = vadd.f32 %v9135_v58, %v9134_v4  ;;  %v7854_v9 = vmul.f32 %v7625_v26, %v6469_v36  ;;  %v7858_v27 = vmul.f32 %v7807_v22, %v6597_v19  ;;  %4375 = vmatprep.subr.mxu0 %v7682_v57 }
 0x1fd   :  { %9133 = vst [vmem:[#allocation36_spill] sm:$0xff] %v7840_v62  ;;  %v7860_v62 = vpop.f32.mrf.mxu0  ;;  %3965 = vmatmul.mubr.f32.gmra.mxu1 %v4846_v37  ;;  %v7865_v58 = vmul.f32 %v7655_v51, %v6642_v20  ;;  %v7869_v50 = vmul.f32 %v7791_v10, %v6471_v30  ;;  %v7872_v4 = vrot.slane %v616_v5, %v6533_v46  ;;  %v9141_v37 = vld [vmem:[#allocation24_spill] sm:$0xff]  ;;  %v7886_v5 = vpop.f32.mrf.mxu1 }
 0x1fe   :  { %9136 = vst [vmem:[#allocation19_spill] sm:$0xff] %v7849_v49  ;;  %9137 = vst [vmem:[#allocation14_spill] sm:$0xff] %v7858_v27  ;;  %4206 = vmatprep.subr.mxu1 %v7672_v7  ;;  %4376 = vmatpush1.msra.mxu0 %v7703_v3  ;;  %v7878_v57 = vrot.slane %v9140_v23, %v6516_v40  ;;  %vm593_vm2 = vcmp.eq.f32.partialorder %v9141_v37, %v7829_v31  ;;  %v9143_v7 = vld [vmem:[#allocation18_spill] sm:$0xff]  ;;  %v4848_v3 = vld [vmem:[#allocation2 + $0x130] sm:$0xff] }
 0x1ff   :  { %9138 = vst [vmem:[#allocation41_spill] sm:$0xff] %v7860_v62  ;;  %9139 = vst [vmem:[#allocation42_spill] sm:$0xff] %v7869_v50  ;;  %v7883_v62 = vrot.slane %v728_v56, %v6533_v46  ;;  %v3334_v49 = vpop.f32.mrf.mxu0  ;;  %4207 = vmatpush1.msra.mxu1 %v7685_v53  ;;  %v4847_v50 = vld [vmem:[#allocation2 + $0x90] sm:$0xff]  ;;  %vm705_vm1 = vcmp.eq.f32.partialorder %v9141_v37, %v7845_v41  ;;  %vm597_vm3 = vcmp.eq.f32.partialorder %v9143_v7, %v7829_v31 }
 0x200   :  { %4113 = vmatprep.mubr.f32.mxu0 %v4847_v50  ;;  %9142 = vst [vmem:[#allocation21_spill] sm:$0xff] %v7886_v5  ;;  %vm709_vm4 = vcmp.eq.f32.partialorder %v9143_v7, %v7845_v41  ;;  %4208 = vmatprep.subr.mxu1 %v7691_v52  ;;  %v7897_v53 = vmul.f32 %v7807_v22, %v6633_v59  ;;  %v4849_v5 = vld [vmem:[#allocation2 + $0x88] sm:$0xff] }
 0x201   :  { %3970 = vmatprep.mubr.f32.mxu1 %v4848_v3  ;;  %v7901_v56 = vmul.f32 %v7791_v10, %v6469_v36  ;;  %v7905_v50 = vrot.slane %v9140_v23, %v6533_v46  ;;  %4114 = vmatmul.mubr.f32.gmra.mxu0 %v4849_v5  ;;  %v7910_v52 = vmul.f32 %v7807_v22, %v6642_v20  ;;  %v649_v23 = vsel %vm593_vm2, %v7872_v4, 0.0  ;;  %v7924_v5 = vpop.f32.mrf.mxu0  ;;  %v4852_v7 = vld [vmem:[#allocation2 + $0x188] sm:$0xff] }
 0x202   :  { %9144 = vst [vmem:[#allocation101_spill] sm:$0xff] %v7897_v53  ;;  %4209 = vmatpush1.msra.mxu1 %v7706_v35  ;;  %v7914_v3 = vmul.f32 %v7791_v10, %v6656_v6  ;;  %v7918_v53 = vmul.f32 %v7807_v22, %v6671_v54  ;;  %9149 = vst [vmem:[#allocation106_spill] sm:$0xff] %v7924_v5  ;;  %v3495_v35 = vpop.f32.mrf.mxu1  ;;  %v765_v5 = vsel %vm709_vm4, %v7883_v62, 0.0  ;;  %4377 = vmatprep.subr.mxu0 %v7756_v61  ;;  %v9161_v61 = vld [vmem:[#allocation25_spill] sm:$0xff] }
 0x203   :  { %9145 = vst [vmem:[#allocation102_spill] sm:$0xff] %v7901_v56  ;;  %9146 = vst [vmem:[#allocation103_spill] sm:$0xff] %v7910_v52  ;;  %v4850_v56 = vld [vmem:[#allocation2 + $0x128] sm:$0xff]  ;;  %4210 = vmatprep.subr.mxu1 %v7709_v11  ;;  %v3335_v52 = vadd.f32 %v3334_v49, %v7270_v43  ;;  %v7947_v43 = vmul.f32 %v7807_v22, %v6591_v13  ;;  %v7951_v49 = vmul.f32 %v7878_v57, %v6477_v47 }
 0x204   :  { %9147 = vst [vmem:[#allocation104_spill] sm:$0xff] %v7914_v3  ;;  %9148 = vst [vmem:[#allocation105_spill] sm:$0xff] %v7918_v53  ;;  %3971 = vmatmul.mubr.f32.gmra.mxu1 %v4850_v56  ;;  %v761_v3 = vsel %vm705_vm1, %v7883_v62, 0.0  ;;  %v653_v53 = vsel %vm597_vm3, %v7872_v4, 0.0  ;;  %v4851_v11 = vld [vmem:[#allocation2 + $0xe8] sm:$0xff]  ;;  %v7943_v56 = vmul.f32 %v7791_v10, %v6459_v55  ;;  %v7953_v27 = vpop.f32.mrf.mxu1  ;;  %v7962_v10 = vmul.f32 %v7625_v26, %v6656_v6 }
 0x205   :  { %4211 = vmatpush1.msra.mxu1 %v7712_v45  ;;  %4119 = vmatprep.mubr.f32.mxu0 %v4851_v11  ;;  %9150 = vst [vmem:[#allocation107_spill] sm:$0xff] %v7951_v49  ;;  %9151 = vst [vmem:[#allocation108_spill] sm:$0xff] %v7953_v27  ;;  %v7958_v45 = vmul.f32 %v7905_v50, %v6597_v19  ;;  %v7966_v22 = vmul.f32 %v7878_v57, %v6471_v30  ;;  %v4853_v11 = vld [vmem:[#allocation2 + $0xe0] sm:$0xff]  ;;  %v9155_v49 = vld [vmem:[#allocation23_spill] sm:$0xff] }
 0x206   :  { %4212 = vmatprep.subr.mxu1 %v7715_v12  ;;  %3976 = vmatprep.mubr.f32.mxu1 %v4852_v7  ;;  %9153 = vst [vmem:[#allocation110_spill] sm:$0xff] %v7962_v10  ;;  %v7969_v27 = vadd.f32 %v761_v3, %v649_v23  ;;  %v7971_v12 = vadd.f32 %v765_v5, %v653_v53  ;;  %v3340_v7 = vpop.f32.mrf.mxu0  ;;  %v4856_v23 = vld [vmem:[#allocation2 + $0x1e0] sm:$0xff] }
 0x207   :  { %9152 = vst [vmem:[#allocation109_spill] sm:$0xff] %v7958_v45  ;;  %9154 = vst [vmem:[#allocation111_spill] sm:$0xff] %v7966_v22  ;;  %4120 = vmatmul.mubr.f32.gmra.mxu0 %v4853_v11  ;;  %4213 = vmatpush1.msra.mxu1 %v7718_v42  ;;  %vm601_vm5 = vcmp.eq.f32.partialorder %v9155_v49, %v7829_v31  ;;  %v4854_v45 = vld [vmem:[#allocation2 + $0x180] sm:$0xff]  ;;  %v3490_v10 = vadd.f32 %v7842_v1, %v3335_v52 }
 0x208   :  { %3977 = vmatmul.mubr.f32.gmra.mxu1 %v4854_v45  ;;  %4214 = vmatprep.subr.mxu1 %v7730_v0  ;;  %v3341_v22 = vadd.f32 %v3340_v7, %v7340_v60  ;;  %vm713_vm6 = vcmp.eq.f32.partialorder %v9155_v49, %v7845_v41  ;;  %v4855_v42 = vld [vmem:[#allocation2 + $0x140] sm:$0xff]  ;;  %v7983_v53 = vmul.f32 %v7655_v51, %v6671_v54  ;;  %v9156_v60 = vld [vmem:[#allocation11_spill] sm:$0xff]  ;;  %v7996_v52 = vpop.f32.mrf.mxu0  ;;  %v4857_v7 = vld [vmem:[#allocation2 + $0x138] sm:$0xff] }
 0x209   :  { %4215 = vmatpush1.msra.mxu1 %v7733_v15  ;;  %4125 = vmatprep.mubr.f32.mxu0 %v4855_v42  ;;  %v7987_v3 = vmul.f32 %v7905_v50, %v6633_v59  ;;  %v7991_v0 = vmul.f32 %v7878_v57, %v6469_v36  ;;  %v7994_v1 = vsub.s32 6, %v9156_v60  ;;  %v3501_v15 = vpop.f32.mrf.mxu1  ;;  %v8001_v5 = vmul.f32 %v7905_v50, %v6642_v20 }
 0x20a   :  { %4216 = vmatprep.subr.mxu1 %v7738_v24  ;;  %3982 = vmatprep.mubr.f32.mxu1 %v4856_v23  ;;  %v8005_v45 = vmul.f32 %v7878_v57, %v6656_v6  ;;  %v3496_v11 = vadd.f32 %v3495_v35, %v3341_v22  ;;  %v8010_v42 = vmul.f32 %v7905_v50, %v6671_v54  ;;  %v9160_v24 = vld [vmem:[#allocation40_spill] sm:$0xff]  ;;  %v657_v23 = vsel %vm601_vm5, %v7872_v4, 0.0 }
 0x20b   :  { %9157 = vst [vmem:[#allocation11_spill] sm:$0xff] %v7994_v1  ;;  %4126 = vmatmul.mubr.f32.gmra.mxu0 %v4857_v7  ;;  %4217 = vmatpush1.msra.mxu1 %v7741_v33  ;;  %v8014_v60 = vrot.slane %v9160_v24, %v6516_v40  ;;  %v769_v35 = vsel %vm713_vm6, %v7883_v62, 0.0  ;;  %v8024_v22 = vpop.f32.mrf.mxu1  ;;  %v4858_v33 = vld [vmem:[#allocation2 + $0x1d8] sm:$0xff]  ;;  %v8029_v40 = vrot.slane %v9160_v24, %v6533_v46  ;;  %vm4707_vm6 = vcmask 1041409  }
 0x20c   :  { %9158 = vst [vmem:[#allocation112_spill] sm:$0xff] %v8005_v45  ;;  %9159 = vst [vmem:[#allocation113_spill] sm:$0xff] %v8010_v42  ;;  %3983 = vmatmul.mubr.f32.gmra.mxu1 %v4858_v33  ;;  %v4508_v7 = vmul.f32 %v3490_v10, %v7969_v27  ;;  %v4512_v54 = vmul.f32 %v3496_v11, %v7971_v12  ;;  %4218 = vmatprep.subr.mxu1 %v7744_v29  ;;  %v3346_v45 = vpop.f32.mrf.mxu0  ;;  %v4859_v24 = vld [vmem:[#allocation2 + $0x198] sm:$0xff] }
 0x20d   :  { %4378 = vmatpush1.msra.mxu0 %v7767_v25  ;;  %v564_v42 = vrot.slane %v9122_v48, %v7994_v1  ;;  %vm605_vm7 = vcmp.eq.f32.partialorder %v9161_v61, %v7829_v31  ;;  %vm717_vm8 = vcmp.eq.f32.partialorder %v9161_v61, %v7845_v41  ;;  %4219 = vmatpush1.msra.mxu1 %v7759_v17  ;;  %v4860_v25 = vld [vmem:[#allocation2 + $0x238] sm:$0xff] }
 0x20e   :  { %4131 = vmatprep.mubr.f32.mxu0 %v4859_v24  ;;  %v4568_v10 = vadd.f32 %v4512_v54, %v4508_v7  ;;  %v8042_v11 = vadd.f32 %v769_v35, %v657_v23  ;;  %v3347_v29 = vadd.f32 %v3346_v45, %v7364_v39  ;;  %4220 = vmatprep.subr.mxu1 %v7770_v14  ;;  %v8056_v54 = vpop.f32.mrf.mxu0  ;;  %v3507_v23 = vpop.f32.mrf.mxu1  ;;  %v4861_v35 = vld [vmem:[#allocation2 + $0x190] sm:$0xff] }
 0x20f   :  { %3988 = vmatprep.mubr.f32.mxu1 %v4860_v25  ;;  %v8048_v48 = vmul.f32 %v7878_v57, %v6459_v55  ;;  %v8052_v33 = vmul.f32 %v7905_v50, %v6591_v13  ;;  %v676_v17 = vrot.slane %v9125_v63, %v7994_v1  ;;  %4132 = vmatmul.mubr.f32.gmra.mxu0 %v4861_v35  ;;  %v661_v57 = vsel %vm605_vm7, %v7872_v4, 0.0  ;;  %v4862_v50 = vld [vmem:[#allocation2 + $0x230] sm:$0xff] }
 0x210   :  { %4221 = vmatpush1.msra.mxu1 %v7773_v34  ;;  %v8061_v39 = vmul.f32 %v8014_v60, %v6477_v47  ;;  %v3502_v14 = vadd.f32 %v3501_v15, %v3347_v29  ;;  %v773_v63 = vsel %vm717_vm8, %v7883_v62, 0.0  ;;  %v8074_v34 = vmul.f32 %v8029_v40, %v6597_v19  ;;  %v8082_v7 = vpop.f32.mrf.mxu1  ;;  %v4863_v24 = vld [vmem:[#allocation2 + $0x1f0] sm:$0xff]  ;;  %4379 = vmatprep.subr.mxu0 %v7854_v9  ;;  %v9176_v9 = vld [vmem:[#allocation14_spill] sm:$0xff] }
 0x211   :  { %3989 = vmatmul.mubr.f32.gmra.mxu1 %v4862_v50  ;;  %4222 = vmatprep.subr.mxu1 %v7777_v28  ;;  %v8078_v15 = vmul.f32 %v8014_v60, %v6471_v30  ;;  %v620_v45 = vrot.slane %v9130_v21, %v7994_v1  ;;  %v8086_v29 = vrot.slane %v564_v42, %v6533_v46  ;;  %v4864_v30 = vld [vmem:[#allocation2 + $0x290] sm:$0xff]  ;;  %v9163_v50 = vld [vmem:[#allocation26_spill] sm:$0xff]  ;;  %v4865_v42 = vld [vmem:[#allocation2 + $0x1e8] sm:$0xff]  ;;  %vm4709_vm7 = vcmask 1045509  }
 0x212   :  { %4223 = vmatpush1.msra.mxu1 %v7780_v38  ;;  %4137 = vmatprep.mubr.f32.mxu0 %v4863_v24  ;;  %v732_v28 = vrot.slane %v9132_v32, %v7994_v1  ;;  %v4516_v25 = vmul.f32 %v3502_v14, %v8042_v11  ;;  %v8093_v21 = vrot.slane %v676_v17, %v6533_v46  ;;  %v3352_v38 = vpop.f32.mrf.mxu0  ;;  %v9164_v24 = vld [vmem:[#allocation68_spill] sm:$0xff]  ;;  %v9183_v1 = vld [vmem:[#allocation102_spill] sm:$0xff]  ;;  %vm4712_vm8 = vcmask 1042434  }
 0x213   :  { %4224 = vmatprep.subr.mxu1 %v7787_v18  ;;  %3994 = vmatprep.mubr.f32.mxu1 %v4864_v30  ;;  %v8095_v35 = vadd.f32 %v773_v63, %v661_v57  ;;  %vm609_vm9 = vcmp.eq.f32.partialorder %v9163_v50, %v7829_v31  ;;  %v3353_v14 = vadd.f32 %v3352_v38, %v9164_v24  ;;  %v4866_v18 = vld [vmem:[#allocation2 + $0x288] sm:$0xff]  ;;  %v3513_v63 = vpop.f32.mrf.mxu1  ;;  %v9165_v30 = vld [vmem:[#allocation38_spill] sm:$0xff]  ;;  %v9168_v24 = vld [vmem:[#allocation81_spill] sm:$0xff] }
 0x214   :  { %4138 = vmatmul.mubr.f32.gmra.mxu0 %v4865_v42  ;;  %4225 = vmatpush1.msra.mxu1 %v7803_v44  ;;  %v4569_v32 = vadd.f32 %v4568_v10, %v4516_v25  ;;  %vm721_vm10 = vcmp.eq.f32.partialorder %v9163_v50, %v7845_v41  ;;  %v8106_v17 = vmul.f32 %v8029_v40, %v6633_v59  ;;  %v8116_v10 = vpop.f32.mrf.mxu0  ;;  %v4867_v25 = vld [vmem:[#allocation2 + $0x248] sm:$0xff]  ;;  %v4869_v42 = vld [vmem:[#allocation2 + $0x240] sm:$0xff]  ;;  %v9169_v41 = vld [vmem:[#allocation61_spill] sm:$0xff] }
 0x215   :  { %9162 = vst [vmem:[#allocation40_spill] sm:$0xff] %v8095_v35  ;;  %3995 = vmatmul.mubr.f32.gmra.mxu1 %v4866_v18  ;;  %4226 = vmatprep.subr.mxu1 %v7815_v8  ;;  %v8110_v57 = vmul.f32 %v7625_v26, %v6459_v55  ;;  %v8114_v44 = vmul.f32 %v8014_v60, %v6469_v36  ;;  %v4868_v36 = vld [vmem:[#allocation2 + $0x2e8] sm:$0xff]  ;;  %v9203_v19 = vld [vmem:[#allocation76_spill] sm:$0xff] }
 0x216   :  { %4227 = vmatpush1.msra.mxu1 %v7819_v16  ;;  %4143 = vmatprep.mubr.f32.mxu0 %v4867_v25  ;;  %v8121_v8 = vmul.f32 %v7655_v51, %v6591_v13  ;;  %v8125_v59 = vmul.f32 %v8029_v40, %v6642_v20  ;;  %v3508_v26 = vadd.f32 %v3507_v23, %v3353_v14  ;;  %v665_v51 = vsel %vm609_vm9, %v7872_v4, 0.0  ;;  %v8142_v23 = vpop.f32.mrf.mxu1  ;;  %v9166_v4 = vld [vmem:[#allocation74_spill] sm:$0xff]  ;;  %v3358_v18 = vpop.f32.mrf.mxu0  ;;  %v9171_v25 = vld [vmem:[#allocation36_spill] sm:$0xff] }
 0x217   :  { %4228 = vmatprep.subr.mxu1 %v9165_v30  ;;  %4000 = vmatprep.mubr.f32.mxu1 %v4868_v36  ;;  %v8129_v38 = vrot.slane %v620_v45, %v6533_v46  ;;  %v8132_v16 = vrot.slane %v732_v28, %v6533_v46  ;;  %v777_v20 = vsel %vm721_vm10, %v7883_v62, 0.0  ;;  %vm594_vm11 = vcmp.eq.f32.partialorder %v9141_v37, %v8086_v29  ;;  %v9167_v45 = vld [vmem:[#allocation48_spill] sm:$0xff]  ;;  %v4870_v14 = vld [vmem:[#allocation2 + $0x2e0] sm:$0xff]  ;;  %v9173_v36 = vld [vmem:[#allocation71_spill] sm:$0xff] }
 0x218   :  { %4144 = vmatmul.mubr.f32.gmra.mxu0 %v4869_v42  ;;  %4229 = vmatpush1.msra.mxu1 %v7836_v2  ;;  %vm706_vm12 = vcmp.eq.f32.partialorder %v9141_v37, %v8093_v21  ;;  %v4520_v31 = vmul.f32 %v3508_v26, %v8095_v35  ;;  %v3027_v28 = vadd.f32 %v9167_v45, %v9166_v4  ;;  %v9174_v4 = vld [vmem:[#allocation85_spill] sm:$0xff]  ;;  %v9175_v45 = vld [vmem:[#allocation63_spill] sm:$0xff]  ;;  %v9205_v47 = vld [vmem:[#allocation72_spill] sm:$0xff]  ;;  %vm4714_vm9 = vcmask 1046534  }
 0x219   :  { %v3033_v62 = vadd.f32 %v9169_v41, %v9168_v24  ;;  %4001 = vmatmul.mubr.f32.gmra.mxu1 %v4870_v14  ;;  %v8157_v2 = vmul.f32 %v8014_v60, %v6656_v6  ;;  %4230 = vmatprep.subr.mxu1 %v9171_v25  ;;  %v8161_v30 = vadd.f32 %v777_v20, %v665_v51  ;;  %v4871_v41 = vld [vmem:[#allocation2 + $0x2a0] sm:$0xff]  ;;  %v650_v6 = vsel %vm594_vm11, %v8129_v38, 0.0  ;;  %v8177_v51 = vpop.f32.mrf.mxu0  ;;  %v8179_v20 = vpop.f32.mrf.mxu1 }
 0x21a   :  { %4380 = vmatpush1.msra.mxu0 %v7865_v58  ;;  %v4570_v26 = vadd.f32 %v4569_v32, %v4520_v31  ;;  %v3359_v42 = vadd.f32 %v3358_v18, %v9173_v36  ;;  %v3039_v24 = vadd.f32 %v9175_v45, %v9174_v4  ;;  %4231 = vmatpush2.msra.mxu1 %v9176_v9  ;;  %v762_v58 = vsel %vm706_vm12, %v8132_v16, 0.0  ;;  %v9177_v32 = vld [vmem:[#allocation18_spill] sm:$0xff]  ;;  %v9180_v36 = vld [vmem:[#allocation65_spill] sm:$0xff] }
 0x21b   :  { %9170 = vst [vmem:[#allocation26_spill] sm:$0xff] %v8157_v2  ;;  %9172 = vst [vmem:[#allocation68_spill] sm:$0xff] %v8161_v30  ;;  %4149 = vmatprep.mubr.f32.mxu0 %v4871_v41  ;;  %vm598_vm13 = vcmp.eq.f32.partialorder %v9177_v32, %v8086_v29  ;;  %v9178_v31 = vld [vmem:[#allocation42_spill] sm:$0xff]  ;;  %vm710_vm14 = vcmp.eq.f32.partialorder %v9177_v32, %v8093_v21  ;;  %vm602_vm15 = vcmp.eq.f32.partialorder %v9155_v49, %v8086_v29  ;;  %v4873_v45 = vld [vmem:[#allocation2 + $0x298] sm:$0xff] }
 0x21c   :  { %4232 = vmatprep.subr.mxu1 %v9178_v31  ;;  %v4872_v14 = vld [vmem:[#allocation2 + $0x340] sm:$0xff]  ;;  %v3514_v18 = vadd.f32 %v3513_v63, %v3359_v42  ;;  %4150 = vmatmul.mubr.f32.gmra.mxu0 %v4873_v45  ;;  %v9181_v9 = vld [vmem:[#allocation101_spill] sm:$0xff]  ;;  %v9182_v41 = vld [vmem:[#allocation60_spill] sm:$0xff]  ;;  %vm714_vm2 = vcmp.eq.f32.partialorder %v9155_v49, %v8093_v21  ;;  %v8192_v31 = vpop.f32.mrf.mxu1  ;;  %v8195_v46 = vadd.f32 %v762_v58, %v650_v6 }
 0x21d   :  { %4006 = vmatprep.mubr.f32.mxu1 %v4872_v14  ;;  %v9179_v25 = vld [vmem:[#allocation90_spill] sm:$0xff]  ;;  %4233 = vmatpush2.msra.mxu1 %v9181_v9  ;;  %v3182_v37 = vadd.f32 %v9182_v41, %v3027_v28  ;;  %v4874_v14 = vld [vmem:[#allocation2 + $0x338] sm:$0xff]  ;;  %v654_v28 = vsel %vm598_vm13, %v8129_v38, 0.0  ;;  %v9187_v9 = vld [vmem:[#allocation104_spill] sm:$0xff]  ;;  %vm606_vm1 = vcmp.eq.f32.partialorder %v9161_v61, %v8086_v29  ;;  %vm718_vm3 = vcmp.eq.f32.partialorder %v9161_v61, %v8093_v21 }
 0x21e   :  { %v3045_v4 = vadd.f32 %v9180_v36, %v9179_v25  ;;  %4007 = vmatmul.mubr.f32.gmra.mxu1 %v4874_v14  ;;  %4234 = vmatprep.subr.mxu1 %v9183_v1  ;;  %v9184_v63 = vld [vmem:[#allocation50_spill] sm:$0xff]  ;;  %v4524_v25 = vmul.f32 %v3514_v18, %v8161_v30  ;;  %v9185_v36 = vld [vmem:[#allocation103_spill] sm:$0xff]  ;;  %v4875_v45 = vld [vmem:[#allocation2 + $0x2f8] sm:$0xff]  ;;  %v766_v1 = vsel %vm710_vm14, %v8132_v16, 0.0  ;;  %v3364_v18 = vpop.f32.mrf.mxu0  ;;  %vm610_vm4 = vcmp.eq.f32.partialorder %v9163_v50, %v8086_v29 }
 0x21f   :  { %v3188_v42 = vadd.f32 %v9184_v63, %v3033_v62  ;;  %4235 = vmatpush2.msra.mxu1 %v9185_v36  ;;  %4155 = vmatprep.mubr.f32.mxu0 %v4875_v45  ;;  %v658_v62 = vsel %vm602_vm15, %v8129_v38, 0.0  ;;  %v9186_v6 = vld [vmem:[#allocation62_spill] sm:$0xff]  ;;  %v4876_v41 = vld [vmem:[#allocation2 + $0x398] sm:$0xff]  ;;  %v770_v63 = vsel %vm714_vm2, %v8132_v16, 0.0  ;;  %v9189_v45 = vld [vmem:[#allocation27_spill] sm:$0xff]  ;;  %vm722_vm5 = vcmp.eq.f32.partialorder %v9163_v50, %v8093_v21 }
 0x220   :  { %v3194_v58 = vadd.f32 %v9186_v6, %v3039_v24  ;;  %4236 = vmatprep.subr.mxu1 %v9187_v9  ;;  %4012 = vmatprep.mubr.f32.mxu1 %v4876_v41  ;;  %v8221_v36 = vadd.f32 %v4570_v26, %v4524_v25  ;;  %v9190_v32 = vld [vmem:[#allocation67_spill] sm:$0xff]  ;;  %v4877_v6 = vld [vmem:[#allocation2 + $0x2f0] sm:$0xff]  ;;  %v9191_v9 = vld [vmem:[#allocation105_spill] sm:$0xff]  ;;  %v8232_v26 = vadd.f32 %v766_v1, %v654_v28 }
 0x221   :  { %v3343_v14 = vadd.f32 %v7996_v52, %v3188_v42  ;;  %v3051_v24 = vadd.f32 %v9190_v32, %v9189_v45  ;;  %4156 = vmatmul.mubr.f32.gmra.mxu0 %v4877_v6  ;;  %4237 = vmatpush2.msra.mxu1 %v9191_v9  ;;  %v9192_v41 = vld [vmem:[#allocation106_spill] sm:$0xff]  ;;  %v8229_v52 = vpop.f32.mrf.mxu0  ;;  %v3525_v42 = vpop.f32.mrf.mxu1  ;;  %v4878_v49 = vld [vmem:[#allocation2 + $0x390] sm:$0xff]  ;;  %v9193_v25 = vld [vmem:[#allocation73_spill] sm:$0xff] }
 0x222   :  { %9188 = vst [vmem:[#allocation38_spill] sm:$0xff] %v8221_v36  ;;  %v3337_v30 = vadd.f32 %v9192_v41, %v3182_v37  ;;  %4013 = vmatmul.mubr.f32.gmra.mxu1 %v4878_v49  ;;  %4238 = vmatprep.subr.mxu1 %v7943_v56  ;;  %v3349_v32 = vadd.f32 %v8056_v54, %v3194_v58  ;;  %v9194_v6 = vld [vmem:[#allocation29_spill] sm:$0xff]  ;;  %v4879_v37 = vld [vmem:[#allocation2 + $0x350] sm:$0xff]  ;;  %v662_v56 = vsel %vm606_vm1, %v8129_v38, 0.0  ;;  %v9197_v1 = vld [vmem:[#allocation107_spill] sm:$0xff] }
 0x223   :  { %v3365_v45 = vadd.f32 %v3364_v18, %v9193_v25  ;;  %v9195_v9 = vld [vmem:[#allocation69_spill] sm:$0xff]  ;;  %4239 = vmatpush2.msra.mxu1 %v7947_v43  ;;  %4161 = vmatprep.mubr.f32.mxu0 %v4879_v37  ;;  %v8241_v41 = vadd.f32 %v770_v63, %v658_v62  ;;  %v9196_v49 = vld [vmem:[#allocation64_spill] sm:$0xff]  ;;  %v8248_v54 = vpop.f32.mrf.mxu1  ;;  %v774_v43 = vsel %vm718_vm3, %v8132_v16, 0.0  ;;  %v9206_v2 = vld [vmem:[#allocation111_spill] sm:$0xff] }
 0x224   :  { %v8238_v36 = vadd.f32 %v9195_v9, %v9194_v6  ;;  %v3200_v28 = vadd.f32 %v9196_v49, %v3045_v4  ;;  %4240 = vmatprep.subr.mxu1 %v9197_v1  ;;  %v4880_v58 = vld [vmem:[#allocation2 + $0x3f0] sm:$0xff]  ;;  %v4881_v4 = vld [vmem:[#allocation2 + $0x348] sm:$0xff]  ;;  %v9199_v62 = vld [vmem:[#allocation109_spill] sm:$0xff]  ;;  %v3370_v49 = vpop.f32.mrf.mxu0 }
 0x225   :  { %4018 = vmatprep.mubr.f32.mxu1 %v4880_v58  ;;  %v9198_v18 = vld [vmem:[#allocation108_spill] sm:$0xff]  ;;  %4162 = vmatmul.mubr.f32.gmra.mxu0 %v4881_v4  ;;  %v9200_v63 = vld [vmem:[#allocation21_spill] sm:$0xff]  ;;  %v9202_v1 = vld [vmem:[#allocation110_spill] sm:$0xff]  ;;  %v3520_v61 = vadd.f32 %v8179_v20, %v3365_v45  ;;  %v3371_v35 = vadd.f32 %v3370_v49, %v9203_v19  ;;  %v778_v19 = vsel %vm722_vm5, %v8132_v16, 0.0 }
 0x226   :  { %v3498_v25 = vadd.f32 %v9198_v18, %v3343_v14  ;;  %4241 = vmatpush2.msra.mxu1 %v9199_v62  ;;  %v3492_v6 = vadd.f32 %v9200_v63, %v3337_v30  ;;  %v3355_v9 = vadd.f32 %v8116_v10, %v3200_v28  ;;  %v9201_v14 = vld [vmem:[#allocation66_spill] sm:$0xff]  ;;  %4381 = vmatprep.subr.mxu0 %v9202_v1  ;;  %v4882_v58 = vld [vmem:[#allocation2 + $0x3e8] sm:$0xff]  ;;  %v3531_v28 = vpop.f32.mrf.mxu1 }
 0x227   :  { %v3206_v37 = vadd.f32 %v9201_v14, %v3051_v24  ;;  %4019 = vmatmul.mubr.f32.gmra.mxu1 %v4882_v58  ;;  %v3504_v18 = vadd.f32 %v8024_v22, %v3349_v32  ;;  %v9204_v4 = vld [vmem:[#allocation30_spill] sm:$0xff]  ;;  %4242 = vmatprep.subr.mxu1 %v9206_v2  ;;  %v8272_v10 = vadd.f32 %v774_v43, %v662_v56  ;;  %v3372_v24 = vpop.f32.mrf.mxu0  ;;  %v4883_v22 = vld [vmem:[#allocation2 + $0x3a8] sm:$0xff]  ;;  %v9207_v2 = vld [vmem:[#allocation37_spill] sm:$0xff] }
 0x228   :  { %v3063_v62 = vadd.f32 %v9205_v47, %v9204_v4  ;;  %4382 = vmatpush1.msra.mxu0 %v7983_v53  ;;  %4243 = vmatpush2.msra.mxu1 %v7987_v3  ;;  %v4513_v20 = vmul.f32 %v3498_v25, %v8232_v26  ;;  %v666_v47 = vsel %vm610_vm4, %v8129_v38, 0.0  ;;  %v3526_v53 = vadd.f32 %v3525_v42, %v3371_v35  ;;  %v4884_v3 = vld [vmem:[#allocation2 + $0x448] sm:$0xff]  ;;  %v8290_v25 = vpop.f32.mrf.mxu1  ;;  %v4885_v29 = vld [vmem:[#allocation2 + $0x3a0] sm:$0xff] }
 0x229   :  { %v3361_v30 = vadd.f32 %v8177_v51, %v3206_v37  ;;  %4167 = vmatprep.mubr.f32.mxu0 %v4883_v22  ;;  %v9208_v51 = vld [vmem:[#allocation77_spill] sm:$0xff]  ;;  %4244 = vmatprep.subr.mxu1 %v7991_v0  ;;  %v4509_v45 = vmul.f32 %v3492_v6, %v8195_v46  ;;  %v3510_v56 = vadd.f32 %v8082_v7, %v3355_v9  ;;  %v4886_v16 = vld [vmem:[#allocation2 + $0x440] sm:$0xff]  ;;  %v9209_v0 = vld [vmem:[#allocation112_spill] sm:$0xff]  ;;  %v3376_v6 = vpop.f32.mrf.mxu0 }
 0x22a   :  { %v3069_v32 = vadd.f32 %v9208_v51, %v9207_v2  ;;  %4024 = vmatprep.mubr.f32.mxu1 %v4884_v3  ;;  %4168 = vmatmul.mubr.f32.gmra.mxu0 %v4885_v29  ;;  %v4517_v21 = vmul.f32 %v3504_v18, %v8241_v41  ;;  %v4528_v35 = vmul.f32 %v3520_v61, %v7969_v27  ;;  %v9210_v43 = vld [vmem:[#allocation70_spill] sm:$0xff]  ;;  %v9211_v9 = vld [vmem:[#allocation113_spill] sm:$0xff]  ;;  %v9212_v61 = vld [vmem:[#allocation47_spill] sm:$0xff] }
 0x22b   :  { %4245 = vmatpush2.msra.mxu1 %v8001_v5  ;;  %v4532_v38 = vmul.f32 %v3526_v53, %v7971_v12  ;;  %v8297_v42 = vadd.f32 %v778_v19, %v666_v47  ;;  %v3516_v7 = vadd.f32 %v8142_v23, %v3361_v30  ;;  %v3218_v63 = vadd.f32 %v9210_v43, %v3063_v62  ;;  %v4887_v5 = vld [vmem:[#allocation2 + $0x400] sm:$0xff]  ;;  %v3378_v62 = vpop.f32.mrf.mxu0  ;;  %v3537_v30 = vpop.f32.mrf.mxu1  ;;  %v9214_v22 = vld [vmem:[#allocation51_spill] sm:$0xff]  ;;  %v9215_v47 = vld [vmem:[#allocation80_spill] sm:$0xff] }
 0x22c   :  { %4025 = vmatmul.mubr.f32.gmra.mxu1 %v4886_v16  ;;  %4246 = vmatprep.subr.mxu1 %v9209_v0  ;;  %v4578_v14 = vadd.f32 %v4513_v20, %v4509_v45  ;;  %v3212_v37 = vadd.f32 %v9212_v61, %v8238_v36  ;;  %v4888_v1 = vld [vmem:[#allocation2 + $0x4a0] sm:$0xff]  ;;  %v4521_v58 = vmul.f32 %v3510_v56, %v8272_v10  ;;  %v4889_v53 = vld [vmem:[#allocation2 + $0x3f8] sm:$0xff]  ;;  %v9216_v20 = vld [vmem:[#allocation75_spill] sm:$0xff] }
 0x22d   :  { %4247 = vmatpush2.msra.mxu1 %v9211_v9  ;;  %4173 = vmatprep.mubr.f32.mxu0 %v4887_v5  ;;  %v4608_v49 = vadd.f32 %v4532_v38, %v4528_v35  ;;  %v3373_v18 = vadd.f32 %v3372_v24, %v3218_v63  ;;  %v9213_v23 = vld [vmem:[#allocation78_spill] sm:$0xff]  ;;  %v3075_v19 = vadd.f32 %v9215_v47, %v9214_v22  ;;  %v3539_v45 = vpop.f32.mrf.mxu1  ;;  %v4891_v56 = vld [vmem:[#allocation2 + $0x458] sm:$0xff]  ;;  %v3382_v38 = vpop.f32.mrf.mxu0  ;;  %v9219_v16 = vld [vmem:[#allocation84_spill] sm:$0xff] }
 0x22e   :  { %4248 = vmatprep.subr.mxu1 %v8048_v48  ;;  %4030 = vmatprep.mubr.f32.mxu1 %v4888_v1  ;;  %v3377_v4 = vadd.f32 %v3376_v6, %v9213_v23  ;;  %v4579_v36 = vadd.f32 %v4578_v14, %v4517_v21  ;;  %v3224_v2 = vadd.f32 %v9216_v20, %v3069_v32  ;;  %v4890_v48 = vld [vmem:[#allocation2 + $0x498] sm:$0xff]  ;;  %v9220_v43 = vld [vmem:[#allocation82_spill] sm:$0xff]  ;;  %v4895_v1 = vld [vmem:[#allocation2 + $0x4b0] sm:$0xff] }
 0x22f   :  { %4174 = vmatmul.mubr.f32.gmra.mxu0 %v4889_v53  ;;  %4249 = vmatpush2.msra.mxu1 %v8052_v33  ;;  %v4525_v24 = vmul.f32 %v3516_v7, %v8297_v42  ;;  %v3367_v51 = vadd.f32 %v8229_v52, %v3212_v37  ;;  %v9217_v29 = vld [vmem:[#allocation33_spill] sm:$0xff]  ;;  %v2360_v32 = vmul.f32 %v8014_v60, %v6459_v55  ;;  %v4893_v7 = vld [vmem:[#allocation2 + $0x450] sm:$0xff]  ;;  %v9221_v60 = vld [vmem:[#allocation79_spill] sm:$0xff]  ;;  %v3384_v5 = vpop.f32.mrf.mxu0  ;;  %v3543_v14 = vpop.f32.mrf.mxu1 }
 0x230   :  { %4031 = vmatmul.mubr.f32.gmra.mxu1 %v4890_v48  ;;  %4250 = vmatprep.subr.mxu1 %v8061_v39  ;;  %v3532_v3 = vadd.f32 %v3531_v28, %v3377_v4  ;;  %v2363_v33 = vmul.f32 %v8029_v40, %v9217_v29  ;;  %v3379_v21 = vadd.f32 %v3378_v62, %v3224_v2  ;;  %v4892_v39 = vld [vmem:[#allocation2 + $0x4f8] sm:$0xff]  ;;  %v9227_v22 = vld [vmem:[#allocation88_spill] sm:$0xff]  ;;  %v9228_v53 = vld [vmem:[#allocation83_spill] sm:$0xff] }
 0x231   :  { %4251 = vmatpush2.msra.mxu1 %v8074_v34  ;;  %4179 = vmatprep.mubr.f32.mxu0 %v4891_v56  ;;  %v4580_v35 = vadd.f32 %v4579_v36, %v4521_v58  ;;  %v3528_v52 = vadd.f32 %v8248_v54, %v3373_v18  ;;  %v9218_v34 = vld [vmem:[#allocation19_spill] sm:$0xff]  ;;  %v3383_v55 = vadd.f32 %v3382_v38, %v9220_v43  ;;  %v9222_v58 = vld [vmem:[#allocation26_spill] sm:$0xff] }
 0x232   :  { %4252 = vmatprep.subr.mxu1 %v8078_v15  ;;  %4036 = vmatprep.mubr.f32.mxu1 %v4892_v39  ;;  %v4536_v28 = vmul.f32 %v3532_v3, %v8042_v11  ;;  %v3081_v0 = vadd.f32 %v9219_v16, %v9218_v34  ;;  %v3230_v63 = vadd.f32 %v9221_v60, %v3075_v19  ;;  %v4894_v15 = vld [vmem:[#allocation2 + $0x4f0] sm:$0xff]  ;;  %v4896_v18 = vld [vmem:[#allocation2 + $0x4a8] sm:$0xff]  ;;  %v3388_v19 = vpop.f32.mrf.mxu0  ;;  %v4899_v29 = vld [vmem:[#allocation2 + $0x500] sm:$0xff] }
 0x233   :  { %4180 = vmatmul.mubr.f32.gmra.mxu0 %v4893_v7  ;;  %4253 = vmatpush2.msra.mxu1 %v8106_v17  ;;  %v4581_v6 = vadd.f32 %v4580_v35, %v4525_v24  ;;  %v3522_v54 = vadd.f32 %v8192_v31, %v3367_v51  ;;  %v3534_v17 = vadd.f32 %v8290_v25, %v3379_v21  ;;  %v9225_v25 = vld [vmem:[#allocation40_spill] sm:$0xff]  ;;  %v4898_v20 = vld [vmem:[#allocation2 + $0x48] sm:$0xff]  ;;  %v4900_v34 = vld [vmem:[#allocation2 + $0x40] sm:$0xff] }
 0x234   :  { %4383 = vmatprep.subr.mxu0 %v8110_v57  ;;  %4037 = vmatmul.mubr.f32.gmra.mxu1 %v4894_v15  ;;  %v4609_v9 = vadd.f32 %v4608_v49, %v4536_v28  ;;  %v3538_v61 = vadd.f32 %v3537_v30, %v3383_v55  ;;  %v3385_v37 = vadd.f32 %v3384_v5, %v3230_v63  ;;  %v3545_v49 = vpop.f32.mrf.mxu1  ;;  %v9226_v30 = vld [vmem:[#allocation32_spill] sm:$0xff]  ;;  %v9229_v24 = vld [vmem:[#allocation87_spill] sm:$0xff]  ;;  %v4901_v55 = vld [vmem:[#allocation2 + $0xa0] sm:$0xff] }
 0x235   :  { %4254 = vmatprep.subr.mxu1 %v8114_v44  ;;  %4384 = vmatpush1.msra.mxu0 %v8121_v8  ;;  %v2359_v57 = vmul.f32 %v8029_v40, %v6591_v13  ;;  %v4533_v31 = vmul.f32 %v3528_v52, %v8232_v26  ;;  %v9223_v44 = vld [vmem:[#allocation49_spill] sm:$0xff]  ;;  %v9224_v8 = vld [vmem:[#allocation86_spill] sm:$0xff]  ;;  %v2355_v47 = vmul.f32 %v9227_v22, %v9226_v30  ;;  %v4582_v13 = vrot.slane %v4581_v6, 4  ;;  %v4902_v63 = vld [vmem:[#allocation2 + $0x50] sm:$0xff] }
 0x236   :  { %4255 = vmatpush2.msra.mxu1 %v8125_v59  ;;  %4185 = vmatprep.mubr.f32.mxu0 %v4895_v1  ;;  %v2356_v23 = vmul.f32 %v9224_v8, %v9223_v44  ;;  %v4540_v4 = vmul.f32 %v3538_v61, %v9225_v25  ;;  %v3540_v62 = vadd.f32 %v3539_v45, %v3385_v37  ;;  %v4897_v59 = vld [vmem:[#allocation2 + $0x508] sm:$0xff]  ;;  %v3390_v45 = vpop.f32.mrf.mxu0  ;;  %v3549_v56 = vpop.f32.mrf.mxu1  ;;  %v9231_v52 = vmov 0.0   ;;  %v4903_v61 = vld [vmem:[#allocation2 + $0x98] sm:$0xff] }
 0x237   :  { %4256 = vmatprep.subr.mxu1 %v9222_v58  ;;  %4186 = vmatmul.mubr.f32.gmra.mxu0 %v4896_v18  ;;  %v4529_v40 = vmul.f32 %v3522_v54, %v8195_v46  ;;  %v3236_v36 = vadd.f32 %v9228_v53, %v3081_v0  ;;  %v4537_v2 = vmul.f32 %v3534_v17, %v8241_v41  ;;  %v9232_v0 = vld [vmem:[#allocation68_spill] sm:$0xff]  ;;  %v4905_v18 = vld [vmem:[#allocation2 + $0xa8] sm:$0xff] }
 0x238   :  { %4257 = vmatpush2.msra.mxu1 %v2363_v33  ;;  %4191 = vmatprep.mubr.f32.mxu0 %v4897_v59  ;;  %v4610_v48 = vadd.f32 %v4609_v9, %v4540_v4  ;;  %v3389_v51 = vadd.f32 %v3388_v19, %v9229_v24  ;;  %v9230_v33 = vld [vmem:[#allocation38_spill] sm:$0xff]  ;;  %v4541_v39 = vmul.f32 %v3540_v62, %v8272_v10  ;;  %v8349_v38 = vpop.f32.mrf.mxu1  ;;  %v3394_v60 = vpop.f32.mrf.mxu0  ;;  %v9236_v53 = vld [vmem:[#allocation96_spill] sm:$0xff] }
 0x239   :  { %4258 = vmatprep.subr.mxu1 %v2360_v32  ;;  %4262 = vmatprep.mubr.f32.mxu1 %v4898_v20  ;;  %v4618_v3 = vadd.f32 %v4533_v31, %v4529_v40  ;;  %v4572_v21 = vrot.slane %v9230_v33, 4  ;;  %v3391_v32 = vadd.f32 %v3390_v45, %v3236_v36  ;;  %v4583_v28 = vadd.f32 %v4582_v13, %v4581_v6  ;;  %v9234_v4 = vld [vmem:[#allocation46_spill] sm:$0xff]  ;;  %v9237_v20 = vld [vmem:[#allocation44_spill] sm:$0xff] }
 0x23a   :  { %4259 = vmatpush2.msra.mxu1 %v2359_v57  ;;  %v3544_v35 = vadd.f32 %v3543_v14, %v3389_v51  ;;  %v8356_v14 = vpop.f32.mrf.mxu0  ;;  %v3555_v17 = vpop.f32.mrf.mxu1  ;;  %v9233_v57 = vld [vmem:[#allocation92_spill] sm:$0xff]  ;;  %v9235_v62 = vld [vmem:[#allocation22_spill] sm:$0xff]  ;;  %v9240_v51 = vld [vmem:[#allocation55_spill] sm:$0xff] }
 0x23b   :  { %4260 = vmatprep.subr.mxu1 %v2356_v23  ;;  %4192 = vmatmul.mubr.f32.gmra.mxu0 %v4899_v29  ;;  %v4619_v16 = vadd.f32 %v4618_v3, %v4537_v2  ;;  %v3546_v43 = vadd.f32 %v3545_v49, %v3391_v32  ;;  %v4573_v15 = vadd.f32 %v4572_v21, %v9230_v33  ;;  %v4584_v5 = vrot.slane %v4583_v28, 2  ;;  %v4904_v49 = vld [vmem:[#allocation2 + $0xf8] sm:$0xff]  ;;  %v9239_v24 = vld [vmem:[#allocation54_spill] sm:$0xff] }
 0x23c   :  { %4261 = vmatpush2.msra.mxu1 %v2355_v47  ;;  %4417 = vmatprep.mubr.f32.mxu0 %v9231_v52  ;;  %v4544_v7 = vmul.f32 %v3544_v35, %v9232_v0  ;;  %v3395_v31 = vadd.f32 %v3394_v60, %v9233_v57  ;;  %v8359_v58 = vpop.f32.mrf.mxu1  ;;  %v2938_v59 = vadd.f32 %v9235_v62, %v9234_v4  ;;  %v3400_v22 = vpop.f32.mrf.mxu0  ;;  %v4906_v47 = vld [vmem:[#allocation2 + $0xf0] sm:$0xff]  ;;  %v9238_v2 = vld [vmem:[#allocation45_spill] sm:$0xff]  ;;  %v9241_v45 = vld [vmem:[#allocation94_spill] sm:$0xff] }
 0x23d   :  { %4263 = vmatmul.mubr.f32.vlgmr.msra.gmra.mxu1 %v4900_v34  ;;  %v4620_v54 = vadd.f32 %v4619_v16, %v4541_v39  ;;  %v4545_v6 = vmul.f32 %v3546_v43, %v8297_v42  ;;  %v4574_v44 = vrot.slane %v4573_v15, 2  ;;  %v4585_v30 = vadd.f32 %v4584_v5, %v4583_v28  ;;  %v9242_v33 = vld [vmem:[#allocation53_spill] sm:$0xff]  ;;  %v4907_v35 = vld [vmem:[#allocation2 + $0x150] sm:$0xff]  ;;  %v4908_v34 = vld [vmem:[#allocation2 + $0x100] sm:$0xff] }
 0x23e   :  { %4268 = vmatprep.mubr.f32.mxu1 %v4901_v55  ;;  %v4611_v9 = vadd.f32 %v4610_v48, %v4544_v7  ;;  %v3550_v19 = vadd.f32 %v3549_v56, %v3395_v31  ;;  %v3401_v36 = vadd.f32 %v3400_v22, %v9236_v53  ;;  %v2932_v48 = vadd.f32 %v9238_v2, %v9237_v20  ;;  %v9243_v21 = vld [vmem:[#allocation97_spill] sm:$0xff]  ;;  %v3402_v32 = vpop.f32.mrf.mxu0  ;;  %v3561_v28 = vpop.f32.mrf.mxu1  ;;  %v9244_v55 = vld [vmem:[#allocation91_spill] sm:$0xff]  ;;  %v9246_v57 = vld [vmem:[#allocation28_spill] sm:$0xff] }
 0x23f   :  { %4757 = vmatmul.mubr.msk.f32.vlgmr.msra.gmra.mxu0 %vm2602_vm0, %v4902_v63  ;;  %v4621_v1 = vadd.f32 %v4620_v54, %v4545_v6  ;;  %v2944_v3 = vadd.f32 %v9240_v51, %v9239_v24  ;;  %v3093_v29 = vadd.f32 %v9241_v45, %v2938_v59  ;;  %v3097_v39 = vadd.f32 %v9243_v21, %v9242_v33  ;;  %v9245_v63 = vld [vmem:[#allocation31_spill] sm:$0xff]  ;;  %v9247_v31 = vld [vmem:[#allocation56_spill] sm:$0xff]  ;;  %v4911_v59 = vld [vmem:[#allocation2 + $0x158] sm:$0xff] }
 0x240   :  { %4423 = vmatprep.mubr.f32.mxu0 %v9231_v52  ;;  %v4612_v37 = vrot.slane %v4611_v9, 4  ;;  %v4575_v56 = vadd.f32 %v4574_v44, %v4573_v15  ;;  %v3556_v43 = vadd.f32 %v3555_v17, %v3401_v36  ;;  %v3087_v60 = vadd.f32 %v9244_v55, %v2932_v48  ;;  %v8377_v6 = vpop.f32.mrf.mxu1  ;;  %v4909_v5 = vld [vmem:[#allocation2 + $0x148] sm:$0xff]  ;;  %v9253_v53 = vld [vmem:[#allocation89_spill] sm:$0xff]  ;;  %v9254_v2 = vld [vmem:[#allocation98_spill] sm:$0xff] }
 0x241   :  { %4269 = vmatmul.mubr.f32.gmra.mxu1 %v4903_v61  ;;  %v4622_v23 = vrot.slane %v4621_v1, 4  ;;  %v3099_v54 = vadd.f32 %v9245_v63, %v2944_v3  ;;  %v2950_v17 = vadd.f32 %v9247_v31, %v9246_v57  ;;  %v3406_v62 = vpop.f32.mrf.mxu0  ;;  %v4912_v3 = vld [vmem:[#allocation2 + $0x1a0] sm:$0xff]  ;;  %v9260_v57 = vld [vmem:[#allocation100_spill] sm:$0xff] }
 0x242   :  { %4274 = vmatprep.mubr.f32.mxu1 %v4904_v49  ;;  %v4613_v8 = vadd.f32 %v4612_v37, %v4611_v9  ;;  %v4586_v9 = vrot.slane %v4585_v30, 1  ;;  %v4552_v15 = vmul.f32 %v3556_v43, %v7971_v12  ;;  %v9248_v49 = vld [vmem:[#allocation43_spill] sm:$0xff]  ;;  %v4576_v22 = vrot.slane %v4575_v56, 1  ;;  %v9252_v12 = vld [vmem:[#allocation34_spill] sm:$0xff] }
 0x243   :  { %4758 = vmatmul.mubr.msk.f32.gmra.mxu0 %vm2602_vm0, %v4905_v18  ;;  %v4623_v40 = vadd.f32 %v4622_v23, %v4621_v1  ;;  %v4548_v1 = vmul.f32 %v3550_v19, %v7969_v27  ;;  %v9249_v18 = vld [vmem:[#allocation99_spill] sm:$0xff]  ;;  %v9251_v27 = vld [vmem:[#allocation93_spill] sm:$0xff]  ;;  %v3105_v19 = vadd.f32 %v9252_v12, %v2950_v17  ;;  %v3242_v36 = vadd.f32 %v9253_v53, %v3087_v60  ;;  %v3408_v24 = vpop.f32.mrf.mxu0  ;;  %v4918_v12 = vld [vmem:[#allocation2 + $0x250] sm:$0xff] }
 0x244   :  { %4429 = vmatprep.mubr.f32.mxu0 %v9231_v52  ;;  %v4614_v13 = vrot.slane %v4613_v8, 2  ;;  %v3103_v44 = vadd.f32 %v9249_v18, %v9248_v49  ;;  %v9250_v23 = vld [vmem:[#allocation95_spill] sm:$0xff]  ;;  %v3254_v48 = vadd.f32 %v9254_v2, %v3099_v54  ;;  %v3567_v51 = vpop.f32.mrf.mxu1  ;;  %v4587_v45 = vadd.f32 %v4586_v9, %v4585_v30  ;;  %v9259_v54 = vld [vmem:[#allocation16_spill] sm:$0xff] }
 0x245   :  { %4275 = vmatmul.mubr.f32.gmra.mxu1 %v4906_v47  ;;  %v4624_v7 = vrot.slane %v4623_v40, 2  ;;  %v3252_v4 = vadd.f32 %v9250_v23, %v3097_v39  ;;  %v3397_v43 = vadd.f32 %v8356_v14, %v3242_v36  ;;  %v9257_v60 = vld [vmem:[#allocation39_spill] sm:$0xff]  ;;  %v4577_v30 = vadd.f32 %v4576_v22, %v4575_v56  ;;  %v9261_v56 = vld [vmem:[#allocation41_spill] sm:$0xff]  ;;  %v9263_v2 = vld [vmem:[#allocation12_spill] sm:$0xff] }
 0x246   :  { %4280 = vmatprep.mubr.f32.mxu1 %v4907_v35  ;;  %v4615_v16 = vadd.f32 %v4614_v13, %v4613_v8  ;;  %v4910_v8 = vld [vmem:[#allocation2 + $0x1a8] sm:$0xff]  ;;  %v4648_v13 = vadd.f32 %v4552_v15, %v4548_v1  ;;  %v3258_v63 = vadd.f32 %v9257_v60, %v3103_v44  ;;  %v4914_v15 = vld [vmem:[#allocation2 + $0x1b0] sm:$0xff]  ;;  %v3569_v9 = vpop.f32.mrf.mxu1  ;;  %v3260_v14 = vadd.f32 %v9260_v57, %v3105_v19 }
 0x247   :  { %4759 = vmatmul.mubr.msk.f32.gmra.mxu0 %vm2602_vm0, %v4908_v34  ;;  %v4625_v37 = vadd.f32 %v4624_v7, %v4623_v40  ;;  %v3248_v40 = vadd.f32 %v9251_v27, %v3093_v29  ;;  %v3407_v20 = vadd.f32 %v3406_v62, %v3252_v4  ;;  %v9255_v35 = vld [vmem:[#allocation59_spill] sm:$0xff]  ;;  %v9256_v34 = vld [vmem:[#allocation58_spill] sm:$0xff]  ;;  %v4700_v31 = vcombine.low %v4577_v30, %v4587_v45 }
 0x248   :  { %4435 = vmatprep.mubr.f32.mxu0 %v9231_v52  ;;  %v4616_v61 = vrot.slane %v4615_v16, 1  ;;  %v2956_v29 = vadd.f32 %v9256_v34, %v9255_v35  ;;  %v4913_v7 = vld [vmem:[#allocation2 + $0x200] sm:$0xff]  ;;  %v3552_v23 = vadd.f32 %v8349_v38, %v3397_v43  ;;  %v4917_v62 = vld [vmem:[#allocation2 + $0x208] sm:$0xff]  ;;  %v4923_v43 = vld [vmem:[#allocation2 + $0x2b8] sm:$0xff] }
 0x249   :  { %4281 = vmatmul.mubr.f32.gmra.mxu1 %v4909_v5  ;;  %v4626_v47 = vrot.slane %v4625_v37, 1  ;;  %v3403_v39 = vadd.f32 %v3402_v32, %v3248_v40  ;;  %v3562_v55 = vadd.f32 %v3561_v28, %v3407_v20  ;;  %v9258_v5 = vld [vmem:[#allocation57_spill] sm:$0xff]  ;;  %v9262_v53 = vld [vmem:[#allocation35_spill] sm:$0xff] }
 0x24a   :  { %4286 = vmatprep.mubr.f32.mxu1 %v4910_v8  ;;  %v4617_v33 = vadd.f32 %v4616_v61, %v4615_v16  ;;  %v3109_v1 = vadd.f32 %v9259_v54, %v9258_v5  ;;  %v3409_v16 = vadd.f32 %v3408_v24, %v3254_v48  ;;  %v4915_v28 = vld [vmem:[#allocation2 + $0x1f8] sm:$0xff]  ;;  %v3111_v44 = vadd.f32 %v9261_v56, %v2956_v29  ;;  %v3573_v27 = vpop.f32.mrf.mxu1  ;;  %v4920_v24 = vld [vmem:[#allocation2 + $0x260] sm:$0xff] }
 0x24b   :  { %4760 = vmatmul.mubr.msk.f32.gmra.mxu0 %vm2602_vm0, %v4911_v59  ;;  %v4627_v21 = vadd.f32 %v4626_v47, %v4625_v37  ;;  %v4556_v61 = vmul.f32 %v3562_v55, %v8042_v11  ;;  %v3412_v37 = vpop.f32.mrf.mxu0  ;;  %v3558_v17 = vadd.f32 %v8359_v58, %v3403_v39  ;;  %v4916_v8 = vld [vmem:[#allocation2 + $0x258] sm:$0xff] }
 0x24c   :  { %4441 = vmatprep.mubr.f32.mxu0 %v9231_v52  ;;  %v3413_v49 = vadd.f32 %v3412_v37, %v3258_v63  ;;  %v3564_v59 = vadd.f32 %v8377_v6, %v3409_v16  ;;  %v3264_v36 = vadd.f32 %v9262_v53, %v3109_v1  ;;  %v4919_v6 = vld [vmem:[#allocation2 + $0x2b0] sm:$0xff]  ;;  %v3266_v48 = vadd.f32 %v9263_v2, %v3111_v44  ;;  %v4924_v63 = vld [vmem:[#allocation2 + $0x300] sm:$0xff]  ;;  %v4934_v53 = vld [vmem:[#allocation2 + $0x468] sm:$0xff] }
 0x24d   :  { %4287 = vmatmul.mubr.f32.gmra.mxu1 %v4912_v3  ;;  %v4702_v32 = vcombine.low %v4617_v33, %v4627_v21  ;;  %v4649_v4 = vadd.f32 %v4648_v13, %v4556_v61  ;;  %v3414_v11 = vpop.f32.mrf.mxu0  ;;  %v4553_v38 = vmul.f32 %v3558_v17, %v8232_v26  ;;  %v3575_v26 = vpop.f32.mrf.mxu1  ;;  %v4921_v21 = vld [vmem:[#allocation2 + $0x2a8] sm:$0xff]  ;;  %v4925_v1 = vld [vmem:[#allocation2 + $0x360] sm:$0xff]  ;;  %v4930_v44 = vld [vmem:[#allocation2 + $0x3b0] sm:$0xff] }
 0x24e   :  { %4292 = vmatprep.mubr.f32.mxu1 %v4913_v7  ;;  %v3568_v22 = vadd.f32 %v3567_v51, %v3413_v49  ;;  %v3415_v47 = vadd.f32 %v3414_v11, %v3260_v14  ;;  %v4549_v51 = vmul.f32 %v3552_v23, %v8195_v46  ;;  %v4557_v3 = vmul.f32 %v3564_v59, %v8241_v41  ;;  %v4922_v7 = vld [vmem:[#allocation2 + $0x308] sm:$0xff] }
 0x24f   :  { %4761 = vmatmul.mubr.msk.f32.gmra.mxu0 %vm2602_vm0, %v4914_v15  ;;  %v4706_v18 = vrot.slane %v4702_v32, 7  ;;  %v3418_v20 = vpop.f32.mrf.mxu0  ;;  %v4926_v15 = vld [vmem:[#allocation2 + $0x310] sm:$0xff]  ;;  %v4927_v32 = vld [vmem:[#allocation2 + $0x358] sm:$0xff] }
 0x250   :  { %4447 = vmatprep.mubr.f32.mxu0 %v9231_v52  ;;  %v4560_v13 = vmul.f32 %v3568_v22, %v9225_v25  ;;  %v3570_v19 = vadd.f32 %v3569_v9, %v3415_v47  ;;  %v3419_v33 = vadd.f32 %v3418_v20, %v3264_v36  ;;  %v4658_v39 = vadd.f32 %v4553_v38, %v4549_v51  ;;  %v3644_v60 = vpop.f32.mrf.mxu1  ;;  %v4935_v36 = vld [vmem:[#allocation2 + $0x418] sm:$0xff] }
 0x251   :  { %4293 = vmatmul.mubr.f32.gmra.mxu1 %v4915_v28  ;;  %v4708_v58 = vsel %vm4707_vm6, %v4706_v18, %v4700_v31  ;;  %v3420_v25 = vpop.f32.mrf.mxu0  ;;  %v4928_v28 = vld [vmem:[#allocation2 + $0x3b8] sm:$0xff]  ;;  %v4929_v31 = vld [vmem:[#allocation2 + $0x368] sm:$0xff] }
 0x252   :  { %4298 = vmatprep.mubr.f32.mxu1 %v4916_v8  ;;  %v8410_v40 = vsel %vm4709_vm7, %v4706_v18, %v4708_v58  ;;  %v4650_v45 = vadd.f32 %v4649_v4, %v4560_v13  ;;  %v4561_v35 = vmul.f32 %v3570_v19, %v8272_v10  ;;  %v3574_v34 = vadd.f32 %v3573_v27, %v3419_v33  ;;  %v3646_v9 = vpop.f32.mrf.mxu1  ;;  %v4931_v4 = vld [vmem:[#allocation2 + $0x410] sm:$0xff] }
 0x253   :  { %4762 = vmatmul.mubr.msk.f32.gmra.mxu0 %vm2602_vm0, %v4917_v62  ;;  %v3421_v29 = vadd.f32 %v3420_v25, %v3266_v48  ;;  %v4659_v46 = vadd.f32 %v4658_v39, %v4557_v3  ;;  %v4932_v62 = vld [vmem:[#allocation2 + $0x3c0] sm:$0xff] }
 0x254   :  { %4453 = vmatprep.mubr.f32.mxu0 %v9231_v52  ;;  %v4564_v41 = vmul.f32 %v3574_v34, %v9232_v0  ;;  %v4936_v48 = vld [vmem:[#allocation2 + $0x460] sm:$0xff] }
 0x255   :  { %4299 = vmatmul.mubr.f32.gmra.mxu1 %v4918_v12  ;;  %v3576_v55 = vadd.f32 %v3575_v26, %v3421_v29  ;;  %v4660_v5 = vadd.f32 %v4659_v46, %v4561_v35  ;;  %v4933_v12 = vld [vmem:[#allocation2 + $0x408] sm:$0xff]  ;;  %v4938_v26 = vld [vmem:[#allocation2 + $0x470] sm:$0xff]  ;;  %v4939_v35 = vld [vmem:[#allocation2 + $0x4b8] sm:$0xff] }
 0x256   :  { %4304 = vmatprep.mubr.f32.mxu1 %v4919_v6  ;;  %v4651_v54 = vadd.f32 %v4650_v45, %v4564_v41  ;;  %v4937_v45 = vld [vmem:[#allocation2 + $0x4c0] sm:$0xff]  ;;  %v4940_v29 = vld [vmem:[#allocation2 + $0x518] sm:$0xff]  ;;  %v4941_v46 = vld [vmem:[#allocation2 + $0x4c8] sm:$0xff] }
 0x257   :  { %4763 = vmatmul.mubr.msk.f32.gmra.mxu0 %vm2602_vm0, %v4920_v24  ;;  %v4565_v10 = vmul.f32 %v3576_v55, %v8297_v42  ;;  %v3799_v0 = vpop.f32.mrf.mxu0 }
 0x258   :  { %4459 = vmatprep.mubr.f32.mxu0 %v9231_v52  ;;  %v4652_v30 = vrot.slane %v4651_v54, 4  ;;  %v8427_v57 = vadd.f32 %v3799_v0, %v3644_v60 }
 0x259   :  { %4305 = vmatmul.mubr.f32.gmra.mxu1 %v4921_v21  ;;  %v4661_v16 = vadd.f32 %v4660_v5, %v4565_v10  ;;  %v3650_v14 = vpop.f32.mrf.mxu1  ;;  %v3801_v42 = vpop.f32.mrf.mxu0 }
 0x25a   :  { %4310 = vmatprep.mubr.f32.mxu1 %v4922_v7  ;;  %v4653_v61 = vadd.f32 %v4652_v30, %v4651_v54  ;;  %v8430_v18 = vadd.f32 %v3801_v42, %v3646_v9  ;;  %v4943_v54 = vld [vmem:[#allocation2 + $0x520] sm:$0xff] }
 0x25b   :  { %4764 = vmatmul.mubr.msk.f32.gmra.mxu0 %vm2602_vm0, %v4923_v43  ;;  %v4662_v37 = vrot.slane %v4661_v16, 4  ;;  %v3652_v56 = vpop.f32.mrf.mxu1 }
 0x25c   :  { %4465 = vmatprep.mubr.f32.mxu0 %v9231_v52  ;;  %v4654_v17 = vrot.slane %v4653_v61, 2 }
 0x25d   :  { %4311 = vmatmul.mubr.f32.gmra.mxu1 %v4924_v63  ;;  %v4663_v49 = vadd.f32 %v4662_v37, %v4661_v16  ;;  %v3805_v11 = vpop.f32.mrf.mxu0  ;;  %v4942_v63 = vld [vmem:[#allocation2 + $0x510] sm:$0xff] }
 0x25e   :  { %4316 = vmatprep.mubr.f32.mxu1 %v4925_v1  ;;  %v4655_v8 = vadd.f32 %v4654_v17, %v4653_v61  ;;  %v8434_v47 = vadd.f32 %v3805_v11, %v3650_v14 }
 0x25f   :  { %4765 = vmatmul.mubr.msk.f32.gmra.mxu0 %vm2602_vm0, %v4926_v15  ;;  %v4664_v23 = vrot.slane %v4663_v49, 2  ;;  %v3656_v27 = vpop.f32.mrf.mxu1  ;;  %v3807_v58 = vpop.f32.mrf.mxu0 }
 0x260   :  { %4471 = vmatprep.mubr.f32.mxu0 %v9231_v52  ;;  %v4656_v59 = vrot.slane %v4655_v8, 1  ;;  %v8437_v13 = vadd.f32 %v3807_v58, %v3652_v56 }
 0x261   :  { %4317 = vmatmul.mubr.f32.gmra.mxu1 %v4927_v32  ;;  %v4665_v22 = vadd.f32 %v4664_v23, %v4663_v49  ;;  %v3658_v19 = vpop.f32.mrf.mxu1 }
 0x262   :  { %4322 = vmatprep.mubr.f32.mxu1 %v4928_v28  ;;  %v4657_v6 = vadd.f32 %v4656_v59, %v4655_v8 }
 0x263   :  { %4766 = vmatmul.mubr.msk.f32.gmra.mxu0 %vm2602_vm0, %v4929_v31  ;;  %v4666_v38 = vrot.slane %v4665_v22, 1  ;;  %v3811_v2 = vpop.f32.mrf.mxu0 }
 0x264   :  { %4477 = vmatprep.mubr.f32.mxu0 %v9231_v52  ;;  %v8441_v24 = vadd.f32 %v3811_v2, %v3656_v27 }
 0x265   :  { %4323 = vmatmul.mubr.f32.gmra.mxu1 %v4930_v44  ;;  %v4667_v20 = vadd.f32 %v4666_v38, %v4665_v22  ;;  %v3662_v51 = vpop.f32.mrf.mxu1  ;;  %v3813_v33 = vpop.f32.mrf.mxu0 }
 0x266   :  { %4328 = vmatprep.mubr.f32.mxu1 %v4931_v4  ;;  %v8444_v25 = vadd.f32 %v3813_v33, %v3658_v19 }
 0x267   :  { %4767 = vmatmul.mubr.msk.f32.gmra.mxu0 %vm2602_vm0, %v4932_v62  ;;  %v4704_v3 = vcombine.low %v4657_v6, %v4667_v20  ;;  %v3664_v21 = vpop.f32.mrf.mxu1 }
 0x268   :  { %4483 = vmatprep.mubr.f32.mxu0 %v9231_v52 }
 0x269   :  { %4329 = vmatmul.mubr.f32.gmra.mxu1 %v4933_v12  ;;  %v4711_v39 = vrot.slane %v4704_v3, 6  ;;  %v3817_v7 = vpop.f32.mrf.mxu0 }
 0x26a   :  { %4334 = vmatprep.mubr.f32.mxu1 %v4934_v53  ;;  %v8451_v41 = vadd.f32 %v3817_v7, %v3662_v51 }
 0x26b   :  { %4768 = vmatmul.mubr.msk.f32.gmra.mxu0 %vm2602_vm0, %v4935_v36  ;;  %v4713_v34 = vsel %vm4712_vm8, %v4711_v39, %v8410_v40  ;;  %v3668_v55 = vpop.f32.mrf.mxu1  ;;  %v3819_v60 = vpop.f32.mrf.mxu0 }
 0x26c   :  { %4489 = vmatprep.mubr.f32.mxu0 %v9231_v52  ;;  %v4715_v43 = vsel %vm4714_vm9, %v4711_v39, %v4713_v34  ;;  %v8454_v5 = vadd.f32 %v3819_v60, %v3664_v21 }
 0x26d   :  { %4335 = vmatmul.mubr.f32.gmra.mxu1 %v4936_v48  ;;  %4724 = vst [vmem:[#allocation7] sm:$0x77] %v4715_v43  ;;  %v3670_v40 = vpop.f32.mrf.mxu1 }
 0x26e   :  { %4340 = vmatprep.mubr.f32.mxu1 %v4937_v45 }
 0x26f   :  { %4769 = vmatmul.mubr.msk.f32.gmra.mxu0 %vm2602_vm0, %v4938_v26  ;;  %v3823_v10 = vpop.f32.mrf.mxu0 }
 0x270   :  { %4495 = vmatprep.mubr.f32.mxu0 %v9231_v52  ;;  %v8457_v1 = vadd.f32 %v3823_v10, %v3668_v55 }
 0x271   :  { %4341 = vmatmul.mubr.f32.gmra.mxu1 %v4939_v35  ;;  %v3674_v15 = vpop.f32.mrf.mxu1  ;;  %v3825_v30 = vpop.f32.mrf.mxu0 }
 0x272   :  { %4346 = vmatprep.mubr.f32.mxu1 %v4940_v29  ;;  %v8459_v16 = vadd.f32 %v3825_v30, %v3670_v40 }
 0x273   :  { %4770 = vmatmul.mubr.msk.f32.gmra.mxu0 %vm2602_vm0, %v4941_v46  ;;  %v3676_v9 = vpop.f32.mrf.mxu1 }
 0x274   :  { %4501 = vmatprep.mubr.f32.mxu0 %v9231_v52 }
 0x275   :  { %4347 = vmatmul.mubr.f32.gmra.mxu1 %v4942_v63  ;;  %v3829_v0 = vpop.f32.mrf.mxu0 }
 0x276   :  { %v8461_v32 = vadd.f32 %v3829_v0, %v3674_v15 }
 0x277   :  { %4771 = vmatmul.mubr.msk.f32.gmra.mxu0 %vm2602_vm0, %v4943_v54  ;;  %v3680_v52 = vpop.f32.mrf.mxu1  ;;  %v3831_v61 = vpop.f32.mrf.mxu0 }
 0x278   :  { %v8463_v37 = vadd.f32 %v3831_v61, %v3676_v9 }
 0x279   :  { %v3682_v14 = vpop.f32.mrf.mxu1 }
 0x27b   :  { %v3835_v28 = vpop.f32.mrf.mxu0 }
 0x27c   :  { %v8465_v42 = vadd.f32 %v3835_v28, %v3680_v52 }
 0x27d   :  { %v3686_v31 = vpop.f32.mrf.mxu1  ;;  %v3837_v17 = vpop.f32.mrf.mxu0 }
 0x27e   :  { %v8467_v49 = vadd.f32 %v3837_v17, %v3682_v14 }
 0x27f   :  { %v3688_v56 = vpop.f32.mrf.mxu1 }
 0x281   :  { %v3841_v44 = vpop.f32.mrf.mxu0 }
 0x282   :  { %v8469_v8 = vadd.f32 %v3841_v44, %v3686_v31 }
 0x283   :  { %v3692_v23 = vpop.f32.mrf.mxu1  ;;  %v3843_v4 = vpop.f32.mrf.mxu0 }
 0x284   :  { %v8471_v11 = vadd.f32 %v3843_v4, %v3688_v56 }
 0x285   :  { %v3694_v62 = vpop.f32.mrf.mxu1 }
 0x287   :  { %v3847_v59 = vpop.f32.mrf.mxu0 }
 0x288   :  { %v8473_v22 = vadd.f32 %v3847_v59, %v3692_v23 }
 0x289   :  { %v3698_v27 = vpop.f32.mrf.mxu1  ;;  %v3849_v58 = vpop.f32.mrf.mxu0 }
 0x28a   :  { %v8475_v12 = vadd.f32 %v3849_v58, %v3694_v62 }
 0x28b   :  { %v3700_v38 = vpop.f32.mrf.mxu1 }
 0x28d   :  { %v3853_v19 = vpop.f32.mrf.mxu0 }
 0x28e   :  { %v8477_v53 = vadd.f32 %v3853_v19, %v3698_v27 }
 0x28f   :  { %v3704_v36 = vpop.f32.mrf.mxu1  ;;  %v3855_v6 = vpop.f32.mrf.mxu0 }
 0x290   :  { %v8479_v20 = vadd.f32 %v3855_v6, %v3700_v38 }
 0x291   :  { %v3706_v2 = vpop.f32.mrf.mxu1 }
 0x293   :  { %v3859_v48 = vpop.f32.mrf.mxu0 }
 0x294   :  { %v8481_v51 = vadd.f32 %v3859_v48, %v3704_v36 }
 0x295   :  { %v3710_v3 = vpop.f32.mrf.mxu1  ;;  %v3861_v45 = vpop.f32.mrf.mxu0 }
 0x296   :  { %v8483_v33 = vadd.f32 %v3861_v45, %v3706_v2 }
 0x297   :  { %v3712_v26 = vpop.f32.mrf.mxu1 }
 0x29b   :  { %v3865_v21 = vpop.f32.mrf.mxu0 }
 0x29c   :  { %v8485_v39 = vadd.f32 %v3865_v21, %v3710_v3  ;;  %v3716_v35 = vpop.f32.mrf.mxu1 }
 0x29d   :  { %v3867_v34 = vpop.f32.mrf.mxu0 }
 0x29e   :  { %v8487_v29 = vadd.f32 %v3867_v34, %v3712_v26  ;;  %v3718_v7 = vpop.f32.mrf.mxu1 }
 0x2a1   :  { %v3871_v43 = vpop.f32.mrf.mxu0 }
 0x2a2   :  { %v8489_v46 = vadd.f32 %v3871_v43, %v3716_v35 }
 0x2a3   :  { %v3722_v55 = vpop.f32.mrf.mxu1  ;;  %v3873_v60 = vpop.f32.mrf.mxu0 }
 0x2a4   :  { %v8491_v63 = vadd.f32 %v3873_v60, %v3718_v7 }
 0x2a5   :  { %v3724_v40 = vpop.f32.mrf.mxu1 }
 0x2a8   :  { %v3877_v54 = vpop.f32.mrf.mxu0 }
 0x2a9   :  { %v8493_v10 = vadd.f32 %v3877_v54, %v3722_v55 }
 0x2aa   :  { %v3728_v15 = vpop.f32.mrf.mxu1  ;;  %v3879_v30 = vpop.f32.mrf.mxu0 }
 0x2ab   :  { %v8495_v9 = vadd.f32 %v3879_v30, %v3724_v40 }
 0x2ac   :  { %v3730_v0 = vpop.f32.mrf.mxu1 }
 0x2ad   :  { %9264 = vst [vmem:[#allocation74_spill] sm:$0xff] %v8495_v9  ;;  %v9284_v9 = vld [vmem:[#allocation25_spill] sm:$0xff] }
 0x2af   :  { %v3883_v52 = vpop.f32.mrf.mxu0 }
 0x2b0   :  { %v8497_v61 = vadd.f32 %v3883_v52, %v3728_v15 }
 0x2b1   :  { %v3954_v14 = vpop.f32.mrf.mxu1  ;;  %v3885_v31 = vpop.f32.mrf.mxu0 }
 0x2b2   :  { %9265 = vst [vmem:[#allocation48_spill] sm:$0xff] %v8497_v61  ;;  %v3955_v28 = vadd.f32 %v3954_v14, %v8427_v57  ;;  %v8500_v17 = vadd.f32 %v3885_v31, %v3730_v0 }
 0x2b3   :  { %v3956_v56 = vpop.f32.mrf.mxu1 }
 0x2b4   :  { %9266 = vst [vmem:[#allocation81_spill] sm:$0xff] %v8500_v17  ;;  %v3957_v44 = vadd.f32 %v3956_v56, %v8430_v18 }
 0x2b7   :  { %v3960_v23 = vpop.f32.mrf.mxu1 }
 0x2b8   :  { %v3961_v4 = vadd.f32 %v3960_v23, %v8434_v47 }
 0x2b9   :  { %v3962_v62 = vpop.f32.mrf.mxu1 }
 0x2ba   :  { %v3963_v59 = vadd.f32 %v3962_v62, %v8437_v13 }
 0x2bb   :  { %v4109_v27 = vpop.f32.mrf.mxu0 }
 0x2bc   :  { %v8505_v58 = vadd.f32 %v4109_v27, %v3955_v28 }
 0x2bd   :  { %v3966_v38 = vpop.f32.mrf.mxu1  ;;  %v4111_v36 = vpop.f32.mrf.mxu0 }
 0x2be   :  { %v3967_v19 = vadd.f32 %v3966_v38, %v8441_v24  ;;  %v8508_v57 = vadd.f32 %v4111_v36, %v3957_v44 }
 0x2bf   :  { %v3968_v6 = vpop.f32.mrf.mxu1 }
 0x2c0   :  { %v3969_v2 = vadd.f32 %v3968_v6, %v8444_v25 }
 0x2c1   :  { %v4115_v48 = vpop.f32.mrf.mxu0 }
 0x2c2   :  { %v8511_v18 = vadd.f32 %v4115_v48, %v3961_v4 }
 0x2c3   :  { %v4117_v45 = vpop.f32.mrf.mxu0 }
 0x2c4   :  { %v3972_v3 = vpop.f32.mrf.mxu1  ;;  %v8514_v13 = vadd.f32 %v4117_v45, %v3963_v59 }
 0x2c5   :  { %v3973_v47 = vadd.f32 %v3972_v3, %v8451_v41 }
 0x2c6   :  { %v3974_v26 = vpop.f32.mrf.mxu1 }
 0x2c7   :  { %v3975_v21 = vadd.f32 %v3974_v26, %v8454_v5  ;;  %v4121_v35 = vpop.f32.mrf.mxu0 }
 0x2c8   :  { %v8517_v24 = vadd.f32 %v4121_v35, %v3967_v19  ;;  %v3978_v34 = vpop.f32.mrf.mxu1 }
 0x2c9   :  { %v3979_v7 = vadd.f32 %v3978_v34, %v8457_v1  ;;  %v4123_v43 = vpop.f32.mrf.mxu0 }
 0x2ca   :  { %v8520_v25 = vadd.f32 %v4123_v43, %v3969_v2  ;;  %v3980_v55 = vpop.f32.mrf.mxu1 }
 0x2cb   :  { %v3981_v60 = vadd.f32 %v3980_v55, %v8459_v16  ;;  %v4127_v40 = vpop.f32.mrf.mxu0 }
 0x2cc   :  { %v8523_v41 = vadd.f32 %v4127_v40, %v3973_v47  ;;  %v3984_v54 = vpop.f32.mrf.mxu1 }
 0x2cd   :  { %v3985_v15 = vadd.f32 %v3984_v54, %v8461_v32  ;;  %v4129_v30 = vpop.f32.mrf.mxu0 }
 0x2ce   :  { %v8526_v5 = vadd.f32 %v4129_v30, %v3975_v21  ;;  %v3986_v0 = vpop.f32.mrf.mxu1 }
 0x2cf   :  { %v3987_v52 = vadd.f32 %v3986_v0, %v8463_v37  ;;  %v4133_v14 = vpop.f32.mrf.mxu0 }
 0x2d0   :  { %v8529_v1 = vadd.f32 %v4133_v14, %v3979_v7 }
 0x2d1   :  { %v3990_v28 = vpop.f32.mrf.mxu1  ;;  %v4135_v56 = vpop.f32.mrf.mxu0 }
 0x2d2   :  { %v3991_v31 = vadd.f32 %v3990_v28, %v8465_v42  ;;  %v8532_v16 = vadd.f32 %v4135_v56, %v3981_v60 }
 0x2d3   :  { %v3992_v44 = vpop.f32.mrf.mxu1 }
 0x2d4   :  { %v3993_v23 = vadd.f32 %v3992_v44, %v8467_v49  ;;  %v4139_v4 = vpop.f32.mrf.mxu0 }
 0x2d5   :  { %v8535_v32 = vadd.f32 %v4139_v4, %v3985_v15  ;;  %v3996_v62 = vpop.f32.mrf.mxu1 }
 0x2d6   :  { %v3997_v59 = vadd.f32 %v3996_v62, %v8469_v8  ;;  %v4141_v27 = vpop.f32.mrf.mxu0 }
 0x2d7   :  { %v8538_v37 = vadd.f32 %v4141_v27, %v3987_v52  ;;  %v3998_v38 = vpop.f32.mrf.mxu1  ;;  %v9268_v27 = vld [vmem:[#allocation13_spill] sm:$0xff] }
 0x2d8   :  { %v3999_v19 = vadd.f32 %v3998_v38, %v8471_v11  ;;  %v4145_v36 = vpop.f32.mrf.mxu0 }
 0x2d9   :  { %v8541_v42 = vadd.f32 %v4145_v36, %v3991_v31  ;;  %v4002_v6 = vpop.f32.mrf.mxu1  ;;  %v9269_v36 = vld [vmem:[#allocation17_spill] sm:$0xff] }
 0x2da   :  { %v4003_v2 = vadd.f32 %v4002_v6, %v8473_v22  ;;  %v4147_v48 = vpop.f32.mrf.mxu0 }
 0x2db   :  { %v8544_v49 = vadd.f32 %v4147_v48, %v3993_v23  ;;  %v4004_v3 = vpop.f32.mrf.mxu1 }
 0x2dc   :  { %v4005_v47 = vadd.f32 %v4004_v3, %v8475_v12  ;;  %v4151_v45 = vpop.f32.mrf.mxu0 }
 0x2dd   :  { %v8547_v8 = vadd.f32 %v4151_v45, %v3997_v59  ;;  %v9272_v45 = vld [vmem:[#allocation20_spill] sm:$0xff] }
 0x2de   :  { %v4008_v26 = vpop.f32.mrf.mxu1  ;;  %v4153_v35 = vpop.f32.mrf.mxu0 }
 0x2df   :  { %v4009_v21 = vadd.f32 %v4008_v26, %v8477_v53  ;;  %v8550_v11 = vadd.f32 %v4153_v35, %v3999_v19 }
 0x2e0   :  { %v4010_v34 = vpop.f32.mrf.mxu1 }
 0x2e1   :  { %v4011_v7 = vadd.f32 %v4010_v34, %v8479_v20  ;;  %v4157_v43 = vpop.f32.mrf.mxu0  ;;  %v9273_v34 = vld [vmem:[#allocation15_spill] sm:$0xff] }
 0x2e2   :  { %v8553_v22 = vadd.f32 %v4157_v43, %v4003_v2  ;;  %v4014_v55 = vpop.f32.mrf.mxu1  ;;  %v9270_v2 = vld [vmem:[#allocation11_spill] sm:$0xff] }
 0x2e3   :  { %v4015_v60 = vadd.f32 %v4014_v55, %v8481_v51  ;;  %v4159_v40 = vpop.f32.mrf.mxu0  ;;  %v572_v48 = vrot.slane %v9268_v27, %v9270_v2 }
 0x2e4   :  { %v8556_v12 = vadd.f32 %v4159_v40, %v4005_v47  ;;  %v4016_v54 = vpop.f32.mrf.mxu1 }
 0x2e5   :  { %v4017_v15 = vadd.f32 %v4016_v54, %v8483_v33  ;;  %v4163_v30 = vpop.f32.mrf.mxu0  ;;  %v740_v54 = vrot.slane %v9273_v34, %v9270_v2 }
 0x2e6   :  { %v8559_v53 = vadd.f32 %v4163_v30, %v4009_v21  ;;  %v684_v21 = vrot.slane %v9269_v36, %v9270_v2 }
 0x2e7   :  { %v4020_v0 = vpop.f32.mrf.mxu1  ;;  %v4165_v14 = vpop.f32.mrf.mxu0 }
 0x2e8   :  { %v4021_v52 = vadd.f32 %v4020_v0, %v8485_v39  ;;  %v8562_v20 = vadd.f32 %v4165_v14, %v4011_v7  ;;  %v9267_v39 = vld [vmem:[#allocation52_spill] sm:$0xff] }
 0x2e9   :  { %v8564_v28 = vpop.f32.mrf.mxu1  ;;  %v568_v38 = vrot.slane %v9268_v27, %v9267_v39  ;;  %v680_v6 = vrot.slane %v9269_v36, %v9267_v39  ;;  %v624_v26 = vrot.slane %v9272_v45, %v9267_v39  ;;  %v736_v7 = vrot.slane %v9273_v34, %v9267_v39  ;;  %v9277_v14 = vld [vmem:[#allocation24_spill] sm:$0xff] }
 0x2ea   :  { %v4169_v31 = vpop.f32.mrf.mxu0  ;;  %v8607_v40 = vrot.slane %v572_v48, %v9267_v39  ;;  %v8636_v27 = vrot.slane %v740_v54, %v9267_v39 }
 0x2eb   :  { %v8566_v56 = vadd.f32 %v4169_v31, %v4015_v60  ;;  %v8595_v35 = vrot.slane %v568_v38, %v9267_v39  ;;  %v8602_v55 = vrot.slane %v680_v6, %v9267_v39  ;;  %v628_v60 = vrot.slane %v9272_v45, %v9270_v2  ;;  %v9281_v2 = vld [vmem:[#allocation18_spill] sm:$0xff] }
 0x2ec   :  { %v8568_v51 = vpop.f32.mrf.mxu1  ;;  %v4171_v44 = vpop.f32.mrf.mxu0  ;;  %v8616_v0 = vrot.slane %v624_v26, %v9267_v39  ;;  %v8624_v31 = vrot.slane %v736_v7, %v9267_v39  ;;  %vm596_vm11 = vcmp.eq.f32.partialorder %v9277_v14, %v8607_v40  ;;  %vm600_vm15 = vcmp.eq.f32.partialorder %v9281_v2, %v8607_v40 }
 0x2ed   :  { %v8570_v23 = vadd.f32 %v4171_v44, %v4017_v15  ;;  %vm595_vm0 = vcmp.eq.f32.partialorder %v9277_v14, %v8595_v35  ;;  %vm707_vm10 = vcmp.eq.f32.partialorder %v9277_v14, %v8602_v55  ;;  %vm599_vm13 = vcmp.eq.f32.partialorder %v9281_v2, %v8595_v35 }
 0x2ee   :  { %v8572_v33 = vpop.f32.mrf.mxu1  ;;  %v651_v6 = vsel %vm595_vm0, %v8616_v0, 0.0  ;;  %vm711_vm14 = vcmp.eq.f32.partialorder %v9281_v2, %v8602_v55  ;;  %v763_v48 = vsel %vm707_vm10, %v8624_v31, 0.0  ;;  %vm607_vm0 = vcmp.eq.f32.partialorder %v9284_v9, %v8595_v35 }
 0x2ef   :  { %v4175_v4 = vpop.f32.mrf.mxu0  ;;  %v767_v54 = vsel %vm711_vm14, %v8624_v31, 0.0  ;;  %vm719_vm10 = vcmp.eq.f32.partialorder %v9284_v9, %v8602_v55  ;;  %vm723_vm14 = vcmp.eq.f32.partialorder %v9163_v50, %v8602_v55 }
 0x2f0   :  { %v8574_v62 = vadd.f32 %v4175_v4, %v4021_v52  ;;  %v8576_v59 = vpop.f32.mrf.mxu1  ;;  %v8619_v52 = vrot.slane %v684_v21, %v9267_v39  ;;  %v8631_v4 = vrot.slane %v628_v60, %v9267_v39  ;;  %v9282_v39 = vld [vmem:[#allocation23_spill] sm:$0xff]  ;;  %v655_v60 = vsel %vm599_vm13, %v8616_v0, 0.0 }
 0x2f1   :  { %v8580_v19 = vpop.f32.mrf.mxu0  ;;  %vm603_vm1 = vcmp.eq.f32.partialorder %v9282_v39, %v8595_v35  ;;  %vm715_vm3 = vcmp.eq.f32.partialorder %v9282_v39, %v8602_v55  ;;  %vm604_vm4 = vcmp.eq.f32.partialorder %v9282_v39, %v8607_v40  ;;  %vm611_vm13 = vcmp.eq.f32.partialorder %v9163_v50, %v8595_v35 }
 0x2f2   :  { %v8586_v3 = vpop.f32.mrf.mxu1  ;;  %vm708_vm12 = vcmp.eq.f32.partialorder %v9277_v14, %v8619_v52  ;;  %vm712_vm2 = vcmp.eq.f32.partialorder %v9281_v2, %v8619_v52  ;;  %v652_v21 = vsel %vm596_vm11, %v8631_v4, 0.0  ;;  %vm716_vm5 = vcmp.eq.f32.partialorder %v9282_v39, %v8619_v52 }
 0x2f3   :  { %9271 = vst [vmem:[#allocation61_spill] sm:$0xff] %v8586_v3  ;;  %v8588_v47 = vpop.f32.mrf.mxu0  ;;  %v764_v7 = vsel %vm708_vm12, %v8636_v27, 0.0  ;;  %v771_v39 = vsel %vm715_vm3, %v8624_v31, 0.0  ;;  %v8680_v3 = vadd.f32 %v767_v54, %v655_v60  ;;  %vm608_vm11 = vcmp.eq.f32.partialorder %v9284_v9, %v8607_v40 }
 0x2f4   :  { %v8611_v15 = vpop.f32.mrf.mxu1  ;;  %vm720_vm12 = vcmp.eq.f32.partialorder %v9284_v9, %v8619_v52 }
 0x2f5   :  { %v8599_v43 = vpop.f32.mrf.mxu0  ;;  %9275 = vst [vmem:[#allocation71_spill] sm:$0xff] %v8611_v15  ;;  %v8678_v15 = vadd.f32 %v764_v7, %v652_v21 }
 0x2f6   :  { %9274 = vst [vmem:[#allocation36_spill] sm:$0xff] %v8599_v43  ;;  %v8638_v38 = vpop.f32.mrf.mxu1 }
 0x2f7   :  { %v8613_v30 = vpop.f32.mrf.mxu0  ;;  %9279 = vst [vmem:[#allocation14_spill] sm:$0xff] %v8638_v38  ;;  %v659_v38 = vsel %vm603_vm1, %v8616_v0, 0.0 }
 0x2f8   :  { %9276 = vst [vmem:[#allocation85_spill] sm:$0xff] %v8613_v30  ;;  %v8691_v7 = vadd.f32 %v771_v39, %v659_v38 }
 0x2f9   :  { %v8626_v44 = vpop.f32.mrf.mxu0 }
 0x2fa   :  { %9278 = vst [vmem:[#allocation63_spill] sm:$0xff] %v8626_v44  ;;  %v8676_v44 = vadd.f32 %v763_v48, %v651_v6 }
 0x2fb   :  { %v8640_v36 = vpop.f32.mrf.mxu0 }
 0x2fc   :  { %9280 = vst [vmem:[#allocation42_spill] sm:$0xff] %v8640_v36  ;;  %v768_v36 = vsel %vm712_vm2, %v8636_v27, 0.0  ;;  %vm724_vm2 = vcmp.eq.f32.partialorder %v9163_v50, %v8619_v52 }
 0x2fd   :  { %v4264_v45 = vpop.f32.mrf.mxu1  ;;  %v8656_v26 = vpop.f32.mrf.mxu0  ;;  %v780_v55 = vsel %vm724_vm2, %v8636_v27, 0.0 }
 0x2fe   :  { %9283 = vst [vmem:[#allocation90_spill] sm:$0xff] %v8656_v26  ;;  %v4265_v34 = vadd.f32 %v4264_v45, %v8505_v58  ;;  %v656_v26 = vsel %vm600_vm15, %v8631_v4, 0.0  ;;  %v660_v58 = vsel %vm604_vm4, %v8631_v4, 0.0  ;;  %v772_v45 = vsel %vm716_vm5, %v8636_v27, 0.0 }
 0x2ff   :  { %v4266_v14 = vpop.f32.mrf.mxu1  ;;  %v4419_v2 = vpop.f32.mrf.mxu0  ;;  %v8689_v21 = vadd.f32 %v768_v36, %v656_v26  ;;  %v8693_v60 = vadd.f32 %v772_v45, %v660_v58  ;;  %v776_v45 = vsel %vm720_vm12, %v8636_v27, 0.0  ;;  %vm612_vm15 = vcmp.eq.f32.partialorder %v9163_v50, %v8607_v40 }
 0x300   :  { %v4267_v17 = vadd.f32 %v4266_v14, %v8508_v57  ;;  %v4420_v43 = vadd.f32 %v4419_v2, %v4265_v34  ;;  %v668_v35 = vsel %vm612_vm15, %v8631_v4, 0.0 }
 0x301   :  { %v4270_v30 = vpop.f32.mrf.mxu1  ;;  %v4421_v61 = vpop.f32.mrf.mxu0  ;;  %v8744_v50 = vadd.f32 %v780_v55, %v668_v35 }
 0x302   :  { %v4271_v57 = vadd.f32 %v4270_v30, %v8511_v18  ;;  %v4422_v6 = vadd.f32 %v4421_v61, %v4267_v17  ;;  %v663_v18 = vsel %vm607_vm0, %v8616_v0, 0.0  ;;  %v775_v61 = vsel %vm719_vm10, %v8624_v31, 0.0 }
 0x303   :  { %v4272_v48 = vpop.f32.mrf.mxu1  ;;  %v4425_v14 = vpop.f32.mrf.mxu0  ;;  %v664_v17 = vsel %vm608_vm11, %v8631_v4, 0.0 }
 0x304   :  { %v4273_v54 = vadd.f32 %v4272_v48, %v8514_v13  ;;  %v4426_v34 = vadd.f32 %v4425_v14, %v4271_v57  ;;  %v4510_v13 = vmul.f32 %v4420_v43, %v8676_v44  ;;  %v4511_v9 = vmul.f32 %v4422_v6, %v8678_v15 }
 0x305   :  { %v4276_v30 = vpop.f32.mrf.mxu1  ;;  %v4427_v2 = vpop.f32.mrf.mxu0  ;;  %v667_v6 = vsel %vm611_vm13, %v8616_v0, 0.0 }
 0x306   :  { %v4514_v38 = vmul.f32 %v4426_v34, %v8680_v3  ;;  %v4277_v36 = vadd.f32 %v4276_v30, %v8517_v24  ;;  %v4428_v26 = vadd.f32 %v4427_v2, %v4273_v54  ;;  %v8716_v34 = vadd.f32 %v775_v61, %v663_v18 }
 0x307   :  { %v4278_v39 = vpop.f32.mrf.mxu1  ;;  %v4431_v58 = vpop.f32.mrf.mxu0  ;;  %v779_v30 = vsel %vm723_vm14, %v8624_v31, 0.0  ;;  %v8728_v18 = vadd.f32 %v776_v45, %v664_v17 }
 0x308   :  { %v4588_v57 = vadd.f32 %v4514_v38, %v4510_v13  ;;  %v4515_v43 = vmul.f32 %v4428_v26, %v8689_v21  ;;  %v4279_v48 = vadd.f32 %v4278_v39, %v8520_v25  ;;  %v4432_v14 = vadd.f32 %v4431_v58, %v4277_v36 }
 0x309   :  { %v4282_v24 = vpop.f32.mrf.mxu1  ;;  %v4433_v54 = vpop.f32.mrf.mxu0  ;;  %v8740_v17 = vadd.f32 %v779_v30, %v667_v6 }
 0x30a   :  { %v4598_v2 = vadd.f32 %v4515_v43, %v4511_v9  ;;  %v4518_v13 = vmul.f32 %v4432_v14, %v8691_v7  ;;  %v4283_v25 = vadd.f32 %v4282_v24, %v8523_v41  ;;  %v4434_v38 = vadd.f32 %v4433_v54, %v4279_v48 }
 0x30b   :  { %v4284_v36 = vpop.f32.mrf.mxu1  ;;  %v4437_v26 = vpop.f32.mrf.mxu0 }
 0x30c   :  { %v4589_v0 = vadd.f32 %v4588_v57, %v4518_v13  ;;  %v4519_v31 = vmul.f32 %v4434_v38, %v8693_v60  ;;  %v4285_v41 = vadd.f32 %v4284_v36, %v8526_v5  ;;  %v4438_v61 = vadd.f32 %v4437_v26, %v4283_v25 }
 0x30d   :  { %v4288_v9 = vpop.f32.mrf.mxu1  ;;  %v4439_v39 = vpop.f32.mrf.mxu0 }
 0x30e   :  { %v4599_v58 = vadd.f32 %v4598_v2, %v4519_v31  ;;  %v4522_v45 = vmul.f32 %v4438_v61, %v8716_v34  ;;  %v4289_v40 = vadd.f32 %v4288_v9, %v8529_v1  ;;  %v4440_v4 = vadd.f32 %v4439_v39, %v4285_v41 }
 0x30f   :  { %v4290_v43 = vpop.f32.mrf.mxu1  ;;  %v4443_v48 = vpop.f32.mrf.mxu0 }
 0x310   :  { %v4590_v52 = vadd.f32 %v4589_v0, %v4522_v45  ;;  %v4523_v27 = vmul.f32 %v4440_v4, %v8728_v18  ;;  %v4291_v5 = vadd.f32 %v4290_v43, %v8532_v16  ;;  %v4444_v57 = vadd.f32 %v4443_v48, %v4289_v40 }
 0x311   :  { %v4294_v14 = vpop.f32.mrf.mxu1  ;;  %v4445_v24 = vpop.f32.mrf.mxu0 }
 0x312   :  { %v4600_v54 = vadd.f32 %v4599_v58, %v4523_v27  ;;  %v4526_v6 = vmul.f32 %v4444_v57, %v8740_v17  ;;  %v4295_v30 = vadd.f32 %v4294_v14, %v8535_v32  ;;  %v4446_v2 = vadd.f32 %v4445_v24, %v4291_v5 }
 0x313   :  { %v4296_v1 = vpop.f32.mrf.mxu1  ;;  %v4449_v13 = vpop.f32.mrf.mxu0 }
 0x314   :  { %v4591_v25 = vadd.f32 %v4590_v52, %v4526_v6  ;;  %v4527_v38 = vmul.f32 %v4446_v2, %v8744_v50  ;;  %v4297_v36 = vadd.f32 %v4296_v1, %v8538_v37  ;;  %v4450_v26 = vadd.f32 %v4449_v13, %v4295_v30 }
 0x315   :  { %v4300_v35 = vpop.f32.mrf.mxu1  ;;  %v4451_v55 = vpop.f32.mrf.mxu0 }
 0x316   :  { %v4592_v16 = vrot.slane %v4591_v25, 4  ;;  %v4601_v0 = vadd.f32 %v4600_v54, %v4527_v38  ;;  %v4301_v31 = vadd.f32 %v4300_v35, %v8541_v42  ;;  %v4530_v45 = vmul.f32 %v4450_v26, %v8676_v44 }
 0x317   :  { %v4302_v41 = vpop.f32.mrf.mxu1  ;;  %v4455_v61 = vpop.f32.mrf.mxu0  ;;  %v4452_v40 = vadd.f32 %v4451_v55, %v4297_v36 }
 0x318   :  { %v4593_v9 = vadd.f32 %v4592_v16, %v4591_v25  ;;  %v4602_v39 = vrot.slane %v4601_v0, 4  ;;  %v4303_v32 = vadd.f32 %v4302_v41, %v8544_v49  ;;  %v4456_v58 = vadd.f32 %v4455_v61, %v4301_v31 }
 0x319   :  { %v4306_v4 = vpop.f32.mrf.mxu1  ;;  %v4457_v43 = vpop.f32.mrf.mxu0  ;;  %v4531_v6 = vmul.f32 %v4452_v40, %v8678_v15 }
 0x31a   :  { %v4594_v37 = vrot.slane %v4593_v9, 2  ;;  %v4603_v48 = vadd.f32 %v4602_v39, %v4601_v0  ;;  %v4534_v52 = vmul.f32 %v4456_v58, %v8680_v3  ;;  %v4307_v27 = vadd.f32 %v4306_v4, %v8547_v8 }
 0x31b   :  { %v4458_v5 = vadd.f32 %v4457_v43, %v4303_v32  ;;  %v4308_v42 = vpop.f32.mrf.mxu1  ;;  %v4461_v57 = vpop.f32.mrf.mxu0 }
 0x31c   :  { %v4595_v14 = vadd.f32 %v4594_v37, %v4593_v9  ;;  %v4604_v24 = vrot.slane %v4603_v48, 2  ;;  %v4628_v54 = vadd.f32 %v4534_v52, %v4530_v45  ;;  %v4309_v49 = vadd.f32 %v4308_v42, %v8550_v11 }
 0x31d   :  { %v4535_v30 = vmul.f32 %v4458_v5, %v8689_v21  ;;  %v4462_v2 = vadd.f32 %v4461_v57, %v4307_v27  ;;  %v4312_v1 = vpop.f32.mrf.mxu1  ;;  %v4463_v13 = vpop.f32.mrf.mxu0 }
 0x31e   :  { %v4596_v25 = vrot.slane %v4595_v14, 1  ;;  %v4605_v38 = vadd.f32 %v4604_v24, %v4603_v48  ;;  %v4313_v36 = vadd.f32 %v4312_v1, %v8553_v22  ;;  %v4464_v8 = vadd.f32 %v4463_v13, %v4309_v49 }
 0x31f   :  { %v4638_v26 = vadd.f32 %v4535_v30, %v4531_v6  ;;  %v4538_v35 = vmul.f32 %v4462_v2, %v8691_v7  ;;  %v4314_v55 = vpop.f32.mrf.mxu1  ;;  %v4467_v16 = vpop.f32.mrf.mxu0  ;;  %v4023_v30 = vadd.f32 %v8564_v28, %v8487_v29  ;;  %v4029_v29 = vadd.f32 %v8572_v33, %v8491_v63 }
 0x320   :  { %v4606_v0 = vrot.slane %v4605_v38, 1  ;;  %v4539_v11 = vmul.f32 %v4464_v8, %v8693_v60  ;;  %v4315_v31 = vadd.f32 %v4314_v55, %v8556_v12  ;;  %v8764_v41 = vadd.f32 %v4596_v25, %v4595_v14 }
 0x321   :  { %v4629_v61 = vadd.f32 %v4628_v54, %v4538_v35  ;;  %v4468_v9 = vadd.f32 %v4467_v16, %v4313_v36  ;;  %v4318_v39 = vpop.f32.mrf.mxu1  ;;  %v4469_v32 = vpop.f32.mrf.mxu0  ;;  %v4178_v8 = vadd.f32 %v8580_v19, %v4023_v30 }
 0x322   :  { %v8766_v58 = vadd.f32 %v4606_v0, %v4605_v38  ;;  %v4639_v22 = vadd.f32 %v4638_v26, %v4539_v11  ;;  %v4319_v45 = vadd.f32 %v4318_v39, %v8559_v53  ;;  %v4470_v40 = vadd.f32 %v4469_v32, %v4315_v31  ;;  %v9285_v31 = vld [vmem:[#allocation36_spill] sm:$0xff] }
 0x323   :  { %v4542_v4 = vmul.f32 %v4468_v9, %v8716_v34  ;;  %v4320_v43 = vpop.f32.mrf.mxu1  ;;  %v4473_v37 = vpop.f32.mrf.mxu0  ;;  %v4033_v11 = vadd.f32 %v8576_v59, %v8493_v10  ;;  %v4184_v19 = vadd.f32 %v9285_v31, %v4029_v29 }
 0x324   :  { %v4701_v48 = vcombine.low %v8764_v41, %v8766_v58  ;;  %v4543_v12 = vmul.f32 %v4470_v40, %v8728_v18  ;;  %v4321_v52 = vadd.f32 %v4320_v43, %v8562_v20  ;;  %v4474_v27 = vadd.f32 %v4473_v37, %v4319_v45  ;;  %v9287_v45 = vld [vmem:[#allocation61_spill] sm:$0xff]  ;;  %v9289_v43 = vld [vmem:[#allocation71_spill] sm:$0xff] }
 0x325   :  { %v4630_v5 = vadd.f32 %v4629_v61, %v4542_v4  ;;  %v4324_v42 = vpop.f32.mrf.mxu1  ;;  %v4475_v57 = vpop.f32.mrf.mxu0  ;;  %v4027_v20 = vadd.f32 %v8568_v51, %v8489_v46  ;;  %v9288_v4 = vld [vmem:[#allocation48_spill] sm:$0xff] }
 0x326   :  { %v4640_v14 = vadd.f32 %v4639_v22, %v4543_v12  ;;  %v4546_v24 = vmul.f32 %v4474_v27, %v8740_v17  ;;  %v4325_v53 = vadd.f32 %v4324_v42, %v8566_v56  ;;  %v4476_v54 = vadd.f32 %v4475_v57, %v4321_v52  ;;  %v9286_v22 = vld [vmem:[#allocation74_spill] sm:$0xff]  ;;  %v9290_v12 = vld [vmem:[#allocation85_spill] sm:$0xff] }
 0x327   :  { %v4326_v49 = vpop.f32.mrf.mxu1  ;;  %v4479_v6 = vpop.f32.mrf.mxu0  ;;  %v4182_v28 = vadd.f32 %v8588_v47, %v4027_v20  ;;  %v4035_v40 = vadd.f32 %v9287_v45, %v9286_v22  ;;  %v4039_v37 = vadd.f32 %v9289_v43, %v9288_v4  ;;  %v4188_v10 = vadd.f32 %v9290_v12, %v4033_v11 }
 0x328   :  { %v4631_v2 = vadd.f32 %v4630_v5, %v4546_v24  ;;  %v4547_v1 = vmul.f32 %v4476_v54, %v8744_v50  ;;  %v4327_v13 = vadd.f32 %v4326_v49, %v8570_v23  ;;  %v4480_v25 = vadd.f32 %v4479_v6, %v4325_v53 }
 0x329   :  { %v4330_v38 = vpop.f32.mrf.mxu1  ;;  %v4481_v36 = vpop.f32.mrf.mxu0 }
 0x32a   :  { %v4632_v56 = vrot.slane %v4631_v2, 4  ;;  %v4641_v26 = vadd.f32 %v4640_v14, %v4547_v1  ;;  %v4331_v35 = vadd.f32 %v4330_v38, %v8574_v62  ;;  %v4550_v61 = vmul.f32 %v4480_v25, %v8676_v44  ;;  %v9291_v14 = vld [vmem:[#allocation63_spill] sm:$0xff]  ;;  %v9293_v25 = vld [vmem:[#allocation14_spill] sm:$0xff] }
 0x32b   :  { %v4332_v55 = vpop.f32.mrf.mxu1  ;;  %v4485_v16 = vpop.f32.mrf.mxu0  ;;  %v4482_v9 = vadd.f32 %v4481_v36, %v4327_v13  ;;  %v4190_v24 = vadd.f32 %v9291_v14, %v4035_v40  ;;  %v9292_v13 = vld [vmem:[#allocation81_spill] sm:$0xff] }
 0x32c   :  { %v4633_v0 = vadd.f32 %v4632_v56, %v4631_v2  ;;  %v4642_v46 = vrot.slane %v4641_v26, 4  ;;  %v4333_v51 = vadd.f32 %v4332_v55, %v4178_v8  ;;  %v4486_v23 = vadd.f32 %v4485_v16, %v4331_v35  ;;  %v9294_v35 = vld [vmem:[#allocation42_spill] sm:$0xff] }
 0x32d   :  { %v4336_v62 = vpop.f32.mrf.mxu1  ;;  %v4487_v39 = vpop.f32.mrf.mxu0  ;;  %v4041_v38 = vadd.f32 %v9293_v25, %v9292_v13  ;;  %v4194_v29 = vadd.f32 %v9294_v35, %v4039_v37  ;;  %v9295_v55 = vld [vmem:[#allocation90_spill] sm:$0xff] }
 0x32e   :  { %v4634_v32 = vrot.slane %v4633_v0, 2  ;;  %v4643_v63 = vadd.f32 %v4642_v46, %v4641_v26  ;;  %v4554_v33 = vmul.f32 %v4486_v23, %v8680_v3  ;;  %v4337_v47 = vadd.f32 %v4336_v62, %v4182_v28 }
 0x32f   :  { %v4488_v59 = vadd.f32 %v4487_v39, %v4333_v51  ;;  %v4338_v52 = vpop.f32.mrf.mxu1  ;;  %v4491_v27 = vpop.f32.mrf.mxu0  ;;  %v4551_v3 = vmul.f32 %v4482_v9, %v8678_v15  ;;  %v4196_v16 = vadd.f32 %v9295_v55, %v4041_v38 }
 0x330   :  { %v4635_v44 = vadd.f32 %v4634_v32, %v4633_v0  ;;  %v4644_v5 = vrot.slane %v4643_v63, 2  ;;  %v4668_v42 = vadd.f32 %v4554_v33, %v4550_v61  ;;  %v4339_v57 = vadd.f32 %v4338_v52, %v4184_v19 }
 0x331   :  { %v4555_v53 = vmul.f32 %v4488_v59, %v8689_v21  ;;  %v4492_v54 = vadd.f32 %v4491_v27, %v4337_v47  ;;  %v4342_v49 = vpop.f32.mrf.mxu1  ;;  %v4493_v6 = vpop.f32.mrf.mxu0 }
 0x332   :  { %v4636_v30 = vrot.slane %v4635_v44, 1  ;;  %v4645_v2 = vadd.f32 %v4644_v5, %v4643_v63  ;;  %v4343_v1 = vadd.f32 %v4342_v49, %v4188_v10  ;;  %v4494_v20 = vadd.f32 %v4493_v6, %v4339_v57 }
 0x333   :  { %v4678_v36 = vadd.f32 %v4555_v53, %v4551_v3  ;;  %v4558_v8 = vmul.f32 %v4492_v54, %v8691_v7  ;;  %v4344_v56 = vpop.f32.mrf.mxu1  ;;  %v4497_v26 = vpop.f32.mrf.mxu0 }
 0x334   :  { %v4646_v15 = vrot.slane %v4645_v2, 1  ;;  %v4559_v21 = vmul.f32 %v4494_v20, %v8693_v60  ;;  %v4345_v28 = vadd.f32 %v4344_v56, %v4190_v24  ;;  %v4637_v0 = vadd.f32 %v4636_v30, %v4635_v44 }
 0x335   :  { %v4669_v46 = vadd.f32 %v4668_v42, %v4558_v8  ;;  %v4498_v51 = vadd.f32 %v4497_v26, %v4343_v1  ;;  %v4348_v23 = vpop.f32.mrf.mxu1  ;;  %v4499_v11 = vpop.f32.mrf.mxu0 }
 0x336   :  { %v4647_v31 = vadd.f32 %v4646_v15, %v4645_v2  ;;  %v4679_v19 = vadd.f32 %v4678_v36, %v4559_v21  ;;  %v4349_v61 = vadd.f32 %v4348_v23, %v4194_v29  ;;  %v4500_v9 = vadd.f32 %v4499_v11, %v4345_v28 }
 0x337   :  { %v4562_v7 = vmul.f32 %v4498_v51, %v8716_v34  ;;  %v4350_v62 = vpop.f32.mrf.mxu1  ;;  %v4503_v39 = vpop.f32.mrf.mxu0 }
 0x338   :  { %v4703_v32 = vcombine.low %v4637_v0, %v4647_v31  ;;  %v4563_v63 = vmul.f32 %v4500_v9, %v8728_v18  ;;  %v4351_v60 = vadd.f32 %v4350_v62, %v4196_v16  ;;  %v4504_v33 = vadd.f32 %v4503_v39, %v4349_v61 }
 0x339   :  { %v4670_v47 = vadd.f32 %v4669_v46, %v4562_v7  ;;  %v4505_v22 = vpop.f32.mrf.mxu0 }
 0x33a   :  { %v4716_v45 = vrot.slane %v4703_v32, 7  ;;  %v4680_v40 = vadd.f32 %v4679_v19, %v4563_v63  ;;  %v4566_v4 = vmul.f32 %v4504_v33, %v8740_v17  ;;  %v4506_v43 = vadd.f32 %v4505_v22, %v4351_v60 }
 0x33c   :  { %v4671_v37 = vadd.f32 %v4670_v47, %v4566_v4  ;;  %v4567_v12 = vmul.f32 %v4506_v43, %v8744_v50  ;;  %v4717_v34 = vsel %vm4707_vm6, %v4716_v45, %v4701_v48 }
 0x33d   :  { %v4718_v10 = vsel %vm4709_vm7, %v4716_v45, %v4717_v34 }
 0x33e   :  { %v4672_v18 = vrot.slane %v4671_v37, 4  ;;  %v4681_v59 = vadd.f32 %v4680_v40, %v4567_v12 }
 0x340   :  { %v4673_v52 = vadd.f32 %v4672_v18, %v4671_v37  ;;  %v4682_v27 = vrot.slane %v4681_v59, 4 }
 0x342   :  { %v4674_v44 = vrot.slane %v4673_v52, 2  ;;  %v4683_v5 = vadd.f32 %v4682_v27, %v4681_v59 }
 0x344   :  { %v4675_v42 = vadd.f32 %v4674_v44, %v4673_v52  ;;  %v4684_v57 = vrot.slane %v4683_v5, 2 }
 0x346   :  { %v4676_v17 = vrot.slane %v4675_v42, 1  ;;  %v4685_v14 = vadd.f32 %v4684_v57, %v4683_v5 }
 0x348   :  { %v4686_v24 = vrot.slane %v4685_v14, 1  ;;  %v4677_v3 = vadd.f32 %v4676_v17, %v4675_v42 }
 0x34a   :  { %v4687_v50 = vadd.f32 %v4686_v24, %v4685_v14 }
 0x34c   :  { %v4705_v53 = vcombine.low %v4677_v3, %v4687_v50 }
 0x34e   :  { %v4719_v41 = vrot.slane %v4705_v53, 6 }
 0x350   :  { %v4720_v58 = vsel %vm4712_vm8, %v4719_v41, %v4718_v10 }
 0x351   :  { %v4721_v48 = vsel %vm4714_vm9, %v4719_v41, %v4720_v58 }
 0x352   :  { %4725 = vst [vmem:[#allocation7 + $0x8] sm:$0x77] %v4721_v48 }
 0x353   :  { %4995 = shalt.err (!%p4992_p0)
}
 0x354   :  { %4735 = dma.vmem_to_hbm [thread:$0]  %s4733_s1, 256, %s8822_s2, [#allocation4]  }
 0x355   :  { %5008 = dma.done.wait [#allocation4], 256  }
 0x356   :  { %5009 = vsyncadd [#allocation4], 4294967040 }
 0x357   :  { %4739 = vsyncpa [#allocation3], 1 }
 0x358   :  { %4740 = vsyncpa [#allocation6], 1 }
 0x359   :  { %4741 = vsyncpa [#allocation4], 1 }

</bundles_post_ra>
